<compile_context>
chip_gen: v7x
topology: tpu7x:2x2x1
jax: 0.10.0
libtpu: 0.0.40
codegen_flags: <defaults>
</compile_context>

<pallas_src>
import functools

import jax
import jax.numpy as jnp
from jax.experimental import pallas as pl
from jax.experimental.pallas import tpu as pltpu

LANE = 128                       # lane width; channel-padding / Cout tile size
VMEM_LIMIT = 48 * 1024 * 1024    # leaves headroom inside v7x's 64 MiB VMEM


def _round_up(x, m):
    return (x + m - 1) // m * m


def _pick_tile(n, cap=1024):
    for t in (cap, 512, 256, 128, 64, 32, 16, 8):
        if t <= n and n % t == 0:
            return t
    return n


# ----------------------------- in-kernel helpers -----------------------------

def _maxpool2x2(y, hpool_ref):
    """2x2 / stride-2 max-pool: y (H, W, C) -> (H//2, W//2, C).

    H-direction pool uses a layout-free reshape + contiguous slices; the
    W-direction (sublane) pool round-trips through a VMEM scratch so the
    even/odd columns can be read back with stride-2 `pl.ds` loads.
    """
    H, W, C = y.shape
    Ho, Wo = H // 2, W // 2
    y2 = y.reshape(Ho, 2 * W, C)              # rows [0:W] = even h, [W:2W] = odd h
    hpool_ref[...] = jnp.maximum(y2[:, :W, :], y2[:, W:, :]).astype(hpool_ref.dtype)
    return jnp.maximum(hpool_ref[:, pl.ds(0, Wo, stride=2), :],
                       hpool_ref[:, pl.ds(1, Wo, stride=2), :])


# ------------------------- fused conv(+ReLU)(+pool) --------------------------

def _conv3x3_kernel(x_ref, w_ref, b_ref, o_ref, *scratch, H, W, do_relu, do_pool):
    # x_ref: (1, H+2, W+2, Cp)  bf16  spatially padded input, channels padded
    # w_ref: (3, 3, Cp, TN)     bf16  one Cout tile of the conv weight
    # b_ref: (1, TN)            f32
    # o_ref: (1, Ho, Wo, TN)    bf16  (Ho, Wo = H//2, W//2 when pooling)
    cp = x_ref.shape[-1]
    tn = o_ref.shape[-1]

    # 3x3 'same' conv as 9 shifted (H*W, Cp) x (Cp, TN) MXU matmuls, f32 acc.
    # Bias is folded into the accumulator init (hoisted broadcast, done once).
    acc = jnp.broadcast_to(b_ref[...], (H * W, tn)).astype(jnp.float32)
    for kh in range(3):
        for kw in range(3):
            win = x_ref[0, kh:kh + H, kw:kw + W, :].reshape(H * W, cp)
            acc = acc + jnp.dot(win, w_ref[kh, kw],
                                preferred_element_type=jnp.float32)

    if do_relu:
        acc = jnp.maximum(acc, 0.0)              # fused ReLU (f32 epilogue)
    if do_pool:
        y = _maxpool2x2(acc.reshape(H, W, tn), scratch[0])   # fused 2x2 max-pool
        o_ref[0] = y.astype(o_ref.dtype)
    else:
        o_ref[0] = acc.reshape(H, W, tn).astype(o_ref.dtype)


def conv3x3_block(x, w_oihw, b, *, do_relu, do_pool):
    """Fused Conv3x3(pad=1) [+ReLU] [+MaxPool2x2] on a channel-padded NHWC bf16
    activation.  Returns an NHWC bf16 activation with Cout padded to 128."""
    N, H, W, cp = x.shape
    cout, cin = w_oihw.shape[0], w_oihw.shape[1]
    cop = _round_up(cout, LANE)
    tn = LANE
    if do_pool:
        assert H % 2 == 0 and W % 2 == 0, "2x2 max-pool needs even H, W"
    Ho, Wo = (H // 2, W // 2) if do_pool else (H, W)

    # weights -> (3, 3, Cp, Cop) bf16, zero-padded on both channel axes.
    # bias    -> (1, Cop) f32.  Padded channels stay exactly zero end-to-end.
    w = jnp.transpose(w_oihw, (2, 3, 1, 0))
    w = jnp.pad(w, ((0, 0), (0, 0), (0, cp - cin), (0, cop - cout)))
    w = w.astype(jnp.bfloat16)
    bias = jnp.pad(b, (0, cop - cout)).astype(jnp.float32).reshape(1, cop)

    # spatial 'same' halo (cheap bf16 pad; the 9-tap shifts happen in-kernel,
    # so there is no 9x im2col expansion in HBM).
    xs = jnp.pad(x, ((0, 0), (1, 1), (1, 1), (0, 0)))

    kernel = functools.partial(_conv3x3_kernel, H=H, W=W,
                               do_relu=do_relu, do_pool=do_pool)
    scratch = [pltpu.VMEM((H // 2, W, tn), jnp.float32)] if do_pool else []

    flops = 2 * N * H * W * (9 * cp) * cop
    bytes_accessed = (xs.size * 2 + w.size * 2 + bias.size * 4
                      + N * Ho * Wo * cop * 2)

    return pl.pallas_call(
        kernel,
        out_shape=jax.ShapeDtypeStruct((N, Ho, Wo, cop), jnp.bfloat16),
        # j (Cout tile) is the fast axis -> the (large) activation block index
        # is unchanged across it and is not re-DMA'd; only the weight tile moves.
        grid=(N, cop // tn),
        in_specs=[
            pl.BlockSpec((1, H + 2, W + 2, cp), lambda n, j: (n, 0, 0, 0)),
            pl.BlockSpec((3, 3, cp, tn), lambda n, j: (0, 0, 0, j)),
            pl.BlockSpec((1, tn), lambda n, j: (0, j)),
        ],
        out_specs=pl.BlockSpec((1, Ho, Wo, tn), lambda n, j: (n, 0, 0, j)),
        scratch_shapes=scratch,
        compiler_params=pltpu.CompilerParams(
            dimension_semantics=("parallel", "parallel"),
            vmem_limit_bytes=VMEM_LIMIT),
        cost_estimate=pl.CostEstimate(flops=flops, transcendentals=0,
                                      bytes_accessed=bytes_accessed),
    )(xs, w, bias)


# ------------------ standalone ReLU / pool (unfused fallback) ----------------

def _relu_kernel(x_ref, o_ref):
    # f32 compare (safe on v5e's bf16-less VPU), bf16 only at the store.
    o_ref[...] = jnp.maximum(x_ref[...].astype(jnp.float32), 0.0).astype(o_ref.dtype)


def relu_op(x):
    N, H, W, cp = x.shape
    rows = N * H * W
    tm = _pick_tile(rows)
    x2 = x.reshape(rows, cp)
    out = pl.pallas_call(
        _relu_kernel,
        out_shape=jax.ShapeDtypeStruct((rows, cp), x.dtype),
        grid=(rows // tm, cp // LANE),
        in_specs=[pl.BlockSpec((tm, LANE), lambda i, j: (i, j))],
        out_specs=pl.BlockSpec((tm, LANE), lambda i, j: (i, j)),
        compiler_params=pltpu.CompilerParams(
            dimension_semantics=("parallel", "parallel"),
            vmem_limit_bytes=VMEM_LIMIT),
    )(x2)
    return out.reshape(N, H, W, cp)


def _maxpool2_kernel(x_ref, o_ref, hpool_ref):
    y = x_ref[0].astype(jnp.float32)
    o_ref[0] = _maxpool2x2(y, hpool_ref).astype(o_ref.dtype)


def maxpool_op(x):
    N, H, W, cp = x.shape
    assert H % 2 == 0 and W % 2 == 0, "2x2 max-pool needs even H, W"
    Ho, Wo = H // 2, W // 2
    return pl.pallas_call(
        _maxpool2_kernel,
        out_shape=jax.ShapeDtypeStruct((N, Ho, Wo, cp), x.dtype),
        grid=(N, cp // LANE),
        in_specs=[pl.BlockSpec((1, H, W, LANE), lambda n, j: (n, 0, 0, j))],
        out_specs=pl.BlockSpec((1, Ho, Wo, LANE), lambda n, j: (n, 0, 0, j)),
        scratch_shapes=[pltpu.VMEM((Ho, W, LANE), jnp.float32)],
        compiler_params=pltpu.CompilerParams(
            dimension_semantics=("parallel", "parallel"),
            vmem_limit_bytes=VMEM_LIMIT),
    )(x)


# ------------------------------- VGG2 forward --------------------------------

def make_vgg_features(key, cfg, in_ch):
    """cfg entries: int -> Conv3x3(in,out,pad=1), 'R' -> ReLU, 'M' -> MaxPool2."""
    layers = []
    ch = in_ch
    for item in cfg:
        if item == "M":
            layers.append(("pool",))
        elif item == "R":
            layers.append(("relu",))
        else:
            key, kw, kb = jax.random.split(key, 3)
            w = jax.random.normal(kw, (item, ch, 3, 3), jnp.float32) * 0.1
            b = jax.random.normal(kb, (item,), jnp.float32) * 0.1
            layers.append(("conv", w, b))
            ch = item
    return layers


def vgg2_forward(x_nchw, layers, target_layer):
    """Mirrors VGG2.forward: run features[0..target_layer], return that activation."""
    target_layer = int(target_layer)
    if target_layer == -1:
        return x_nchw
    n = len(layers)

    # NCHW -> NHWC; pad channels to a multiple of 128 (lane axis) once; bf16
    # activations flow between layers (half the inter-layer HBM traffic).
    x = jnp.transpose(x_nchw, (0, 2, 3, 1))
    true_c = x.shape[-1]
    cp = _round_up(true_c, LANE)
    x = jnp.pad(x, ((0, 0), (0, 0), (0, 0), (0, cp - true_c))).astype(jnp.bfloat16)

    i = 0
    while i < n:
        kind = layers[i][0]
        if kind == "conv":
            w, b = layers[i][1], layers[i][2]
            # fuse the following ReLU / pool ONLY if they are before/at the
            # target layer (so the returned activation matches PyTorch exactly).
            fuse_relu = (i + 1 < n and i + 1 <= target_layer
                         and layers[i + 1][0] == "relu")
            fuse_pool = (fuse_relu and i + 2 < n and i + 2 <= target_layer
                         and layers[i + 2][0] == "pool")
            x = conv3x3_block(x, w, b, do_relu=fuse_relu, do_pool=fuse_pool)
            true_c = w.shape[0]
            last = i + (2 if fuse_pool else (1 if fuse_relu else 0))
        elif kind == "relu":
            x = relu_op(x)
            last = i
        else:  # "pool"
            x = maxpool_op(x)
            last = i
        if last == target_layer:
            out = x[..., :true_c]                      # drop channel padding
            return jnp.transpose(out, (0, 3, 1, 2)).astype(jnp.float32)
        i = last + 1
    return None  # like the PyTorch module: falls off the end -> returns None


# ----------------------------- pure-JAX reference ----------------------------

def vgg2_reference(x_nchw, layers, target_layer):
    t = int(target_layer)
    if t == -1:
        return x_nchw
    x = x_nchw
    for ii, layer in enumerate(layers):
        if layer[0] == "conv":
            w, b = layer[1], layer[2]
            x = jax.lax.conv_general_dilated(
                x, w, (1, 1), ((1, 1), (1, 1)),
                dimension_numbers=("NCHW", "OIHW", "NCHW"),
            ) + b[None, :, None, None]
        elif layer[0] == "relu":
            x = jnp.maximum(x, 0.0)
        else:
            x = jax.lax.reduce_window(
                x, -jnp.inf, jax.lax.max, (1, 1, 2, 2), (1, 1, 2, 2), "VALID")
        if ii == t:
            return x
    return None


# ------------------------------------ main ------------------------------------

if __name__ == "__main__":
    key = jax.random.PRNGKey(0)
    k_params, k_x, k_p2 = jax.random.split(key, 3)

    # small synthetic VGG features: conv(4->8), relu, pool, conv(8->16), relu, pool
    cfg = [8, "R", "M", 16, "R", "M"]
    layers = make_vgg_features(k_params, cfg, in_ch=4)
    x = jax.random.normal(k_x, (2, 4, 16, 16), jnp.float32)   # NCHW, like PyTorch

    # tolerance accounts for bf16 MXU inputs + bf16 activation storage
    TOL = 3e-2

    # target 4 (post second ReLU), target 5 (full stack), target 0 (conv only)
    for t in (4, 5, 0):
        out = jax.block_until_ready(vgg2_forward(x, layers, t))
        ref = vgg2_reference(x, layers, t)
        assert out.shape == ref.shape, (t, out.shape, ref.shape)
        err = float(jnp.max(jnp.abs(out - ref)))
        assert err < TOL, (t, err)

    # target_layer == -1 early-return path
    passthrough = jax.block_until_ready(vgg2_forward(x, layers, -1))
    assert jnp.array_equal(passthrough, x)

    # exercise the standalone (unfused) ReLU / max-pool kernels
    layers2 = make_vgg_features(k_p2, ["R", "M"], in_ch=4)
    out2 = jax.block_until_ready(vgg2_forward(x, layers2, 1))
    ref2 = vgg2_reference(x, layers2, 1)
    assert out2.shape == ref2.shape, (out2.shape, ref2.shape)
    assert float(jnp.max(jnp.abs(out2 - ref2))) < TOL

    print("KERNEL_OK")
</pallas_src>

<mosaic_0001>
module attributes {stable_mosaic.version = 11 : i64} {
  func.func @_conv3x3_kernel(%arg0: i32, %arg1: i32, %arg2: memref<1x18x18x128xbf16, #tpu.memory_space<vmem>>, %arg3: memref<3x3x128x128xbf16, #tpu.memory_space<vmem>>, %arg4: memref<1x128xf32, #tpu.memory_space<vmem>>, %arg5: memref<1x8x8x128xbf16, #tpu.memory_space<vmem>>, %arg6: memref<8x16x128xf32, #tpu.memory_space<vmem>>) attributes {dimension_semantics = [#tpu.dimension_semantics<parallel>, #tpu.dimension_semantics<parallel>], iteration_bounds = array<i64: 2, 1>, scalar_prefetch = 0 : i64, scratch_operands = 1 : i64, tpu.core_type = #tpu.core_type<tc>, window_params = [{transform_indices = @transform_0, window_bounds = array<i64: 1, 18, 18, 128>}, {transform_indices = @transform_1, window_bounds = array<i64: 3, 3, 128, 128>}, {transform_indices = @transform_2, window_bounds = array<i64: 1, 128>}, {transform_indices = @transform_3, window_bounds = array<i64: 1, 8, 8, 128>}]} {
    %c0 = arith.constant 0 : index
    %c0_0 = arith.constant 0 : index
    %0 = vector.load %arg4[%c0, %c0_0] : memref<1x128xf32, #tpu.memory_space<vmem>>, vector<1x128xf32>
    %1 = vector.shape_cast %0 : vector<1x128xf32> to vector<1x128xf32>
    %2 = vector.broadcast %1 : vector<1x128xf32> to vector<256x128xf32>
    %c0_1 = arith.constant 0 : index
    %c0_2 = arith.constant 0 : index
    %c0_3 = arith.constant 0 : index
    %c0_4 = arith.constant 0 : index
    %3 = vector.load %arg2[%c0_1, %c0_2, %c0_3, %c0_4] : memref<1x18x18x128xbf16, #tpu.memory_space<vmem>>, vector<1x16x16x128xbf16>
    %4 = vector.shape_cast %3 : vector<1x16x16x128xbf16> to vector<16x16x128xbf16>
    %5 = vector.shape_cast %4 : vector<16x16x128xbf16> to vector<256x128xbf16>
    %c0_5 = arith.constant 0 : index
    %c0_6 = arith.constant 0 : index
    %c0_7 = arith.constant 0 : index
    %c0_8 = arith.constant 0 : index
    %6 = vector.load %arg3[%c0_5, %c0_6, %c0_7, %c0_8] : memref<3x3x128x128xbf16, #tpu.memory_space<vmem>>, vector<1x1x128x128xbf16>
    %7 = vector.shape_cast %6 : vector<1x1x128x128xbf16> to vector<128x128xbf16>
    %cst = arith.constant dense<0.000000e+00> : vector<256x128xf32>
    %8 = tpu.matmul %5, %7, %cst {dimension_numbers = #tpu.dot_dimension_numbers<[1], [0], [0], [1], [0, 0, 1, 1], [], []>} : vector<256x128xbf16>, vector<128x128xbf16>, vector<256x128xf32> -> vector<256x128xf32>
    %9 = arith.addf %2, %8 : vector<256x128xf32>
    %c0_9 = arith.constant 0 : index
    %c0_10 = arith.constant 0 : index
    %c1 = arith.constant 1 : index
    %c0_11 = arith.constant 0 : index
    %10 = vector.load %arg2[%c0_9, %c0_10, %c1, %c0_11] : memref<1x18x18x128xbf16, #tpu.memory_space<vmem>>, vector<1x16x16x128xbf16>
    %11 = vector.shape_cast %10 : vector<1x16x16x128xbf16> to vector<16x16x128xbf16>
    %12 = vector.shape_cast %11 : vector<16x16x128xbf16> to vector<256x128xbf16>
    %c0_12 = arith.constant 0 : index
    %c1_13 = arith.constant 1 : index
    %c0_14 = arith.constant 0 : index
    %c0_15 = arith.constant 0 : index
    %13 = vector.load %arg3[%c0_12, %c1_13, %c0_14, %c0_15] : memref<3x3x128x128xbf16, #tpu.memory_space<vmem>>, vector<1x1x128x128xbf16>
    %14 = vector.shape_cast %13 : vector<1x1x128x128xbf16> to vector<128x128xbf16>
    %cst_16 = arith.constant dense<0.000000e+00> : vector<256x128xf32>
    %15 = tpu.matmul %12, %14, %cst_16 {dimension_numbers = #tpu.dot_dimension_numbers<[1], [0], [0], [1], [0, 0, 1, 1], [], []>} : vector<256x128xbf16>, vector<128x128xbf16>, vector<256x128xf32> -> vector<256x128xf32>
    %16 = arith.addf %9, %15 : vector<256x128xf32>
    %c0_17 = arith.constant 0 : index
    %c0_18 = arith.constant 0 : index
    %c2 = arith.constant 2 : index
    %c0_19 = arith.constant 0 : index
    %17 = vector.load %arg2[%c0_17, %c0_18, %c2, %c0_19] : memref<1x18x18x128xbf16, #tpu.memory_space<vmem>>, vector<1x16x16x128xbf16>
    %18 = vector.shape_cast %17 : vector<1x16x16x128xbf16> to vector<16x16x128xbf16>
    %19 = vector.shape_cast %18 : vector<16x16x128xbf16> to vector<256x128xbf16>
    %c0_20 = arith.constant 0 : index
    %c2_21 = arith.constant 2 : index
    %c0_22 = arith.constant 0 : index
    %c0_23 = arith.constant 0 : index
    %20 = vector.load %arg3[%c0_20, %c2_21, %c0_22, %c0_23] : memref<3x3x128x128xbf16, #tpu.memory_space<vmem>>, vector<1x1x128x128xbf16>
    %21 = vector.shape_cast %20 : vector<1x1x128x128xbf16> to vector<128x128xbf16>
    %cst_24 = arith.constant dense<0.000000e+00> : vector<256x128xf32>
    %22 = tpu.matmul %19, %21, %cst_24 {dimension_numbers = #tpu.dot_dimension_numbers<[1], [0], [0], [1], [0, 0, 1, 1], [], []>} : vector<256x128xbf16>, vector<128x128xbf16>, vector<256x128xf32> -> vector<256x128xf32>
    %23 = arith.addf %16, %22 : vector<256x128xf32>
    %c0_25 = arith.constant 0 : index
    %c1_26 = arith.constant 1 : index
    %c0_27 = arith.constant 0 : index
    %c0_28 = arith.constant 0 : index
    %24 = vector.load %arg2[%c0_25, %c1_26, %c0_27, %c0_28] : memref<1x18x18x128xbf16, #tpu.memory_space<vmem>>, vector<1x16x16x128xbf16>
    %25 = vector.shape_cast %24 : vector<1x16x16x128xbf16> to vector<16x16x128xbf16>
    %26 = vector.shape_cast %25 : vector<16x16x128xbf16> to vector<256x128xbf16>
    %c1_29 = arith.constant 1 : index
    %c0_30 = arith.constant 0 : index
    %c0_31 = arith.constant 0 : index
    %c0_32 = arith.constant 0 : index
    %27 = vector.load %arg3[%c1_29, %c0_30, %c0_31, %c0_32] : memref<3x3x128x128xbf16, #tpu.memory_space<vmem>>, vector<1x1x128x128xbf16>
    %28 = vector.shape_cast %27 : vector<1x1x128x128xbf16> to vector<128x128xbf16>
    %cst_33 = arith.constant dense<0.000000e+00> : vector<256x128xf32>
    %29 = tpu.matmul %26, %28, %cst_33 {dimension_numbers = #tpu.dot_dimension_numbers<[1], [0], [0], [1], [0, 0, 1, 1], [], []>} : vector<256x128xbf16>, vector<128x128xbf16>, vector<256x128xf32> -> vector<256x128xf32>
    %30 = arith.addf %23, %29 : vector<256x128xf32>
    %c0_34 = arith.constant 0 : index
    %c1_35 = arith.constant 1 : index
    %c1_36 = arith.constant 1 : index
    %c0_37 = arith.constant 0 : index
    %31 = vector.load %arg2[%c0_34, %c1_35, %c1_36, %c0_37] : memref<1x18x18x128xbf16, #tpu.memory_space<vmem>>, vector<1x16x16x128xbf16>
    %32 = vector.shape_cast %31 : vector<1x16x16x128xbf16> to vector<16x16x128xbf16>
    %33 = vector.shape_cast %32 : vector<16x16x128xbf16> to vector<256x128xbf16>
    %c1_38 = arith.constant 1 : index
    %c1_39 = arith.constant 1 : index
    %c0_40 = arith.constant 0 : index
    %c0_41 = arith.constant 0 : index
    %34 = vector.load %arg3[%c1_38, %c1_39, %c0_40, %c0_41] : memref<3x3x128x128xbf16, #tpu.memory_space<vmem>>, vector<1x1x128x128xbf16>
    %35 = vector.shape_cast %34 : vector<1x1x128x128xbf16> to vector<128x128xbf16>
    %cst_42 = arith.constant dense<0.000000e+00> : vector<256x128xf32>
    %36 = tpu.matmul %33, %35, %cst_42 {dimension_numbers = #tpu.dot_dimension_numbers<[1], [0], [0], [1], [0, 0, 1, 1], [], []>} : vector<256x128xbf16>, vector<128x128xbf16>, vector<256x128xf32> -> vector<256x128xf32>
    %37 = arith.addf %30, %36 : vector<256x128xf32>
    %c0_43 = arith.constant 0 : index
    %c1_44 = arith.constant 1 : index
    %c2_45 = arith.constant 2 : index
    %c0_46 = arith.constant 0 : index
    %38 = vector.load %arg2[%c0_43, %c1_44, %c2_45, %c0_46] : memref<1x18x18x128xbf16, #tpu.memory_space<vmem>>, vector<1x16x16x128xbf16>
    %39 = vector.shape_cast %38 : vector<1x16x16x128xbf16> to vector<16x16x128xbf16>
    %40 = vector.shape_cast %39 : vector<16x16x128xbf16> to vector<256x128xbf16>
    %c1_47 = arith.constant 1 : index
    %c2_48 = arith.constant 2 : index
    %c0_49 = arith.constant 0 : index
    %c0_50 = arith.constant 0 : index
    %41 = vector.load %arg3[%c1_47, %c2_48, %c0_49, %c0_50] : memref<3x3x128x128xbf16, #tpu.memory_space<vmem>>, vector<1x1x128x128xbf16>
    %42 = vector.shape_cast %41 : vector<1x1x128x128xbf16> to vector<128x128xbf16>
    %cst_51 = arith.constant dense<0.000000e+00> : vector<256x128xf32>
    %43 = tpu.matmul %40, %42, %cst_51 {dimension_numbers = #tpu.dot_dimension_numbers<[1], [0], [0], [1], [0, 0, 1, 1], [], []>} : vector<256x128xbf16>, vector<128x128xbf16>, vector<256x128xf32> -> vector<256x128xf32>
    %44 = arith.addf %37, %43 : vector<256x128xf32>
    %c0_52 = arith.constant 0 : index
    %c2_53 = arith.constant 2 : index
    %c0_54 = arith.constant 0 : index
    %c0_55 = arith.constant 0 : index
    %45 = vector.load %arg2[%c0_52, %c2_53, %c0_54, %c0_55] : memref<1x18x18x128xbf16, #tpu.memory_space<vmem>>, vector<1x16x16x128xbf16>
    %46 = vector.shape_cast %45 : vector<1x16x16x128xbf16> to vector<16x16x128xbf16>
    %47 = vector.shape_cast %46 : vector<16x16x128xbf16> to vector<256x128xbf16>
    %c2_56 = arith.constant 2 : index
    %c0_57 = arith.constant 0 : index
    %c0_58 = arith.constant 0 : index
    %c0_59 = arith.constant 0 : index
    %48 = vector.load %arg3[%c2_56, %c0_57, %c0_58, %c0_59] : memref<3x3x128x128xbf16, #tpu.memory_space<vmem>>, vector<1x1x128x128xbf16>
    %49 = vector.shape_cast %48 : vector<1x1x128x128xbf16> to vector<128x128xbf16>
    %cst_60 = arith.constant dense<0.000000e+00> : vector<256x128xf32>
    %50 = tpu.matmul %47, %49, %cst_60 {dimension_numbers = #tpu.dot_dimension_numbers<[1], [0], [0], [1], [0, 0, 1, 1], [], []>} : vector<256x128xbf16>, vector<128x128xbf16>, vector<256x128xf32> -> vector<256x128xf32>
    %51 = arith.addf %44, %50 : vector<256x128xf32>
    %c0_61 = arith.constant 0 : index
    %c2_62 = arith.constant 2 : index
    %c1_63 = arith.constant 1 : index
    %c0_64 = arith.constant 0 : index
    %52 = vector.load %arg2[%c0_61, %c2_62, %c1_63, %c0_64] : memref<1x18x18x128xbf16, #tpu.memory_space<vmem>>, vector<1x16x16x128xbf16>
    %53 = vector.shape_cast %52 : vector<1x16x16x128xbf16> to vector<16x16x128xbf16>
    %54 = vector.shape_cast %53 : vector<16x16x128xbf16> to vector<256x128xbf16>
    %c2_65 = arith.constant 2 : index
    %c1_66 = arith.constant 1 : index
    %c0_67 = arith.constant 0 : index
    %c0_68 = arith.constant 0 : index
    %55 = vector.load %arg3[%c2_65, %c1_66, %c0_67, %c0_68] : memref<3x3x128x128xbf16, #tpu.memory_space<vmem>>, vector<1x1x128x128xbf16>
    %56 = vector.shape_cast %55 : vector<1x1x128x128xbf16> to vector<128x128xbf16>
    %cst_69 = arith.constant dense<0.000000e+00> : vector<256x128xf32>
    %57 = tpu.matmul %54, %56, %cst_69 {dimension_numbers = #tpu.dot_dimension_numbers<[1], [0], [0], [1], [0, 0, 1, 1], [], []>} : vector<256x128xbf16>, vector<128x128xbf16>, vector<256x128xf32> -> vector<256x128xf32>
    %58 = arith.addf %51, %57 : vector<256x128xf32>
    %c0_70 = arith.constant 0 : index
    %c2_71 = arith.constant 2 : index
    %c2_72 = arith.constant 2 : index
    %c0_73 = arith.constant 0 : index
    %59 = vector.load %arg2[%c0_70, %c2_71, %c2_72, %c0_73] : memref<1x18x18x128xbf16, #tpu.memory_space<vmem>>, vector<1x16x16x128xbf16>
    %60 = vector.shape_cast %59 : vector<1x16x16x128xbf16> to vector<16x16x128xbf16>
    %61 = vector.shape_cast %60 : vector<16x16x128xbf16> to vector<256x128xbf16>
    %c2_74 = arith.constant 2 : index
    %c2_75 = arith.constant 2 : index
    %c0_76 = arith.constant 0 : index
    %c0_77 = arith.constant 0 : index
    %62 = vector.load %arg3[%c2_74, %c2_75, %c0_76, %c0_77] : memref<3x3x128x128xbf16, #tpu.memory_space<vmem>>, vector<1x1x128x128xbf16>
    %63 = vector.shape_cast %62 : vector<1x1x128x128xbf16> to vector<128x128xbf16>
    %cst_78 = arith.constant dense<0.000000e+00> : vector<256x128xf32>
    %64 = tpu.matmul %61, %63, %cst_78 {dimension_numbers = #tpu.dot_dimension_numbers<[1], [0], [0], [1], [0, 0, 1, 1], [], []>} : vector<256x128xbf16>, vector<128x128xbf16>, vector<256x128xf32> -> vector<256x128xf32>
    %65 = arith.addf %58, %64 : vector<256x128xf32>
    %cst_79 = arith.constant 0.000000e+00 : f32
    %66 = vector.broadcast %cst_79 : f32 to vector<256x128xf32>
    %67 = arith.maximumf %65, %66 : vector<256x128xf32>
    %68 = vector.shape_cast %67 : vector<256x128xf32> to vector<16x16x128xf32>
    %69 = vector.shape_cast %68 : vector<16x16x128xf32> to vector<8x32x128xf32>
    %70 = vector.extract_strided_slice %69 {offsets = [0, 0, 0], sizes = [8, 16, 128], strides = [1, 1, 1]} : vector<8x32x128xf32> to vector<8x16x128xf32>
    %71 = vector.extract_strided_slice %69 {offsets = [0, 16, 0], sizes = [8, 16, 128], strides = [1, 1, 1]} : vector<8x32x128xf32> to vector<8x16x128xf32>
    %72 = arith.maximumf %70, %71 : vector<8x16x128xf32>
    %c0_80 = arith.constant 0 : index
    %c0_81 = arith.constant 0 : index
    %c0_82 = arith.constant 0 : index
    %73 = vector.load %arg6[%c0_80, %c0_81, %c0_82] : memref<8x16x128xf32, #tpu.memory_space<vmem>>, vector<8x16x128xf32>
    tpu.vector_store %arg6[%c0_80, %c0_81, %c0_82], %72 {strides = array<i32>} : memref<8x16x128xf32, #tpu.memory_space<vmem>>, vector<8x16x128xf32>,
    %c0_83 = arith.constant 0 : index
    %c0_84 = arith.constant 0 : index
    %c0_85 = arith.constant 0 : index
    %74 = tpu.strided_load %arg6[%c0_83, %c0_84, %c0_85] {strides = array<i32: 1, 2, 1>} : memref<8x16x128xf32, #tpu.memory_space<vmem>>, vector<8x8x128xf32>
    %c0_86 = arith.constant 0 : index
    %c1_87 = arith.constant 1 : index
    %c0_88 = arith.constant 0 : index
    %75 = tpu.strided_load %arg6[%c0_86, %c1_87, %c0_88] {strides = array<i32: 1, 2, 1>} : memref<8x16x128xf32, #tpu.memory_space<vmem>>, vector<8x8x128xf32>
    %76 = arith.maximumf %74, %75 : vector<8x8x128xf32>
    %77 = arith.truncf %76 : vector<8x8x128xf32> to vector<8x8x128xbf16>
    %c0_89 = arith.constant 0 : index
    %c0_90 = arith.constant 0 : index
    %c0_91 = arith.constant 0 : index
    %c0_92 = arith.constant 0 : index
    %78 = vector.load %arg5[%c0_89, %c0_90, %c0_91, %c0_92] : memref<1x8x8x128xbf16, #tpu.memory_space<vmem>>, vector<1x8x8x128xbf16>
    %79 = vector.shape_cast %78 : vector<1x8x8x128xbf16> to vector<8x8x128xbf16>
    %80 = vector.shape_cast %77 : vector<8x8x128xbf16> to vector<1x8x8x128xbf16>
    tpu.vector_store %arg5[%c0_89, %c0_90, %c0_91, %c0_92], %80 {strides = array<i32>} : memref<1x8x8x128xbf16, #tpu.memory_space<vmem>>, vector<1x8x8x128xbf16>,
    return
  }
  func.func @transform_0(%arg0: i32, %arg1: i32) -> (i32, i32, i32, i32) {
    %c0_i32 = arith.constant 0 : i32
    %c0_i32_0 = arith.constant 0 : i32
    %c0_i32_1 = arith.constant 0 : i32
    %c0_i32_2 = arith.constant 0 : i32
    return %arg0, %c0_i32, %c0_i32_0, %c0_i32_1 : i32, i32, i32, i32
  }
  func.func @transform_1(%arg0: i32, %arg1: i32) -> (i32, i32, i32, i32) {
    %c0_i32 = arith.constant 0 : i32
    %c0_i32_0 = arith.constant 0 : i32
    %c0_i32_1 = arith.constant 0 : i32
    %c0_i32_2 = arith.constant 0 : i32
    return %c0_i32, %c0_i32_0, %c0_i32_1, %arg1 : i32, i32, i32, i32
  }
  func.func @transform_2(%arg0: i32, %arg1: i32) -> (i32, i32) {
    %c0_i32 = arith.constant 0 : i32
    %c0_i32_0 = arith.constant 0 : i32
    return %c0_i32, %arg1 : i32, i32
  }
  func.func @transform_3(%arg0: i32, %arg1: i32) -> (i32, i32, i32, i32) {
    %c0_i32 = arith.constant 0 : i32
    %c0_i32_0 = arith.constant 0 : i32
    %c0_i32_1 = arith.constant 0 : i32
    return %arg0, %c0_i32, %c0_i32_0, %arg1 : i32, i32, i32, i32
  }
}

</mosaic_0001>

<bundles_post_ra>
// kernel: tpu_custom_call.1
= control target key start
LH: loop header
LB: loop body
LE: loop exit
PB: predicated region body
PF: predicated region fallthrough
CT: control target
= control target key end

     0   :  { %8 = vsyncpa [#allocation4], 0  ;;  %s8929_s0 = inlined_call_operand.vmem [shape: bf16[2,18,18,128], index: 0, kind: input, shape index: {}]   ;;  %s8930_s1 = inlined_call_operand.vmem [shape: bf16[3,3,128,128], index: 1, kind: input, shape index: {}]   ;;  %s8931_s2 = inlined_call_operand.vmem [shape: f32[1,128], index: 2, kind: input, shape index: {}]   ;;  %s8932_s3 = inlined_call_operand.hbm [shape: bf16[2,8,8,128], index: 3, kind: output, shape index: {}]  }
   0x1   :  { %10 = vsyncpa [#allocation4 + $0x1], 0  ;;  %s7262_s12 = smov 0   ;;  %s7264_s13 = smov 0  }
   0x2   :  { %s7266_s14 = smov 0   ;;  %s7268_s15 = smov 0  }
   0x3   :  { %s7270_s16 = smov 0   ;;  %s7272_s17 = smov 0  }
   0x4 LB: > { %s5376_s18 = sadd.s32 4294967295, %s7237_s17   ;;  %s5377_s19 = sadd.s32 4294967294, %s7237_s17   ;;  %s7237_s17 = sphi %s7272_s17, %s16_s17   ;;  %s7233_s16 = sphi %s7270_s16, %s8943_s16   ;;  %s7229_s15 = sphi %s7268_s15, %s8942_s15   ;;  %s7225_s14 = sphi %s7266_s14, %s8941_s14   ;;  %s7221_s13 = sphi %s7264_s13, %s8940_s13   ;;  %s7217_s12 = sphi %s7262_s12, %s8939_s12  }
   0x5   : > { %s28_s20 = sadd.s32 1, %s7233_s16  ;;  %s115_s21 = sadd.s32 1, %s7225_s14 }
   0x6   : > { %p30_p0 = scmp.ge.s32.totalorder %s28_s20, 2  ;;  %p125_p1 = scmp.ne.s32.totalorder %s7225_s14, %s7221_s13 }
   0x7   : > { %p126_p2 = scmp.eq.s32.totalorder %s5376_s18, 1  ;;  %p131_p3 = scmp.ne.s32.totalorder %s7221_s13, %s7217_s12 }
   0x8   : > { %s8945_s20 = smov (%p30_p0, %s28_s20), 0  ;;  %p132_p5 = scmp.eq.s32.totalorder %s5377_s19, 1 }
   0x9   : > { %p7302_p4 = por %p126_p2, %p125_p1  ;;  %s110_s23 = ssub.s32 %s7233_s16, %s8945_s20 }
   0xa   : > { %p5382_p6 = scmp.ge.s32.totalorder %s7237_s17, 1  ;;  %p113_p7 = scmp.eq.s32.totalorder %s110_s23, 0 }
   0xb   : > { %p7309_p8 = por %p132_p5, %p131_p3  ;;  %p171_p9 = scmp.lt.s32.totalorder %s7237_s17, 3 }
   0xc   : > { %s7315_s25 = scalar_select %p113_p7, %s7225_s14, %s115_s21  }
   0xd   : > { %p172_p10 = pnand %p5382_p6, %p171_p9 }
   0xe   : > { %v7009_v0 = vld [vmem:[%s8930_s1] sm:$0xff] (!%p172_p10)   ;;  %v7011_v2 = vld [vmem:[%s8930_s1 + $0x8] sm:$0xff] (!%p172_p10)   ;;  %p202_p11 = scmp.lt.s32.totalorder (!%p172_p10), %s7229_s15, 1  ;;  %v7013_v4 = vld [vmem:[%s8930_s1 + $0x10] sm:$0xff] (!%p172_p10)   ;;  %vm655_vm0 = vsmask.f32 (!%p172_p10), 3328 }
   0xf   : > { %175 = sbr.rel (%p172_p10) target bundleno = 583 (0x247), region = 32  ;;  %v7010_v1 = vld [vmem:[%s8930_s1 + $0x100] sm:$0xff] (!%p172_p10)   ;;  %6215 = vmatprep.subr.bf16.mxu1 (!%p172_p10), %v7009_v0  ;;  %v7012_v3 = vld [vmem:[%s8930_s1 + $0x108] sm:$0xff] (!%p172_p10)   ;;  %v7014_v5 = vld [vmem:[%s8930_s1 + $0x110] sm:$0xff] (!%p172_p10)   ;;  %vm656_vm1 = vsmask.f32 (!%p172_p10), 7440 }
  0x10   : > { %6407 = vmatprep.subr.bf16.mxu0 (!%p172_p10), %v7010_v1  ;;  %6216 = vmatpush3.bf16.msra.mxu1 (!%p172_p10), %v7009_v0  ;;  %v7015_v6 = vld [vmem:[%s8930_s1 + $0x18] sm:$0xff] (!%p172_p10)   ;;  %v7017_v8 = vld [vmem:[%s8930_s1 + $0x20] sm:$0xff] (!%p172_p10)   ;;  %v7019_v10 = vld [vmem:[%s8930_s1 + $0x28] sm:$0xff] (!%p172_p10)   ;;  %vm1428_vm3 = vcmask (!%p172_p10), 1042432   ;;  %vm1429_vm4 = vcmask (!%p172_p10), 1046532   ;;  %s199_s30 = sand.u32 (!%p172_p10), 1, %s7221_s13  }
  0x11   : > { %6408 = vmatpush3.bf16.msra.mxu0 (!%p172_p10), %v7010_v1  ;;  %6217 = vmatprep.subr.bf16.mxu1 (!%p172_p10), %v7011_v2  ;;  %v7016_v7 = vld [vmem:[%s8930_s1 + $0x118] sm:$0xff] (!%p172_p10)   ;;  %v7018_v9 = vld [vmem:[%s8930_s1 + $0x120] sm:$0xff] (!%p172_p10)   ;;  %v7020_v12 = vld [vmem:[%s8930_s1 + $0x128] sm:$0xff] (!%p172_p10)   ;;  %s5383_s4 = sshll.u32 (!%p172_p10), %s199_s30, 5  ;;  %s5975_s7 = sshll.u32 (!%p172_p10), %s7229_s15, 9 }
  0x12   : > { %6409 = vmatprep.subr.bf16.mxu0 (!%p172_p10), %v7012_v3  ;;  %v7021_v18 = vld [vmem:[%s8930_s1 + $0x30] sm:$0xff] (!%p172_p10)   ;;  %v7023_v28 = vld [vmem:[%s8930_s1 + $0x38] sm:$0xff] (!%p172_p10)   ;;  %vm7388_vm2 = vmor (!%p172_p10), %vm655_vm0, %vm656_vm1  ;;  %s8852_s5 = scalar_lea.vmem (!%p172_p10), [#allocation3], %s5383_s4  ;;  %s8883_s18 = scalar_lea.sflag (!%p172_p10), [#allocation4], %s199_s30 }
  0x13   : > { %v7022_v24 = vld [vmem:[%s8930_s1 + $0x130] sm:$0xff] (!%p172_p10)   ;;  %v7024_v32 = vld [vmem:[%s8930_s1 + $0x138] sm:$0xff] (!%p172_p10)   ;;  %v7027_v49 = vld [vmem:[%s8930_s1 + $0x40] sm:$0xff] (!%p172_p10)   ;;  %s5277_s8 = sshll.u32 (!%p172_p10), %s8852_s5, 4  ;;  %s7239_s19 = smov (!%p172_p10), [#allocation3]   ;;  %s8878_s8 = int_to_ptr.vmem [resolvable:$true] %s5277_s8 }
  0x14   : > { %6218 = vmatpush3.bf16.msra.mxu1 (!%p172_p10), %v7011_v2  ;;  %v7028_v55 = vld [vmem:[%s8930_s1 + $0x140] sm:$0xff] (!%p172_p10)   ;;  %vm7536_vm5 = vmor (!%p172_p10), %vm1428_vm3, %vm1429_vm4  ;;  %s7163_s21 = sshll.u32 (!%p172_p10), %s7239_s19, 4  ;;  %s7164_s21 = int_to_ptr.vmem [resolvable:$false] %s7163_s21 }
  0x15   : > { %6410 = vmatpush3.bf16.msra.mxu0 (!%p172_p10), %v7012_v3  ;;  %6219 = vmatprep.subr.bf16.mxu1 (!%p172_p10), %v7013_v4  ;;  %s7165_s23 = scalar_lea.vmem (!%p172_p10), %s7164_s21, 1024  ;;  %p7166_p1 = scmp.lt.s32.totalorder (!%p172_p10), %s8878_s8, %s7164_s21 }
  0x16   : > { %s203_s11 = scalar_select %p202_p11, %s7229_s15, 1  ;;  %6411 = vmatprep.subr.bf16.mxu0 %v7014_v5 }
  0x17   : > { %s7159_s15 = scalar_lea.vmem %s8878_s8, 512 }
  0x18   : > { %s6951_s26 = smul.u32 216, %s203_s11  ;;  %6220 = vmatpush3.bf16.msra.mxu1 %v7013_v4  ;;  %s8876_s11 = scalar_lea.hbm %s8932_s3, %s5975_s7 }
  0x19   : > { %6412 = vmatpush3.bf16.msra.mxu0 %v7014_v5  ;;  %6221 = vmatprep.subr.bf16.mxu1 %v7015_v6  ;;  %p7160_p12 = scmp.ne.s32.totalorder %s8878_s8, %s7159_s15  ;;  %p7167_p2 = scmp.lt.s32.totalorder %s7165_s23, %s7159_s15 }
  0x1a   : > { %6413 = vmatprep.subr.bf16.mxu0 %v7016_v7  ;;  %s7352_s6 = scalar_lea.vmem %s8929_s0, %s6951_s26 }
  0x1b   : > { %v7025_v11 = vld [vmem:[%s7352_s6] sm:$0xff]   ;;  %v5578_v13 = vld [vmem:[%s7352_s6 + $0xc] sm:$0xf]  ;;  %v7363_v14 = vld [vmem:[%s7352_s6 + $0x10] sm:$0xf]  ;;  %p7161_p13 = pnand %p7160_p12, %p7302_p4  ;;  %p7168_p3 = por %p7167_p2, %p7166_p1 }
  0x1c   : > { %6222 = vmatpush3.bf16.msra.mxu1 %v7015_v6  ;;  %6231 = vmatprep.mubr.bf16.mxu1 %v7025_v11  ;;  %v7366_v15 = vld [vmem:[%s7352_s6 + $0x14] sm:$0x1]  ;;  %v2301_v16 = vshrl.u32 %v5578_v13, 16  ;;  %v2304_v17 = vshll.u32 %v5578_v13, 16  ;;  %v2310_v19 = vshll.u32 %v7363_v14, 16  ;;  %v2314_v20 = vshrl.u32 %v7363_v14, 16 }
  0x1d   : > { %6414 = vmatpush3.bf16.msra.mxu0 %v7016_v7  ;;  %6223 = vmatprep.subr.bf16.mxu1 %v7017_v8  ;;  %v2320_v21 = vshll.u32 %v7366_v15, 16  ;;  %v5581_v30 = vld [vmem:[%s7352_s6 + $0x18] sm:$0xf]  ;;  %v7382_v31 = vld [vmem:[%s7352_s6 + $0x1c] sm:$0xf]  ;;  %v3075_v48 = vrot.slane %v7366_v15, 5  ;;  %p7162_p0 = pneg %p7161_p13 }
  0x1e   : > { %6415 = vmatprep.subr.bf16.mxu0 %v7018_v9  ;;  %v2303_v22 = vrot.slane %v2301_v16, 4  ;;  %v2306_v23 = vrot.slane %v2304_v17, 5  ;;  %v2312_v25 = vrot.slane %v2310_v19, 5  ;;  %v2316_v26 = vrot.slane %v2314_v20, 4  ;;  %v7393_v35 = vld [vmem:[%s7352_s6 + $0x20] sm:$0x1] }
  0x1f   : > { %v2322_v27 = vrot.slane %v2320_v21, 5  ;;  %v2325_v36 = vshrl.u32 %v5581_v30, 16  ;;  %v2328_v37 = vshll.u32 %v5581_v30, 16  ;;  %v2334_v38 = vshll.u32 %v7382_v31, 16  ;;  %v7026_v57 = vld [vmem:[%s7352_s6 + $0xc] sm:$0xff]   ;;  %v7030_v3 = vld [vmem:[%s7352_s6 + $0x18] sm:$0xff]   ;;  %p7169_p5 = pnand %p7168_p3, %p7162_p0 }
  0x20   : > { %6224 = vmatpush3.bf16.msra.mxu1 %v7017_v8  ;;  %v2307_v29 = vor.u32 %v2306_v23, %v2303_v22  ;;  %v2317_v34 = vor.u32 %v2316_v26, %v2312_v25  ;;  %v2338_v40 = vshrl.u32 %v7382_v31, 16  ;;  %v2344_v41 = vshll.u32 %v7393_v35, 16  ;;  %v5584_v59 = vld [vmem:[%s7352_s6 + $0x24] sm:$0xf]  ;;  %v7417_v60 = vld [vmem:[%s7352_s6 + $0x28] sm:$0xf] }
  0x21   : > { %6416 = vmatpush3.bf16.msra.mxu0 %v7018_v9  ;;  %6225 = vmatprep.subr.bf16.mxu1 %v7019_v10  ;;  %v3079_v42 = vrot.slane %v7382_v31, 5  ;;  %v2327_v44 = vrot.slane %v2325_v36, 4  ;;  %v2330_v45 = vrot.slane %v2328_v37, 5  ;;  %v2336_v46 = vrot.slane %v2334_v38, 5  ;;  %v7420_v62 = vld [vmem:[%s7352_s6 + $0x2c] sm:$0x1] }
  0x22   : > { %6417 = vmatprep.subr.bf16.mxu0 %v7020_v12  ;;  %v2308_v39 = vrot.slane %v2307_v29, 4  ;;  %v2318_v43 = vrot.slane %v2317_v34, 4  ;;  %v2340_v50 = vrot.slane %v2338_v40, 4  ;;  %v2346_v53 = vrot.slane %v2344_v41, 5  ;;  %v7029_v7 = vld [vmem:[%s8930_s1 + $0x148] sm:$0xff]   ;;  %v7033_v29 = vld [vmem:[%s8930_s1 + $0x150] sm:$0xff]  }
  0x23   : > { %v2331_v52 = vor.u32 %v2330_v45, %v2327_v44  ;;  %v7409_v54 = vrot.slane %v3079_v42, 4  ;;  %v2349_v63 = vshrl.u32 %v5584_v59, 16  ;;  %v2352_v0 = vshll.u32 %v5584_v59, 16  ;;  %v7032_v11 = vld [vmem:[%s8930_s1 + $0x48] sm:$0xff]   ;;  %v5587_v19 = vld [vmem:[%s7352_s6 + $0x30] sm:$0xf] }
  0x24   : > { %6226 = vmatpush3.bf16.msra.mxu1 %v7019_v10  ;;  %v2313_v47 = vsel %vm7388_vm2, %v2308_v39, %v2312_v25  ;;  %v2323_v51 = vsel %vm7388_vm2, %v2318_v43, %v2322_v27  ;;  %v2341_v58 = vor.u32 %v2340_v50, %v2336_v46  ;;  %v2358_v1 = vshll.u32 %v7417_v60, 16  ;;  %v7438_v20 = vld [vmem:[%s7352_s6 + $0x34] sm:$0xf]  ;;  %v7441_v21 = vld [vmem:[%s7352_s6 + $0x38] sm:$0x1]  ;;  %v7051_v15 = vld [vmem:[%s8930_s1 + $0x68] sm:$0xff]  }
  0x25   : > { %6418 = vmatpush3.bf16.msra.mxu0 %v7020_v12  ;;  %6227 = vmatprep.subr.bf16.mxu1 %v7021_v18  ;;  %v5642_v56 = vcombine.low %v2313_v47, %v2323_v51  ;;  %v2332_v61 = vrot.slane %v2331_v52, 4  ;;  %v2362_v4 = vshrl.u32 %v7417_v60, 16  ;;  %v2368_v5 = vshll.u32 %v7420_v62, 16  ;;  %v7035_v41 = vld [vmem:[%s7352_s6 + $0x30] sm:$0xff]   ;;  %v5590_v45 = vld [vmem:[%s7352_s6 + $0x3c] sm:$0xf] }
  0x26   : > { %6419 = vmatprep.subr.bf16.mxu0 %v7022_v24  ;;  %v2342_v2 = vrot.slane %v2341_v58, 4  ;;  %v2351_v8 = vrot.slane %v2349_v63, 4  ;;  %v2354_v9 = vrot.slane %v2352_v0, 5  ;;  %v2360_v10 = vrot.slane %v2358_v1, 5  ;;  %v7460_v50 = vld [vmem:[%s7352_s6 + $0x44] sm:$0x1] }
  0x27   : > { %6423 = vmatprep.mubr.bf16.mxu0 %v5642_v56  ;;  %v2337_v6 = vsel %vm7388_vm2, %v2332_v61, %v2336_v46  ;;  %v2364_v13 = vrot.slane %v2362_v4, 4  ;;  %v2370_v16 = vrot.slane %v2368_v5, 5  ;;  %v2373_v23 = vshrl.u32 %v5587_v19, 16  ;;  %v7457_v46 = vld [vmem:[%s7352_s6 + $0x40] sm:$0xf]  ;;  %v7034_v59 = vld [vmem:[%s8930_s1 + $0x158] sm:$0xff]  }
  0x28   : > { %6228 = vmatpush3.bf16.msra.mxu1 %v7021_v18  ;;  %v2347_v12 = vsel %vm7388_vm2, %v2342_v2, %v2346_v53  ;;  %v2355_v18 = vor.u32 %v2354_v9, %v2351_v8  ;;  %v2382_v25 = vshll.u32 %v7438_v20, 16  ;;  %v2386_v27 = vshrl.u32 %v7438_v20, 16  ;;  %v7037_v4 = vld [vmem:[%s8930_s1 + $0x50] sm:$0xff]   ;;  %v7477_v8 = vld [vmem:[%s7352_s6 + $0x4c] sm:$0xf] }
  0x29   : > { %6420 = vmatpush3.bf16.msra.mxu0 %v7022_v24  ;;  %6229 = vmatprep.subr.bf16.mxu1 %v7023_v28  ;;  %v5643_v17 = vcombine.low %v2337_v6, %v2347_v12  ;;  %v2365_v22 = vor.u32 %v2364_v13, %v2360_v10  ;;  %v2376_v24 = vshll.u32 %v5587_v19, 16  ;;  %v2375_v34 = vrot.slane %v2373_v23, 4  ;;  %v7480_v9 = vld [vmem:[%s7352_s6 + $0x50] sm:$0x1] }
  0x2a   : > { %6421 = vmatprep.subr.bf16.mxu0 %v7024_v32  ;;  %v2356_v26 = vrot.slane %v2355_v18, 4  ;;  %v2384_v37 = vrot.slane %v2382_v25, 5  ;;  %v2388_v39 = vrot.slane %v2386_v27, 4  ;;  %v2397_v51 = vshrl.u32 %v5590_v45, 16 }
  0x2b   : > { %v2366_v30 = vrot.slane %v2365_v22, 4  ;;  %v2378_v36 = vrot.slane %v2376_v24, 5  ;;  %v2400_v52 = vshll.u32 %v5590_v45, 16  ;;  %v2410_v56 = vshrl.u32 %v7457_v46, 16  ;;  %v7038_v22 = vld [vmem:[%s8930_s1 + $0x160] sm:$0xff]  }
  0x2c   : > { %6230 = vmatpush3.bf16.msra.mxu1 %v7023_v28  ;;  %v2392_v28 = vshll.u32 %v7441_v21, 16  ;;  %v2361_v38 = vsel %vm7388_vm2, %v2356_v26, %v2360_v10  ;;  %v2399_v61 = vrot.slane %v2397_v51, 4  ;;  %v2434_v18 = vshrl.u32 %v7477_v8, 16  ;;  %v7036_v24 = vld [vmem:[%s7352_s6 + $0x3c] sm:$0xff]  }
  0x2d   : > { %6422 = vmatpush3.bf16.msra.mxu0 %v7024_v32  ;;  %6263 = vmatprep.subr.bf16.mxu1 %v7027_v49  ;;  %v7031_v32 = vld [vmem:[%s7352_s6 + $0x24] sm:$0xff]   ;;  %v2371_v43 = vsel %vm7388_vm2, %v2366_v30, %v2370_v16  ;;  %v2379_v44 = vor.u32 %v2378_v36, %v2375_v34  ;;  %v2402_v63 = vrot.slane %v2400_v52, 5  ;;  %v2412_v2 = vrot.slane %v2410_v56, 4 }
  0x2e   : > { %6455 = vmatprep.subr.bf16.mxu0 %v7028_v55  ;;  %v2394_v40 = vrot.slane %v2392_v28, 5  ;;  %v5644_v47 = vcombine.low %v2361_v38, %v2371_v43  ;;  %v2440_v19 = vshll.u32 %v7480_v9, 16  ;;  %v7040_v34 = vld [vmem:[%s7352_s6 + $0x48] sm:$0xff]   ;;  %v5596_v38 = vld [vmem:[%s7352_s6 + $0x54] sm:$0xf]  ;;  %v3096_v31 = vrot.slane %v7441_v21, 5 }
  0x2f   : > { %6232 = vmatmul.mubr.bf16.vlgmr.msra.gmra.mrb[0].mxu1 %v7026_v57  ;;  %v2380_v53 = vrot.slane %v2379_v44, 4  ;;  %v2416_v57 = vshll.u32 %v7460_v50, 16  ;;  %v2403_v6 = vor.u32 %v2402_v63, %v2399_v61  ;;  %v7502_v43 = vld [vmem:[%s7352_s6 + $0x5c] sm:$0x1]  ;;  %v2445_v44 = vshrl.u32 %v5596_v38, 16  ;;  %v7055_v21 = vld [vmem:[%s8930_s1 + $0x70] sm:$0xff]  }
  0x30   : > { %6424 = vmatmul.mubr.bf16.vlgmr.msra.gmra.mrb[0].mxu0 %v5643_v17  ;;  %6264 = vmatpush3.bf16.msra.mxu1 %v7027_v49  ;;  %v2389_v49 = vor.u32 %v2388_v39, %v2384_v37  ;;  %v2430_v17 = vshll.u32 %v7477_v8, 16  ;;  %v2442_v30 = vrot.slane %v2440_v19, 5  ;;  %v2448_v45 = vshll.u32 %v5596_v38, 16 }
  0x31   : > { %6456 = vmatpush3.bf16.msra.mxu0 %v7028_v55  ;;  %6235 = vmatprep.mubr.bf16.mxu1 %v7030_v3  ;;  %v2406_v55 = vshll.u32 %v7457_v46, 16  ;;  %v2385_v0 = vsel %vm7388_vm2, %v2380_v53, %v2384_v37  ;;  %v2418_v3 = vrot.slane %v2416_v57, 5  ;;  %v2404_v16 = vrot.slane %v2403_v6, 4  ;;  %v7042_v57 = vld [vmem:[%s8930_s1 + $0x58] sm:$0xff]  }
  0x32   : > { %6457 = vmatprep.subr.bf16.mxu0 %v7029_v7  ;;  %6265 = vmatprep.subr.bf16.mxu1 %v7032_v11  ;;  %v2390_v58 = vrot.slane %v2389_v49, 4  ;;  %v2432_v28 = vrot.slane %v2430_v17, 5  ;;  %v2464_v52 = vshll.u32 %v7502_v43, 16  ;;  %v2450_v56 = vrot.slane %v2448_v45, 5 }
  0x33   : > { %6427 = vmatprep.mubr.bf16.mxu0 %v5644_v47  ;;  %v2408_v1 = vrot.slane %v2406_v55, 5  ;;  %v2447_v55 = vrot.slane %v2445_v44, 4  ;;  %v3082_v44 = vrot.slane %v7393_v35, 5 }
  0x34   : > { %6266 = vmatpush3.bf16.msra.mxu1 %v7032_v11  ;;  %v2395_v5 = vsel %vm7388_vm2, %v2390_v58, %v2394_v40  ;;  %v2466_v63 = vrot.slane %v2464_v52, 5  ;;  %v7046_v52 = vld [vmem:[%s7352_s6 + $0x6c] sm:$0xff]  }
  0x35   : > { %6458 = vmatpush3.bf16.msra.mxu0 %v7029_v7  ;;  %v5593_v7 = vld [vmem:[%s7352_s6 + $0x48] sm:$0xf]  ;;  %v5645_v10 = vcombine.low %v2385_v0, %v2395_v5  ;;  %v2413_v11 = vor.u32 %v2412_v2, %v2408_v1  ;;  %6267 = vmatprep.subr.bf16.mxu1 %v7037_v4  ;;  %v2409_v27 = vsel %vm7388_vm2, %v2404_v16, %v2408_v1  ;;  %v7041_v0 = vld [vmem:[%s7352_s6 + $0x54] sm:$0xff]   ;;  %v7520_v5 = vld [vmem:[%s7352_s6 + $0x64] sm:$0xf] }
  0x36   : > { %6459 = vmatprep.subr.bf16.mxu0 %v7033_v29  ;;  %v2421_v12 = vshrl.u32 %v5593_v7, 16  ;;  %v2424_v13 = vshll.u32 %v5593_v7, 16  ;;  %v7043_v1 = vld [vmem:[%s8930_s1 + $0x170] sm:$0xff]   ;;  %v2478_v16 = vshll.u32 %v7520_v5, 16  ;;  %v2482_v17 = vshrl.u32 %v7520_v5, 16 }
  0x37   : > { %6236 = vmatmul.mubr.bf16.gmra.mrb[4].mxu1 %v7031_v32  ;;  %v2414_v23 = vrot.slane %v2413_v11, 4  ;;  %v7039_v32 = vld [vmem:[%s8930_s1 + $0x168] sm:$0xff]  }
  0x38   : > { %6239 = vmatprep.mubr.bf16.mxu1 %v7035_v41  ;;  %6268 = vmatpush3.bf16.msra.mxu1 %v7037_v4  ;;  %v2423_v25 = vrot.slane %v2421_v12, 4  ;;  %v2426_v26 = vrot.slane %v2424_v13, 5  ;;  %v7499_v41 = vld [vmem:[%s7352_s6 + $0x58] sm:$0xf]  ;;  %v5599_v4 = vld [vmem:[%s7352_s6 + $0x60] sm:$0xf] }
  0x39   : > { %6460 = vmatpush3.bf16.msra.mxu0 %v7033_v29  ;;  %v2436_v29 = vrot.slane %v2434_v18, 4  ;;  %v2419_v36 = vsel %vm7388_vm2, %v2414_v23, %v2418_v3  ;;  %v2454_v49 = vshll.u32 %v7499_v41, 16  ;;  %v2458_v51 = vshrl.u32 %v7499_v41, 16  ;;  %6269 = vmatprep.subr.bf16.mxu1 %v7042_v57 }
  0x3a   : > { %6461 = vmatprep.subr.bf16.mxu0 %v7034_v59  ;;  %6428 = vmatmul.mubr.bf16.gmra.mrb[4].mxu0 %v5645_v10  ;;  %v2427_v37 = vor.u32 %v2426_v26, %v2423_v25  ;;  %v5646_v39 = vcombine.low %v2409_v27, %v2419_v36  ;;  %v2451_v3 = vor.u32 %v2450_v56, %v2447_v55  ;;  %v7523_v10 = vld [vmem:[%s7352_s6 + $0x68] sm:$0x1]  ;;  %v2469_v11 = vshrl.u32 %v5599_v4, 16  ;;  %v5667_v55 = vld [vmem:[%s7352_s6 + $0x18] sm:$0xe]  ;;  %v7048_v56 = vld [vmem:[%s8930_s1 + $0x180] sm:$0xff]  }
  0x3b   : > { %v2437_v40 = vor.u32 %v2436_v29, %v2432_v28  ;;  %v2460_v61 = vrot.slane %v2458_v51, 4  ;;  %v2472_v12 = vshll.u32 %v5599_v4, 16  ;;  %v2488_v18 = vshll.u32 %v7523_v10, 16  ;;  %v7045_v29 = vld [vmem:[%s7352_s6 + $0x60] sm:$0xff]  }
  0x3c   : > { %v2428_v47 = vrot.slane %v2427_v37, 4  ;;  %6431 = vmatprep.mubr.bf16.mxu0 %v5646_v39  ;;  %6270 = vmatpush3.bf16.msra.mxu1 %v7042_v57  ;;  %v2452_v13 = vrot.slane %v2451_v3, 4  ;;  %v2480_v26 = vrot.slane %v2478_v16, 5  ;;  %v2484_v27 = vrot.slane %v2482_v17, 4  ;;  %v7052_v17 = vld [vmem:[%s8930_s1 + $0x188] sm:$0xff]  }
  0x3d   : > { %6462 = vmatpush3.bf16.msra.mxu0 %v7034_v59  ;;  %v2438_v53 = vrot.slane %v2437_v40, 4  ;;  %v2456_v59 = vrot.slane %v2454_v49, 5  ;;  %v2474_v23 = vrot.slane %v2472_v12, 5  ;;  %v3072_v40 = vrot.slane %v7363_v14, 5 }
  0x3e   : > { %6463 = vmatprep.subr.bf16.mxu0 %v7038_v22  ;;  %v2433_v58 = vsel %vm7388_vm2, %v2428_v47, %v2432_v28  ;;  %v2490_v28 = vrot.slane %v2488_v18, 5  ;;  %v2485_v38 = vor.u32 %v2484_v27, %v2480_v26  ;;  %v5683_v35 = vrot.slane %v5667_v55, 9  ;;  %v7053_v18 = vld [vmem:[%s7352_s6 + $0x90] sm:$0xff]  }
  0x3f   : > { %6240 = vmatmul.mubr.bf16.gmra.mrb[8].mxu1 %v7036_v24  ;;  %v2443_v2 = vsel %vm7388_vm2, %v2438_v53, %v2442_v30  ;;  %v2461_v7 = vor.u32 %v2460_v61, %v2456_v59  ;;  %v7044_v24 = vld [vmem:[%s8930_s1 + $0x178] sm:$0xff]   ;;  %v2457_v25 = vsel %vm7388_vm2, %v2452_v13, %v2456_v59  ;;  %v3074_v51 = vrot.slane %v3072_v40, 4  ;;  %v7047_v53 = vld [vmem:[%s8930_s1 + $0x60] sm:$0xff]  }
  0x40   : > { %6243 = vmatprep.mubr.bf16.mxu1 %v7040_v34  ;;  %v5647_v6 = vcombine.low %v2433_v58, %v2443_v2  ;;  %v2486_v47 = vrot.slane %v2485_v38, 4  ;;  %6271 = vmatprep.subr.bf16.mxu1 %v7047_v53  ;;  %v5668_v59 = vld [vmem:[%s7352_s6 + $0x24] sm:$0xe]  ;;  %v3086_v2 = vrot.slane %v7417_v60, 5  ;;  %v3089_v3 = vrot.slane %v7420_v62, 5 }
  0x41   : > { %6464 = vmatpush3.bf16.msra.mxu0 %v7038_v22  ;;  %v2462_v19 = vrot.slane %v2461_v7, 4  ;;  %v2471_v22 = vrot.slane %v2469_v11, 4  ;;  %v3076_v58 = vsel %vm7536_vm5, %v3074_v51, %v3075_v48  ;;  %6272 = vmatpush3.bf16.msra.mxu1 %v7047_v53  ;;  %v5669_v48 = vld [vmem:[%s7352_s6 + $0x30] sm:$0xe]  ;;  %v3093_v4 = vrot.slane %v7438_v20, 5  ;;  %v7050_v11 = vld [vmem:[%s7352_s6 + $0x84] sm:$0xff]  }
  0x42   : > { %6465 = vmatprep.subr.bf16.mxu0 %v7039_v32  ;;  %6432 = vmatmul.mubr.bf16.gmra.mrb[8].mxu0 %v5647_v6  ;;  %v2491_v57 = vsel %vm7388_vm2, %v2486_v47, %v2490_v28  ;;  %v3080_v6 = vsel %vm7536_vm5, %v5683_v35, %v3079_v42  ;;  %v3083_v60 = vsel %vm7536_vm5, %v7409_v54, %v3082_v44  ;;  %v3088_v62 = vrot.slane %v3086_v2, 4  ;;  %v5670_v13 = vld [vmem:[%s7352_s6 + $0x3c] sm:$0xe] }
  0x43   : > { %v2467_v34 = vsel %vm7388_vm2, %v2462_v19, %v2466_v63  ;;  %v2475_v36 = vor.u32 %v2474_v23, %v2471_v22  ;;  %6273 = vmatprep.subr.bf16.mxu1 %v7051_v15  ;;  %v5685_v20 = vrot.slane %v5669_v48, 9  ;;  %v3095_v12 = vrot.slane %v3093_v4, 4  ;;  %v7060_v35 = vld [vmem:[%s8930_s1 + $0x198] sm:$0xff]  }
  0x44   : > { %v5648_v37 = vcombine.low %v2457_v25, %v2467_v34  ;;  %v3090_v42 = vsel %vm7536_vm5, %v3088_v62, %v3089_v3  ;;  %v3100_v54 = vrot.slane %v7457_v46, 5  ;;  %v5715_v16 = vcombine.low %v3080_v6, %v3083_v60  ;;  %v5672_v34 = vld [vmem:[%s7352_s6 + $0x54] sm:$0xe]  ;;  %v5603_v3 = vld [vmem:[%s7352_s6 + $0x70] sm:$0xf] }
  0x45   : > { %6466 = vmatpush3.bf16.msra.mxu0 %v7039_v32  ;;  %v5666_v32 = vld [vmem:[%s7352_s6 + $0xc] sm:$0xe]  ;;  %v2476_v45 = vrot.slane %v2475_v36, 4  ;;  %6274 = vmatpush3.bf16.msra.mxu1 %v7051_v15  ;;  %v3103_v19 = vrot.slane %v7460_v50, 5  ;;  %v5686_v23 = vrot.slane %v5670_v13, 9  ;;  %v3107_v46 = vrot.slane %v7477_v8, 5 }
  0x46   : > { %6467 = vmatprep.subr.bf16.mxu0 %v7043_v1  ;;  %v5682_v39 = vrot.slane %v5666_v32, 9  ;;  %6435 = vmatprep.mubr.bf16.mxu0 %v5648_v37  ;;  %v3102_v25 = vrot.slane %v3100_v54, 4  ;;  %v3110_v27 = vrot.slane %v7480_v9, 5  ;;  %v3094_v50 = vsel %vm7536_vm5, %v5685_v20, %v3093_v4  ;;  %v7652_v15 = vld [vmem:[%s8930_s1 + $0x80] sm:$0xff]   ;;  %v5604_v62 = vld [vmem:[%s7352_s6 + $0x74] sm:$0x1] }
  0x47   : > { %6244 = vmatmul.mubr.bf16.gmra.mrb[12].mxu1 %v7041_v0  ;;  %v2481_v14 = vsel %vm7388_vm2, %v2476_v45, %v2480_v26  ;;  %v7049_v0 = vld [vmem:[%s7352_s6 + $0x78] sm:$0xff]   ;;  %6275 = vmatprep.subr.bf16.mxu1 %v7055_v21  ;;  %v3109_v28 = vrot.slane %v3107_v46, 4  ;;  %v3114_v36 = vrot.slane %v7499_v41, 5  ;;  %v3097_v8 = vsel %vm7536_vm5, %v3095_v12, %v3096_v31  ;;  %v5673_v45 = vld [vmem:[%s7352_s6 + $0x60] sm:$0xe] }
  0x48   : > { %6247 = vmatprep.mubr.bf16.mxu1 %v7045_v29  ;;  %v3073_v49 = vsel %vm7536_vm5, %v5682_v39, %v3072_v40  ;;  %v5649_v61 = vcombine.low %v2481_v14, %v2491_v57  ;;  %v7056_v29 = vld [vmem:[%s8930_s1 + $0x190] sm:$0xff]   ;;  %v3101_v9 = vsel %vm7536_vm5, %v5686_v23, %v3100_v54  ;;  %v5688_v32 = vrot.slane %v5672_v34, 9  ;;  %v7054_v39 = vld [vmem:[%s7352_s6 + $0x9c] sm:$0xff]   ;;  %v610_v12 = vld [vmem:[%s7352_s6 + $0xc] sm:$0xf] }
  0x49   : > { %6468 = vmatpush3.bf16.msra.mxu0 %v7043_v1  ;;  %v5714_v63 = vcombine.low %v3073_v49, %v3076_v58  ;;  %v5684_v1 = vrot.slane %v5668_v59, 9  ;;  %v3117_v37 = vrot.slane %v7502_v43, 5  ;;  %v3104_v38 = vsel %vm7536_vm5, %v3102_v25, %v3103_v19  ;;  %v7059_v43 = vld [vmem:[%s8930_s1 + $0x78] sm:$0xff]   ;;  %6276 = vmatpush3.bf16.msra.mxu1 %v7055_v21  ;;  %v608_v58 = vld [vmem:[%s7352_s6 + $0x4] sm:$0xf] }
  0x4a   : > { %6469 = vmatprep.subr.bf16.mxu0 %v7044_v24  ;;  %6436 = vmatmul.mubr.bf16.gmra.mrb[12].mxu0 %v5649_v61  ;;  %v7619_v40 = vsel %vm7536_vm5, %v3109_v28, %v3110_v27  ;;  %v3116_v44 = vrot.slane %v3114_v36, 4  ;;  %v3121_v47 = vrot.slane %v7520_v5, 5  ;;  %v3124_v49 = vrot.slane %v7523_v10, 5  ;;  %v607_v5 = vld [vmem:[%s7352_s6] sm:$0xf] }
  0x4b   : > { %6471 = vmatprep.mubr.bf16.mxu0 %v5714_v63  ;;  %v3087_v7 = vsel %vm7536_vm5, %v5684_v1, %v3086_v2  ;;  %v5717_v51 = vcombine.low %v3094_v50, %v3097_v8  ;;  %v7630_v53 = vsel %vm7536_vm5, %v5688_v32, %v3114_v36  ;;  %6277 = vmatprep.subr.bf16.mxu1 %v7059_v43  ;;  %v5689_v14 = vrot.slane %v5673_v45, 9  ;;  %v609_v59 = vld [vmem:[%s7352_s6 + $0x8] sm:$0x1]  ;;  %v7062_v13 = vld [vmem:[%s8930_s1 + $0x1a0] sm:$0xff]   ;;  %v611_v19 = vld [vmem:[%s7352_s6 + $0x10] sm:$0xf] }
  0x4c   : > { %v5716_v22 = vcombine.low %v3087_v7, %v3090_v42  ;;  %v7634_v55 = vsel %vm7536_vm5, %v3116_v44, %v3117_v37  ;;  %v5718_v10 = vcombine.low %v3101_v9, %v3104_v38  ;;  %v3123_v57 = vrot.slane %v3121_v47, 4  ;;  %v5674_v7 = vld [vmem:[%s7352_s6 + $0x6c] sm:$0xe]  ;;  %v612_v21 = vld [vmem:[%s7352_s6 + $0x14] sm:$0x1] }
  0x4d   : > { %6470 = vmatpush3.bf16.msra.mxu0 %v7044_v24  ;;  %v5671_v24 = vld [vmem:[%s7352_s6 + $0x48] sm:$0xe]  ;;  %v659_v61 = vshrl.u32 %v607_v5, 16  ;;  %v7646_v63 = vsel %vm7536_vm5, %v5689_v14, %v3121_v47  ;;  %v668_v1 = vshll.u32 %v608_v58, 16  ;;  %v672_v2 = vshrl.u32 %v608_v58, 16  ;;  %6278 = vmatpush3.bf16.msra.mxu1 %v7059_v43 }
  0x4e   : > { %6503 = vmatprep.subr.bf16.mxu0 %v7048_v56  ;;  %v5687_v26 = vrot.slane %v5671_v24, 9  ;;  %v5720_v48 = vcombine.low %v7630_v53, %v7634_v55  ;;  %v7658_v4 = vsel %vm7536_vm5, %v3123_v57, %v3124_v49  ;;  %v678_v60 = vshll.u32 %v609_v59, 16  ;;  %6311 = vmatprep.subr.bf16.mxu1 %v7652_v15  ;;  %v5606_v9 = vld [vmem:[%s7352_s6 + $0x7c] sm:$0xf]  ;;  %v5607_v44 = vld [vmem:[%s7352_s6 + $0x80] sm:$0x1] }
  0x4f   : > { %6248 = vmatmul.mubr.bf16.gmra.mrb[16].mxu1 %v7046_v52  ;;  %v7057_v52 = vld [vmem:[%s7352_s6 + $0xa8] sm:$0xff]   ;;  %v661_v6 = vrot.slane %v659_v61, 4  ;;  %v670_v31 = vrot.slane %v668_v1, 5  ;;  %v674_v42 = vrot.slane %v672_v2, 4  ;;  %v683_v24 = vshrl.u32 %v610_v12, 16 }
  0x50   : > { %6251 = vmatprep.mubr.bf16.mxu1 %v7049_v0  ;;  %v7615_v41 = vsel %vm7536_vm5, %v5687_v26, %v3107_v46  ;;  %v662_v0 = vshll.u32 %v607_v5, 16  ;;  %v680_v54 = vrot.slane %v678_v60, 5  ;;  %v686_v25 = vshll.u32 %v610_v12, 16  ;;  %v7058_v26 = vld [vmem:[%s7352_s6 + $0xb4] sm:$0xff]   ;;  %v7064_v57 = vld [vmem:[%s8930_s1 + $0x1a8] sm:$0xff]  }
  0x51   : > { %v675_v23 = vor.u32 %v674_v42, %v670_v31  ;;  %v692_v50 = vshll.u32 %v611_v19, 16  ;;  %v696_v28 = vshrl.u32 %v611_v19, 16  ;;  %v685_v36 = vrot.slane %v683_v24, 4  ;;  %v614_v1 = vld [vmem:[%s7352_s6 + $0x1c] sm:$0xf] }
  0x52   : > { %6472 = vmatmul.mubr.bf16.vlgmr.msra.gmra.mrb[0].mxu0 %v5715_v16  ;;  %v664_v20 = vrot.slane %v662_v0, 5  ;;  %v5690_v16 = vrot.slane %v5674_v7, 9  ;;  %v688_v8 = vrot.slane %v686_v25, 5  ;;  %v2526_v5 = vshll.u32 %v5606_v9, 16  ;;  %v5609_v55 = vld [vmem:[%s7352_s6 + $0x88] sm:$0xf] }
  0x53   : > { %6504 = vmatpush3.bf16.msra.mxu0 %v7048_v56  ;;  %6475 = vmatprep.mubr.bf16.mxu0 %v5716_v22  ;;  %v5719_v56 = vcombine.low %v7615_v41, %v7619_v40  ;;  %v676_v34 = vrot.slane %v675_v23, 4  ;;  %v694_v37 = vrot.slane %v692_v50, 5  ;;  %v698_v38 = vrot.slane %v696_v28, 4  ;;  %v615_v40 = vld [vmem:[%s7352_s6 + $0x20] sm:$0x1]  ;;  %v7066_v25 = vld [vmem:[%s8930_s1 + $0x1b0] sm:$0xff]  }
  0x54   : > { %6505 = vmatprep.subr.bf16.mxu0 %v7052_v17  ;;  %v665_v22 = vor.u32 %v664_v20, %v661_v6  ;;  %v689_v49 = vor.u32 %v688_v8, %v685_v36  ;;  %v2530_v59 = vshrl.u32 %v5606_v9, 16  ;;  %v2536_v61 = vshll.u32 %v5607_v44, 16  ;;  %v5610_v42 = vld [vmem:[%s7352_s6 + $0x8c] sm:$0x1]  ;;  %v5676_v12 = vld [vmem:[%s7352_s6 + $0x84] sm:$0xe] }
  0x55   : > { %v681_v45 = vsel %vm7388_vm2, %v676_v34, %v680_v54  ;;  %v699_v14 = vor.u32 %v698_v38, %v694_v37  ;;  %v3135_v6 = vrot.slane %v5606_v9, 5  ;;  %v3138_v41 = vrot.slane %v5607_v44, 5  ;;  %v7719_v19 = vld [vmem:[%s7352_s6 + $0x28] sm:$0xf]  ;;  %v7068_v38 = vld [vmem:[%s8930_s1 + $0x1b8] sm:$0xff]  }
  0x56   : > { %v690_v58 = vrot.slane %v689_v49, 4  ;;  %v2532_v60 = vrot.slane %v2530_v59, 4  ;;  %v726_v24 = vshll.u32 %v615_v40, 16  ;;  %v5692_v28 = vrot.slane %v5676_v12, 9  ;;  %v5612_v49 = vld [vmem:[%s7352_s6 + $0x94] sm:$0xf] }
  0x57   : > { %6252 = vmatmul.mubr.bf16.gmra.mrb[20].mxu1 %v7050_v11  ;;  %6506 = vmatpush3.bf16.msra.mxu0 %v7052_v17  ;;  %v5721_v11 = vcombine.low %v7646_v63, %v7658_v4  ;;  %v3128_v17 = vrot.slane %v5603_v3, 5  ;;  %v700_v2 = vrot.slane %v699_v14, 4  ;;  %v7700_v3 = vrot.slane %v2526_v5, 5  ;;  %v619_v59 = vld [vmem:[%s7352_s6 + $0x30] sm:$0xf] }
  0x58   : > { %6255 = vmatprep.mubr.bf16.mxu1 %v7053_v18  ;;  %6507 = vmatprep.subr.bf16.mxu0 %v7056_v29  ;;  %v3131_v18 = vrot.slane %v5604_v62, 5  ;;  %v7705_v62 = vrot.slane %v2536_v61, 5  ;;  %v3137_v20 = vrot.slane %v3135_v6, 4  ;;  %v728_v8 = vrot.slane %v726_v24, 5  ;;  %v5615_v12 = vld [vmem:[%s7352_s6 + $0xa0] sm:$0xf] }
  0x59   : > { %v7673_v46 = vsel %vm7536_vm5, %v5690_v16, %v3128_v17  ;;  %v3130_v27 = vrot.slane %v3128_v17, 4  ;;  %v2533_v16 = vor.u32 %v2532_v60, %v7700_v3  ;;  %v3142_v9 = vrot.slane %v5609_v55, 5 }
  0x5a   : > { %6476 = vmatmul.mubr.bf16.gmra.mrb[4].mxu0 %v5717_v51  ;;  %v5675_v51 = vld [vmem:[%s7352_s6 + $0x78] sm:$0xe] }
  0x5b   : > { %6479 = vmatprep.mubr.bf16.mxu0 %v5718_v10  ;;  %6508 = vmatpush3.bf16.msra.mxu0 %v7056_v29  ;;  %v666_v29 = vrot.slane %v665_v22, 4  ;;  %v7679_v32 = vsel %vm7536_vm5, %v3130_v27, %v3131_v18  ;;  %v613_v10 = vld [vmem:[%s7352_s6 + $0x18] sm:$0xf]  ;;  %v5691_v0 = vrot.slane %v5675_v51, 9  ;;  %v716_v18 = vshll.u32 %v614_v1, 16 }
  0x5c   : > { %6509 = vmatprep.subr.bf16.mxu0 %v7060_v35  ;;  %v5722_v47 = vcombine.low %v7673_v46, %v7679_v32  ;;  %v707_v53 = vshrl.u32 %v613_v10, 16  ;;  %v7723_v22 = vsel %vm7536_vm5, %v3137_v20, %v3138_v41  ;;  %v5613_v51 = vld [vmem:[%s7352_s6 + $0x98] sm:$0x1]  ;;  %v3144_v14 = vrot.slane %v3142_v9, 4 }
  0x5d   : > { %v671_v43 = vsel %vm7388_vm2, %v666_v29, %v670_v31  ;;  %v7712_v7 = vsel %vm7536_vm5, %v5691_v0, %v3135_v6  ;;  %v710_v31 = vshll.u32 %v613_v10, 16  ;;  %v718_v50 = vrot.slane %v716_v18, 5  ;;  %v7063_v29 = vld [vmem:[%s8930_s1 + $0x88] sm:$0xff]   ;;  %v7765_v6 = vld [vmem:[%s7352_s6 + $0x34] sm:$0xf] }
  0x5e   : > { %v709_v17 = vrot.slane %v707_v53, 4  ;;  %v5723_v27 = vcombine.low %v7712_v7, %v7723_v22  ;;  %v3152_v60 = vrot.slane %v5613_v51, 5  ;;  %v7067_v53 = vld [vmem:[%s8930_s1 + $0x98] sm:$0xff]   ;;  %v764_v18 = vshll.u32 %v7765_v6, 16  ;;  %v7794_v22 = vld [vmem:[%s8930_s1 + $0x1c0] sm:$0xff]  }
  0x5f   : > { %6256 = vmatmul.mubr.bf16.gmra.mrb[24].mxu1 %v7054_v39  ;;  %6510 = vmatpush3.bf16.msra.mxu0 %v7060_v35  ;;  %v702_v39 = vshll.u32 %v612_v21, 16  ;;  %v712_v23 = vrot.slane %v710_v31, 5  ;;  %v720_v21 = vshrl.u32 %v614_v1, 16  ;;  %v7773_v31 = vld [vmem:[%s7352_s6 + $0x38] sm:$0x1] }
  0x60   : > { %6259 = vmatprep.mubr.bf16.mxu1 %v7057_v52  ;;  %6511 = vmatprep.subr.bf16.mxu0 %v7062_v13  ;;  %v5426_v52 = vcombine.low %v671_v43, %v681_v45  ;;  %v740_v45 = vshll.u32 %v7719_v19, 16  ;;  %v774_v7 = vshll.u32 %v7773_v31, 16  ;;  %v7802_v51 = vld [vmem:[%s7352_s6 + $0x44] sm:$0x1] }
  0x61   : > { %v704_v35 = vrot.slane %v702_v39, 5  ;;  %v713_v34 = vor.u32 %v712_v23, %v709_v17  ;;  %v722_v36 = vrot.slane %v720_v21, 4  ;;  %v3145_v39 = vrot.slane %v5610_v42, 5  ;;  %v5678_v23 = vld [vmem:[%s7352_s6 + $0x9c] sm:$0xe] }
  0x62   : > { %6480 = vmatmul.mubr.bf16.gmra.mrb[8].mxu0 %v5719_v56  ;;  %v695_v56 = vsel %vm7388_vm2, %v690_v58, %v694_v37  ;;  %v7736_v37 = vld [vmem:[%s7352_s6 + $0x2c] sm:$0x1]  ;;  %v744_v58 = vshrl.u32 %v7719_v19, 16  ;;  %v755_v42 = vshrl.u32 %v619_v59, 16  ;;  %v758_v17 = vshll.u32 %v619_v59, 16 }
  0x63   : > { %6483 = vmatprep.mubr.bf16.mxu0 %v5720_v48  ;;  %6512 = vmatpush3.bf16.msra.mxu0 %v7062_v13  ;;  %v705_v48 = vsel %vm7388_vm2, %v700_v2, %v704_v35  ;;  %v616_v13 = vld [vmem:[%s7352_s6 + $0x24] sm:$0xf]  ;;  %v714_v63 = vrot.slane %v713_v34, 4  ;;  %v723_v4 = vor.u32 %v722_v36, %v718_v50  ;;  %v5677_v35 = vld [vmem:[%s7352_s6 + $0x90] sm:$0xe]  ;;  %v3146_v32 = vsel %vm7536_vm5, %v3144_v14, %v3145_v39 }
  0x64   : > { %6513 = vmatprep.subr.bf16.mxu0 %v7064_v57  ;;  %v5427_v54 = vcombine.low %v695_v56, %v705_v48  ;;  %v731_v44 = vshrl.u32 %v616_v13, 16  ;;  %v734_v43 = vshll.u32 %v616_v13, 16  ;;  %v746_v1 = vrot.slane %v744_v58, 4  ;;  %v5616_v13 = vld [vmem:[%s7352_s6 + $0xa4] sm:$0x1] }
  0x65   : > { %v719_v46 = vsel %vm7388_vm2, %v714_v63, %v718_v50  ;;  %v5693_v2 = vrot.slane %v5677_v35, 9  ;;  %v3149_v56 = vrot.slane %v5612_v49, 5  ;;  %v768_v50 = vshrl.u32 %v7765_v6, 16  ;;  %v7799_v39 = vld [vmem:[%s7352_s6 + $0x40] sm:$0xf] }
  0x66   : > { %v733_v5 = vrot.slane %v731_v44, 4  ;;  %v736_v10 = vrot.slane %v734_v43, 5  ;;  %v760_v34 = vrot.slane %v758_v17, 5  ;;  %v766_v36 = vrot.slane %v764_v18, 5  ;;  %v5618_v35 = vld [vmem:[%s7352_s6 + $0xac] sm:$0xf] }
  0x67   : > { %6260 = vmatmul.mubr.bf16.gmra.mrb[28].mxu1 %v7058_v26  ;;  %v7728_v26 = vrot.slane %v2533_v16, 4  ;;  %6514 = vmatpush3.bf16.msra.mxu0 %v7064_v57  ;;  %v742_v57 = vrot.slane %v740_v45, 5  ;;  %v3151_v16 = vrot.slane %v3149_v56, 4  ;;  %v776_v45 = vrot.slane %v774_v7, 5  ;;  %v7830_v17 = vld [vmem:[%s7352_s6 + $0x50] sm:$0x1] }
  0x68   : > { %6279 = vmatprep.mubr.bf16.mxu1 %v5426_v52  ;;  %6515 = vmatprep.subr.bf16.mxu0 %v7066_v25  ;;  %v7065_v52 = vld [vmem:[%s8930_s1 + $0x90] sm:$0xff]   ;;  %v737_v0 = vor.u32 %v736_v10, %v733_v5  ;;  %v3156_v49 = vrot.slane %v5615_v12, 5  ;;  %v788_v58 = vshll.u32 %v7799_v39, 16  ;;  %v792_v59 = vshrl.u32 %v7799_v39, 16 }
  0x69   : > { %v747_v20 = vor.u32 %v746_v1, %v742_v57  ;;  %v7078_v7 = vld [vmem:[%s8930_s1 + $0xb0] sm:$0xff]  }
  0x6a   : > { %6484 = vmatmul.mubr.bf16.gmra.mrb[12].mxu0 %v5721_v11  ;;  %v3143_v11 = vsel %vm7536_vm5, %v5692_v28, %v3142_v9  ;;  %v738_v48 = vrot.slane %v737_v0, 4  ;;  %v622_v28 = vld [vmem:[%s7352_s6 + $0x3c] sm:$0xf]  ;;  %v770_v9 = vrot.slane %v768_v50, 4 }
  0x6b   : > { %6487 = vmatprep.mubr.bf16.mxu0 %v5722_v47  ;;  %6516 = vmatpush3.bf16.msra.mxu0 %v7066_v25  ;;  %v750_v47 = vshll.u32 %v7736_v37, 16  ;;  %v5724_v61 = vcombine.low %v3143_v11, %v3146_v32  ;;  %v748_v24 = vrot.slane %v747_v20, 4  ;;  %v757_v25 = vrot.slane %v755_v42, 4  ;;  %v7827_v20 = vld [vmem:[%s7352_s6 + $0x4c] sm:$0xf] }
  0x6c   : > { %6517 = vmatprep.subr.bf16.mxu0 %v7068_v38  ;;  %v743_v21 = vsel %vm7388_vm2, %v738_v48, %v742_v57  ;;  %v771_v63 = vor.u32 %v770_v9, %v766_v36  ;;  %v779_v11 = vshrl.u32 %v622_v28, 16  ;;  %v782_v14 = vshll.u32 %v622_v28, 16 }
  0x6d   : > { %v752_v40 = vrot.slane %v750_v47, 5  ;;  %v761_v43 = vor.u32 %v760_v34, %v757_v25  ;;  %v3158_v57 = vrot.slane %v3156_v49, 4  ;;  %v794_v48 = vrot.slane %v792_v59, 4  ;;  %v5622_v34 = vld [vmem:[%s7352_s6 + $0xbc] sm:$0x1] }
  0x6e   : > { %v781_v32 = vrot.slane %v779_v11, 4  ;;  %v784_v47 = vrot.slane %v782_v14, 5 }
  0x6f   : > { %6280 = vmatmul.mubr.bf16.vlgmr.msra.gmra.mrb[0].mxu1 %v5427_v54  ;;  %6518 = vmatpush3.bf16.msra.mxu0 %v7068_v38  ;;  %v3150_v54 = vsel %vm7536_vm5, %v5693_v2, %v3149_v56  ;;  %v5694_v38 = vrot.slane %v5678_v23, 9  ;;  %v762_v5 = vrot.slane %v761_v43, 4  ;;  %v790_v2 = vrot.slane %v788_v58, 5  ;;  %v7074_v56 = vld [vmem:[%s8930_s1 + $0xa8] sm:$0xff]  }
  0x70   : > { %6312 = vmatpush3.bf16.msra.mxu1 %v7652_v15  ;;  %v724_v15 = vrot.slane %v723_v4, 4  ;;  %6551 = vmatprep.subr.bf16.mxu0 %v7794_v22  ;;  %v3159_v4 = vrot.slane %v5616_v13, 5 }
  0x71   : > { %6313 = vmatprep.subr.bf16.mxu1 %v7063_v29  ;;  %v3157_v10 = vsel %vm7536_vm5, %v5694_v38, %v3156_v49  ;;  %v767_v0 = vsel %vm7388_vm2, %v762_v5, %v766_v36  ;;  %v795_v13 = vor.u32 %v794_v48, %v790_v2  ;;  %v5680_v36 = vld [vmem:[%s7352_s6 + $0xb4] sm:$0xe]  ;;  %v816_v38 = vshrl.u32 %v7827_v20, 16 }
  0x72   : > { %v729_v41 = vsel %vm7388_vm2, %v724_v15, %v728_v8  ;;  %6488 = vmatmul.mubr.bf16.gmra.mrb[16].mxu0 %v5723_v27  ;;  %v753_v27 = vsel %vm7388_vm2, %v748_v24, %v752_v40  ;;  %v772_v15 = vrot.slane %v771_v63, 4  ;;  %v3160_v1 = vsel %vm7536_vm5, %v3158_v57, %v3159_v4  ;;  %v625_v40 = vld [vmem:[%s7352_s6 + $0x48] sm:$0xf]  ;;  %v5621_v24 = vld [vmem:[%s7352_s6 + $0xb8] sm:$0xf] }
  0x73   : > { %v5428_v55 = vcombine.low %v719_v46, %v729_v41  ;;  %6491 = vmatprep.mubr.bf16.mxu0 %v5724_v61  ;;  %v5429_v44 = vcombine.low %v743_v21, %v753_v27  ;;  %v5619_v46 = vld [vmem:[%s7352_s6 + $0xb0] sm:$0x1]  ;;  %v5679_v61 = vld [vmem:[%s7352_s6 + $0xa8] sm:$0xe]  ;;  %v798_v41 = vshll.u32 %v7802_v51, 16  ;;  %v803_v21 = vshrl.u32 %v625_v40, 16 }
  0x74   : > { %6314 = vmatpush3.bf16.msra.mxu1 %v7063_v29  ;;  %v3153_v29 = vsel %vm7536_vm5, %v3151_v16, %v3152_v60  ;;  %v777_v60 = vsel %vm7388_vm2, %v772_v15, %v776_v45  ;;  %v3163_v16 = vrot.slane %v5618_v35, 5  ;;  %v3166_v23 = vrot.slane %v5619_v46, 5  ;;  %v7851_v35 = vld [vmem:[%s7352_s6 + $0x58] sm:$0xf]  ;;  %v7854_v46 = vld [vmem:[%s7352_s6 + $0x5c] sm:$0x1] }
  0x75   : > { %6315 = vmatprep.subr.bf16.mxu1 %v7065_v52  ;;  %6283 = vmatprep.mubr.bf16.mxu1 %v5428_v55  ;;  %v5725_v8 = vcombine.low %v3150_v54, %v3153_v29  ;;  %v785_v55 = vor.u32 %v784_v47, %v781_v32  ;;  %v5430_v42 = vcombine.low %v767_v0, %v777_v60  ;;  %v800_v12 = vrot.slane %v798_v41, 5 }
  0x76   : > { %v5695_v54 = vrot.slane %v5679_v61, 9  ;;  %v3165_v50 = vrot.slane %v3163_v16, 4  ;;  %v806_v28 = vshll.u32 %v625_v40, 16  ;;  %v812_v29 = vshll.u32 %v7827_v20, 16  ;;  %v5624_v61 = vld [vmem:[%s7352_s6 + $0xc4] sm:$0xf] }
  0x77   : > { %6284 = vmatmul.mubr.bf16.gmra.mrb[4].mxu1 %v5429_v44  ;;  %v786_v18 = vrot.slane %v785_v55, 4  ;;  %v805_v9 = vrot.slane %v803_v21, 4  ;;  %v628_v44 = vld [vmem:[%s7352_s6 + $0x54] sm:$0xf]  ;;  %v818_v11 = vrot.slane %v816_v38, 4  ;;  %v5696_v14 = vrot.slane %v5680_v36, 9 }
  0x78   : > { %6316 = vmatpush3.bf16.msra.mxu1 %v7065_v52  ;;  %v7070_v52 = vld [vmem:[%s8930_s1 + $0xa0] sm:$0xff]   ;;  %6287 = vmatprep.mubr.bf16.mxu1 %v5430_v42  ;;  %v3164_v25 = vsel %vm7536_vm5, %v5695_v54, %v3163_v16  ;;  %v3167_v43 = vsel %vm7536_vm5, %v3165_v50, %v3166_v23  ;;  %v808_v45 = vrot.slane %v806_v28, 5  ;;  %v814_v49 = vrot.slane %v812_v29, 5  ;;  %v5625_v40 = vld [vmem:[%s7352_s6 + $0xc8] sm:$0x1] }
  0x79   : > { %6317 = vmatprep.subr.bf16.mxu1 %v7067_v53  ;;  %v791_v27 = vsel %vm7388_vm2, %v786_v18, %v790_v2  ;;  %v5727_v4 = vcombine.low %v3164_v25, %v3167_v43  ;;  %v3170_v58 = vrot.slane %v5621_v24, 5  ;;  %v3173_v32 = vrot.slane %v5622_v34, 5  ;;  %v5681_v42 = vld [vmem:[%s7352_s6 + $0xc0] sm:$0xe]  ;;  %v7873_v23 = vld [vmem:[%s7352_s6 + $0x64] sm:$0xf] }
  0x7a   : > { %6492 = vmatmul.mubr.bf16.gmra.mrb[20].mxu0 %v5725_v8  ;;  %v796_v8 = vrot.slane %v795_v13, 4  ;;  %v819_v15 = vor.u32 %v818_v11, %v814_v49  ;;  %v827_v47 = vshrl.u32 %v628_v44, 16  ;;  %v830_v59 = vshll.u32 %v628_v44, 16  ;;  %v631_v13 = vld [vmem:[%s7352_s6 + $0x60] sm:$0xf] }
  0x7b   : > { %v3172_v2 = vrot.slane %v3170_v58, 4  ;;  %v836_v41 = vshll.u32 %v7851_v35, 16  ;;  %v840_v48 = vshrl.u32 %v7851_v35, 16  ;;  %v846_v18 = vshll.u32 %v7854_v46, 16  ;;  %v634_v44 = vld [vmem:[%s7352_s6 + $0x6c] sm:$0xf] }
  0x7c   : > { %6318 = vmatpush3.bf16.msra.mxu1 %v7067_v53  ;;  %v5726_v53 = vcombine.low %v3157_v10, %v3160_v1  ;;  %v801_v63 = vsel %vm7388_vm2, %v796_v8, %v800_v12  ;;  %v809_v10 = vor.u32 %v808_v45, %v805_v9  ;;  %v3171_v1 = vsel %vm7536_vm5, %v5696_v14, %v3170_v58 }
  0x7d   : > { %6319 = vmatprep.subr.bf16.mxu1 %v7070_v52  ;;  %v5431_v5 = vcombine.low %v791_v27, %v801_v63  ;;  %v820_v60 = vrot.slane %v819_v15, 4  ;;  %v832_v55 = vrot.slane %v830_v59, 5  ;;  %v3174_v54 = vsel %vm7536_vm5, %v3172_v2, %v3173_v32  ;;  %v7885_v63 = vld [vmem:[%s7352_s6 + $0x70] sm:$0xf]  ;;  %v7069_v59 = vld [vmem:[%s7352_s6 + $0x18] sm:$0xff]  }
  0x7e   : > { %6495 = vmatprep.mubr.bf16.mxu0 %v5726_v53  ;;  %v810_v0 = vrot.slane %v809_v10, 4  ;;  %v829_v53 = vrot.slane %v827_v47, 4  ;;  %v838_v16 = vrot.slane %v836_v41, 5  ;;  %v5728_v24 = vcombine.low %v3171_v1, %v3174_v54 }
  0x7f   : > { %6288 = vmatmul.mubr.bf16.gmra.mrb[8].mxu1 %v5431_v5  ;;  %v842_v50 = vrot.slane %v840_v48, 4  ;;  %v848_v29 = vrot.slane %v846_v18, 5  ;;  %v5697_v34 = vrot.slane %v5681_v42, 9  ;;  %v3177_v36 = vrot.slane %v5624_v61, 5 }
  0x80   : > { %6320 = vmatpush3.bf16.msra.mxu1 %v7070_v52  ;;  %v822_v52 = vshll.u32 %v7830_v17, 16  ;;  %v815_v12 = vsel %vm7388_vm2, %v810_v0, %v814_v49  ;;  %v833_v25 = vor.u32 %v832_v55, %v829_v53  ;;  %v3180_v9 = vrot.slane %v5625_v40, 5 }
  0x81   : > { %6321 = vmatprep.subr.bf16.mxu1 %v7074_v56  ;;  %v843_v8 = vor.u32 %v842_v50, %v838_v16  ;;  %v851_v38 = vshrl.u32 %v631_v13, 16  ;;  %v3178_v43 = vsel %vm7536_vm5, %v5697_v34, %v3177_v36  ;;  %v3179_v45 = vrot.slane %v3177_v36, 4 }
  0x82   : > { %v824_v57 = vrot.slane %v822_v52, 5  ;;  %6496 = vmatmul.mubr.bf16.gmra.mrb[24].mxu0 %v5727_v4  ;;  %v834_v27 = vrot.slane %v833_v25, 4  ;;  %v854_v49 = vshll.u32 %v631_v13, 16  ;;  %v860_v52 = vshll.u32 %v7873_v23, 16  ;;  %v7890_v4 = vld [vmem:[%s8930_s1 + $0xc0] sm:$0xff]  }
  0x83   : > { %6499 = vmatprep.mubr.bf16.mxu0 %v5728_v24  ;;  %v844_v14 = vrot.slane %v843_v8, 4  ;;  %v853_v5 = vrot.slane %v851_v38, 4  ;;  %v864_v10 = vshrl.u32 %v7873_v23, 16  ;;  %v3181_v58 = vsel %vm7536_vm5, %v3179_v45, %v3180_v9  ;;  %v7910_v13 = vld [vmem:[%s7352_s6 + $0x7c] sm:$0xf] }
  0x84   : > { %6322 = vmatpush3.bf16.msra.mxu1 %v7074_v56  ;;  %v7082_v56 = vld [vmem:[%s8930_s1 + $0xb8] sm:$0xff]   ;;  %v825_v21 = vsel %vm7388_vm2, %v820_v60, %v824_v57  ;;  %v839_v11 = vsel %vm7388_vm2, %v834_v27, %v838_v16  ;;  %v7896_v57 = vld [vmem:[%s7352_s6 + $0x74] sm:$0x1]  ;;  %v856_v15 = vrot.slane %v854_v49, 5  ;;  %v862_v32 = vrot.slane %v860_v52, 5 }
  0x85   : > { %6323 = vmatprep.subr.bf16.mxu1 %v7078_v7  ;;  %v5432_v28 = vcombine.low %v815_v12, %v825_v21  ;;  %v849_v61 = vsel %vm7388_vm2, %v844_v14, %v848_v29  ;;  %v5729_v0 = vcombine.low %v3178_v43, %v3181_v58  ;;  %v866_v1 = vrot.slane %v864_v10, 4  ;;  %v637_v12 = vld [vmem:[%s7352_s6 + $0x78] sm:$0xf]  ;;  %v7914_v29 = vld [vmem:[%s7352_s6 + $0x80] sm:$0x1]  ;;  %v7073_v58 = vld [vmem:[%s7352_s6 + $0x30] sm:$0xff]  }
  0x86   : > { %v875_v2 = vshrl.u32 %v634_v44, 16  ;;  %v5433_v41 = vcombine.low %v839_v11, %v849_v61  ;;  %v857_v40 = vor.u32 %v856_v15, %v853_v5  ;;  %v878_v60 = vshll.u32 %v634_v44, 16  ;;  %v640_v49 = vld [vmem:[%s7352_s6 + $0x84] sm:$0xf]  ;;  %v7923_v52 = vld [vmem:[%s7352_s6 + $0x88] sm:$0xf] }
  0x87   : > { %6291 = vmatprep.mubr.bf16.mxu1 %v5432_v28  ;;  %v867_v53 = vor.u32 %v866_v1, %v862_v32  ;;  %v884_v48 = vshll.u32 %v7885_v63, 16  ;;  %v888_v42 = vshrl.u32 %v7885_v63, 16  ;;  %v894_v18 = vshll.u32 %v7896_v57, 16  ;;  %v7071_v28 = vld [vmem:[%s7352_s6 + $0x24] sm:$0xff]   ;;  %v7929_v15 = vld [vmem:[%s7352_s6 + $0x8c] sm:$0x1] }
  0x88   : > { %6324 = vmatpush3.bf16.msra.mxu1 %v7078_v7  ;;  %v7878_v7 = vld [vmem:[%s7352_s6 + $0x68] sm:$0x1]  ;;  %v877_v55 = vrot.slane %v875_v2, 4  ;;  %v858_v54 = vrot.slane %v857_v40, 4  ;;  %v880_v16 = vrot.slane %v878_v60, 5  ;;  %v899_v21 = vshrl.u32 %v637_v12, 16 }
  0x89   : > { %6325 = vmatprep.subr.bf16.mxu1 %v7082_v56  ;;  %v870_v47 = vshll.u32 %v7878_v7, 16  ;;  %6292 = vmatmul.mubr.bf16.gmra.mrb[12].mxu1 %v5433_v41  ;;  %v868_v24 = vrot.slane %v867_v53, 4  ;;  %v886_v25 = vrot.slane %v884_v48, 5  ;;  %v890_v50 = vrot.slane %v888_v42, 4  ;;  %v7080_v48 = vld [vmem:[%s8930_s1 + $0x1d0] sm:$0xff]  }
  0x8a   : > { %6500 = vmatmul.mubr.bf16.gmra.mrb[28].mxu0 %v5729_v0  ;;  %v902_v34 = vshll.u32 %v637_v12, 16  ;;  %v863_v36 = vsel %vm7388_vm2, %v858_v54, %v862_v32  ;;  %v881_v27 = vor.u32 %v880_v16, %v877_v55  ;;  %v896_v8 = vrot.slane %v894_v18, 5  ;;  %v7076_v0 = vld [vmem:[%s8930_s1 + $0x1c8] sm:$0xff]  }
  0x8b   : > { %6519 = vmatprep.mubr.bf16.mxu0 %v7069_v59  ;;  %v901_v9 = vrot.slane %v899_v21, 4  ;;  %v891_v44 = vor.u32 %v890_v50, %v886_v25  ;;  %v908_v45 = vshll.u32 %v7910_v13, 16  ;;  %v912_v5 = vshrl.u32 %v7910_v13, 16 }
  0x8c   : > { %6326 = vmatpush3.bf16.msra.mxu1 %v7082_v56  ;;  %v872_v56 = vrot.slane %v870_v47, 5  ;;  %v904_v43 = vrot.slane %v902_v34, 5  ;;  %v882_v14 = vrot.slane %v881_v27, 4  ;;  %v918_v10 = vshll.u32 %v7914_v29, 16  ;;  %v7953_v27 = vld [vmem:[%s7352_s6 + $0x98] sm:$0x1] }
  0x8d   : > { %6359 = vmatprep.subr.bf16.mxu1 %v7890_v4  ;;  %v892_v32 = vrot.slane %v891_v44, 4  ;;  %v910_v59 = vrot.slane %v908_v45, 5  ;;  %v923_v61 = vshrl.u32 %v640_v49, 16  ;;  %v914_v2 = vrot.slane %v912_v5, 4  ;;  %v646_v5 = vld [vmem:[%s7352_s6 + $0x9c] sm:$0xf] }
  0x8e   : > { %v873_v38 = vsel %vm7388_vm2, %v868_v24, %v872_v56  ;;  %v905_v47 = vor.u32 %v904_v43, %v901_v9  ;;  %v887_v1 = vsel %vm7388_vm2, %v882_v14, %v886_v25  ;;  %v920_v41 = vrot.slane %v918_v10, 5  ;;  %v7075_v24 = vld [vmem:[%s7352_s6 + $0x3c] sm:$0xff]   ;;  %v643_v25 = vld [vmem:[%s7352_s6 + $0x90] sm:$0xf] }
  0x8f   : > { %v5434_v11 = vcombine.low %v863_v36, %v873_v38  ;;  %v926_v40 = vshll.u32 %v640_v49, 16  ;;  %v897_v56 = vsel %vm7388_vm2, %v892_v32, %v896_v8  ;;  %v925_v53 = vrot.slane %v923_v61, 4  ;;  %v7950_v36 = vld [vmem:[%s7352_s6 + $0x94] sm:$0xf]  ;;  %v7077_v8 = vld [vmem:[%s7352_s6 + $0x48] sm:$0xff]   ;;  %v7084_v61 = vld [vmem:[%s8930_s1 + $0x1d8] sm:$0xff]  }
  0x90   : > { %v906_v60 = vrot.slane %v905_v47, 4  ;;  %v932_v55 = vshll.u32 %v7923_v52, 16  ;;  %v5435_v42 = vcombine.low %v887_v1, %v897_v56  ;;  %v915_v12 = vor.u32 %v914_v2, %v910_v59 }
  0x91   : > { %6295 = vmatprep.mubr.bf16.mxu1 %v5434_v11  ;;  %v928_v54 = vrot.slane %v926_v40, 5  ;;  %v936_v16 = vshrl.u32 %v7923_v52, 16  ;;  %v942_v21 = vshll.u32 %v7929_v15, 16  ;;  %v947_v38 = vshrl.u32 %v643_v25, 16  ;;  %v7971_v40 = vld [vmem:[%s7352_s6 + $0xa4] sm:$0x1] }
  0x92   : > { %6520 = vmatmul.mubr.bf16.vlgmr.msra.gmra.mrb[0].mxu0 %v7071_v28  ;;  %v934_v18 = vrot.slane %v932_v55, 5  ;;  %6296 = vmatmul.mubr.bf16.gmra.mrb[16].mxu1 %v5435_v42  ;;  %v911_v50 = vsel %vm7388_vm2, %v906_v60, %v910_v59  ;;  %v916_v28 = vrot.slane %v915_v12, 4  ;;  %v950_v44 = vshll.u32 %v643_v25, 16  ;;  %v7962_v59 = vld [vmem:[%s7352_s6 + $0xa0] sm:$0xf] }
  0x93   : > { %6552 = vmatpush3.bf16.msra.mxu0 %v7794_v22  ;;  %6523 = vmatprep.mubr.bf16.mxu0 %v7073_v58  ;;  %v929_v22 = vor.u32 %v928_v54, %v925_v53  ;;  %v938_v34 = vrot.slane %v936_v16, 4  ;;  %v944_v9 = vrot.slane %v942_v21, 5  ;;  %v956_v43 = vshll.u32 %v7950_v36, 16 }
  0x94   : > { %6553 = vmatprep.subr.bf16.mxu0 %v7076_v0  ;;  %v921_v45 = vsel %vm7388_vm2, %v916_v28, %v920_v41  ;;  %v960_v14 = vshrl.u32 %v7950_v36, 16  ;;  %v949_v58 = vrot.slane %v947_v38, 4  ;;  %v952_v32 = vrot.slane %v950_v44, 5  ;;  %v7088_v28 = vld [vmem:[%s8930_s1 + $0x1e0] sm:$0xff]  }
  0x95   : > { %v930_v49 = vrot.slane %v929_v22, 4  ;;  %v939_v11 = vor.u32 %v938_v34, %v934_v18  ;;  %v5436_v10 = vcombine.low %v911_v50, %v921_v45  ;;  %v958_v47 = vrot.slane %v956_v43, 5  ;;  %v7079_v50 = vld [vmem:[%s7352_s6 + $0x54] sm:$0xff]   ;;  %v7081_v38 = vld [vmem:[%s7352_s6 + $0x60] sm:$0xff]   ;;  %v649_v43 = vld [vmem:[%s7352_s6 + $0xa8] sm:$0xf] }
  0x96   : > { %v962_v41 = vrot.slane %v960_v14, 4  ;;  %v953_v56 = vor.u32 %v952_v32, %v949_v58  ;;  %v971_v60 = vshrl.u32 %v646_v5, 16  ;;  %v974_v53 = vshll.u32 %v646_v5, 16  ;;  %v7987_v45 = vld [vmem:[%s7352_s6 + $0xac] sm:$0xf] }
  0x97   : > { %6554 = vmatpush3.bf16.msra.mxu0 %v7076_v0  ;;  %v935_v1 = vsel %vm7388_vm2, %v930_v49, %v934_v18  ;;  %v940_v2 = vrot.slane %v939_v11, 4  ;;  %v966_v0 = vshll.u32 %v7953_v27, 16  ;;  %6299 = vmatprep.mubr.bf16.mxu1 %v5436_v10  ;;  %v980_v55 = vshll.u32 %v7962_v59, 16  ;;  %v7992_v5 = vld [vmem:[%s7352_s6 + $0xb0] sm:$0x1] }
  0x98   : > { %6555 = vmatprep.subr.bf16.mxu0 %v7080_v48  ;;  %v963_v12 = vor.u32 %v962_v41, %v958_v47  ;;  %v984_v16 = vshrl.u32 %v7962_v59, 16  ;;  %v954_v21 = vrot.slane %v953_v56, 4  ;;  %v976_v25 = vrot.slane %v974_v53, 5  ;;  %v652_v53 = vld [vmem:[%s7352_s6 + $0xb4] sm:$0xf] }
  0x99   : > { %v945_v42 = vsel %vm7388_vm2, %v940_v2, %v944_v9  ;;  %v968_v54 = vrot.slane %v966_v0, 5  ;;  %v982_v34 = vrot.slane %v980_v55, 5  ;;  %v995_v10 = vshrl.u32 %v649_v43, 16  ;;  %v7092_v2 = vld [vmem:[%s8930_s1 + $0x1e8] sm:$0xff]  }
  0x9a   : > { %6524 = vmatmul.mubr.bf16.gmra.mrb[4].mxu0 %v7075_v24  ;;  %v5437_v18 = vcombine.low %v935_v1, %v945_v42  ;;  %v973_v24 = vrot.slane %v971_v60, 4  ;;  %v964_v22 = vrot.slane %v963_v12, 4  ;;  %v986_v9 = vrot.slane %v984_v16, 4  ;;  %v8004_v12 = vld [vmem:[%s7352_s6 + $0xb8] sm:$0xf] }
  0x9b   : > { %6527 = vmatprep.mubr.bf16.mxu0 %v7077_v8  ;;  %6556 = vmatpush3.bf16.msra.mxu0 %v7080_v48  ;;  %v990_v8 = vshll.u32 %v7971_v40, 16  ;;  %v959_v48 = vsel %vm7388_vm2, %v954_v21, %v958_v47  ;;  %v998_v1 = vshll.u32 %v649_v43, 16  ;;  %v1004_v47 = vshll.u32 %v7987_v45, 16 }
  0x9c   : > { %6557 = vmatprep.subr.bf16.mxu0 %v7084_v61  ;;  %6300 = vmatmul.mubr.bf16.gmra.mrb[20].mxu1 %v5437_v18  ;;  %v977_v44 = vor.u32 %v976_v25, %v973_v24  ;;  %v969_v49 = vsel %vm7388_vm2, %v964_v22, %v968_v54  ;;  %v987_v11 = vor.u32 %v986_v9, %v982_v34  ;;  %v997_v0 = vrot.slane %v995_v10, 4  ;;  %v8007_v54 = vld [vmem:[%s7352_s6 + $0xbc] sm:$0x1]  ;;  %v7096_v25 = vld [vmem:[%s8930_s1 + $0x1f0] sm:$0xff]   ;;  %v7129_v10 = vld [vmem:[%s7352_s6 + $0x4] sm:$0xf] }
  0x9d   : > { %v992_v14 = vrot.slane %v990_v8, 5  ;;  %v5438_v58 = vcombine.low %v959_v48, %v969_v49  ;;  %v1008_v56 = vshrl.u32 %v7987_v45, 16  ;;  %v1014_v60 = vshll.u32 %v7992_v5, 16  ;;  %v7083_v8 = vld [vmem:[%s7352_s6 + $0x6c] sm:$0xff]  }
  0x9e   : > { %v978_v32 = vrot.slane %v977_v44, 4  ;;  %v988_v41 = vrot.slane %v987_v11, 4  ;;  %v1000_v55 = vrot.slane %v998_v1, 5  ;;  %v1006_v42 = vrot.slane %v1004_v47, 5 }
  0x9f   : > { %6558 = vmatpush3.bf16.msra.mxu0 %v7084_v61  ;;  %6303 = vmatprep.mubr.bf16.mxu1 %v5438_v58  ;;  %v1010_v18 = vrot.slane %v1008_v56, 4  ;;  %v1016_v21 = vrot.slane %v1014_v60, 5  ;;  %v1019_v24 = vshrl.u32 %v652_v53, 16  ;;  %v1028_v9 = vshll.u32 %v8004_v12, 16 }
  0xa0   : > { %6559 = vmatprep.subr.bf16.mxu0 %v7088_v28  ;;  %v983_v61 = vsel %vm7388_vm2, %v978_v32, %v982_v34  ;;  %v993_v16 = vsel %vm7388_vm2, %v988_v41, %v992_v14  ;;  %v1001_v22 = vor.u32 %v1000_v55, %v997_v0  ;;  %v1022_v34 = vshll.u32 %v652_v53, 16  ;;  %v7100_v32 = vld [vmem:[%s8930_s1 + $0x1f8] sm:$0xff]   ;;  %v7130_v0 = vld [vmem:[%s7352_s6 + $0x8] sm:$0x1] }
  0xa1   : > { %v1011_v48 = vor.u32 %v1010_v18, %v1006_v42  ;;  %v1021_v44 = vrot.slane %v1019_v24, 4  ;;  %v1032_v43 = vshrl.u32 %v8004_v12, 16  ;;  %v1030_v14 = vrot.slane %v1028_v9, 5  ;;  %v7132_v9 = vld [vmem:[%s7352_s6 + $0x14] sm:$0x1] }
  0xa2   : > { %6528 = vmatmul.mubr.bf16.gmra.mrb[8].mxu0 %v7079_v50  ;;  %v5439_v50 = vcombine.low %v983_v61, %v993_v16  ;;  %v1002_v49 = vrot.slane %v1001_v22, 4  ;;  %v1024_v11 = vrot.slane %v1022_v34, 5  ;;  %v1433_v58 = vrot.slane %v7129_v10, 5  ;;  %v1364_v61 = vld [vmem:[%s7352_s6] sm:$0xe] }
  0xa3   : > { %6531 = vmatprep.mubr.bf16.mxu0 %v7081_v38  ;;  %6560 = vmatpush3.bf16.msra.mxu0 %v7088_v28  ;;  %v1038_v38 = vshll.u32 %v8007_v54, 16  ;;  %v7085_v28 = vld [vmem:[%s7352_s6 + $0x78] sm:$0xff]   ;;  %v1012_v1 = vrot.slane %v1011_v48, 4  ;;  %v1034_v47 = vrot.slane %v1032_v43, 4  ;;  %v1436_v56 = vrot.slane %v7130_v0, 5 }
  0xa4   : > { %6561 = vmatprep.subr.bf16.mxu0 %v7092_v2  ;;  %6304 = vmatmul.mubr.bf16.gmra.mrb[24].mxu1 %v5439_v50  ;;  %v1007_v60 = vsel %vm7388_vm2, %v1002_v49, %v1006_v42  ;;  %v1025_v53 = vor.u32 %v1024_v11, %v1021_v44  ;;  %v1435_v55 = vrot.slane %v1433_v58, 4  ;;  %v7131_v16 = vld [vmem:[%s7352_s6 + $0x10] sm:$0xf]  ;;  %v5450_v22 = vrot.slane %v1364_v61, 9  ;;  %v1365_v34 = vld [vmem:[%s7352_s6 + $0xc] sm:$0xe] }
  0xa5   : > { %v1040_v41 = vrot.slane %v1038_v38, 5  ;;  %v1440_v18 = vrot.slane %v7131_v16, 5  ;;  %v1017_v24 = vsel %vm7388_vm2, %v1012_v1, %v1016_v21  ;;  %v1035_v50 = vor.u32 %v1034_v47, %v1030_v14  ;;  %v1366_v10 = vld [vmem:[%s7352_s6 + $0x18] sm:$0xe]  ;;  %v7089_v16 = vld [vmem:[%s7352_s6 + $0x90] sm:$0xff]  }
  0xa6   : > { %v1443_v48 = vrot.slane %v7132_v9, 5  ;;  %v1026_v43 = vrot.slane %v1025_v53, 4  ;;  %v1437_v42 = vsel %vm7536_vm5, %v1435_v55, %v1436_v56  ;;  %v5451_v44 = vrot.slane %v1365_v34, 9  ;;  %v7133_v56 = vld [vmem:[%s7352_s6 + $0x1c] sm:$0xf] }
  0xa7   : > { %6562 = vmatpush3.bf16.msra.mxu0 %v7092_v2  ;;  %v5440_v2 = vcombine.low %v1007_v60, %v1017_v24  ;;  %v1036_v38 = vrot.slane %v1035_v50, 4  ;;  %v1434_v21 = vsel %vm7536_vm5, %v5450_v22, %v1433_v58  ;;  %v1442_v49 = vrot.slane %v1440_v18, 4 }
  0xa8   : > { %6563 = vmatprep.subr.bf16.mxu0 %v7096_v25  ;;  %v1031_v11 = vsel %vm7388_vm2, %v1026_v43, %v1030_v14  ;;  %v5482_v47 = vcombine.low %v1434_v21, %v1437_v42  ;;  %v5452_v0 = vrot.slane %v1366_v10, 9  ;;  %v1447_v60 = vrot.slane %v7133_v56, 5  ;;  %v1369_v43 = vld [vmem:[%s7352_s6 + $0x3c] sm:$0xe]  ;;  %v8065_v42 = vld [vmem:[%s8930_s1 + $0x200] sm:$0xff]  }
  0xa9   : > { %6307 = vmatprep.mubr.bf16.mxu1 %v5440_v2  ;;  %v1041_v1 = vsel %vm7388_vm2, %v1036_v38, %v1040_v41  ;;  %v1454_v61 = vrot.slane %v7719_v19, 5  ;;  %v1457_v24 = vrot.slane %v7736_v37, 5  ;;  %v1461_v50 = vrot.slane %v7765_v6, 5  ;;  %v1368_v19 = vld [vmem:[%s7352_s6 + $0x30] sm:$0xe]  ;;  %v7090_v38 = vld [vmem:[%s8930_s1 + $0xc8] sm:$0xff]  }
  0xaa   : > { %6532 = vmatmul.mubr.bf16.gmra.mrb[12].mxu0 %v7083_v8  ;;  %v7087_v8 = vld [vmem:[%s7352_s6 + $0x84] sm:$0xff]   ;;  %v5441_v58 = vcombine.low %v1031_v11, %v1041_v1  ;;  %v1449_v55 = vrot.slane %v1447_v60, 4  ;;  %v1441_v22 = vsel %vm7536_vm5, %v5451_v44, %v1440_v18  ;;  %v1444_v34 = vsel %vm7536_vm5, %v1442_v49, %v1443_v48  ;;  %v7091_v21 = vld [vmem:[%s7352_s6 + $0x9c] sm:$0xff]  }
  0xab   : > { %6535 = vmatprep.mubr.bf16.mxu0 %v7085_v28  ;;  %6564 = vmatpush3.bf16.msra.mxu0 %v7096_v25  ;;  %v7134_v28 = vld [vmem:[%s7352_s6 + $0x20] sm:$0x1]  ;;  %v1367_v25 = vld [vmem:[%s7352_s6 + $0x24] sm:$0xe]  ;;  %v1456_v41 = vrot.slane %v1454_v61, 4  ;;  %v1448_v9 = vsel %vm7536_vm5, %v5452_v0, %v1447_v60  ;;  %v1463_v2 = vrot.slane %v1461_v50, 4  ;;  %v5483_v44 = vcombine.low %v1441_v22, %v1444_v34 }
  0xac   : > { %6565 = vmatprep.subr.bf16.mxu0 %v7100_v32  ;;  %v1450_v53 = vrot.slane %v7134_v28, 5  ;;  %v5453_v14 = vrot.slane %v1367_v25, 9  ;;  %6308 = vmatmul.mubr.bf16.gmra.mrb[28].mxu1 %v5441_v58  ;;  %v1464_v6 = vrot.slane %v7773_v31, 5  ;;  %v1468_v18 = vrot.slane %v7799_v39, 5  ;;  %v1370_v0 = vld [vmem:[%s7352_s6 + $0x48] sm:$0xe] }
  0xad   : > { %6327 = vmatprep.mubr.bf16.mxu1 %v5482_v47  ;;  %v1471_v48 = vrot.slane %v7802_v51, 5  ;;  %v5455_v49 = vrot.slane %v1369_v43, 9  ;;  %v1475_v31 = vrot.slane %v7827_v20, 5  ;;  %v1478_v51 = vrot.slane %v7830_v17, 5  ;;  %v7094_v25 = vld [vmem:[%s8930_s1 + $0xd0] sm:$0xff]  }
  0xae   : > { %v1451_v37 = vsel %vm7536_vm5, %v1449_v55, %v1450_v53  ;;  %v1470_v39 = vrot.slane %v1468_v18, 4  ;;  %v1455_v10 = vsel %vm7536_vm5, %v5453_v14, %v1454_v61  ;;  %v1458_v1 = vsel %vm7536_vm5, %v1456_v41, %v1457_v24  ;;  %v1371_v61 = vld [vmem:[%s7352_s6 + $0x54] sm:$0xe]  ;;  %v5811_v43 = vld [vmem:[%s7352_s6 + $0x1c] sm:$0xf] }
  0xaf   : > { %6566 = vmatpush3.bf16.msra.mxu0 %v7100_v32  ;;  %v5454_v32 = vrot.slane %v1368_v19, 9  ;;  %v5484_v11 = vcombine.low %v1448_v9, %v1451_v37  ;;  %v8081_v47 = vsel %vm7536_vm5, %v5455_v49, %v1468_v18  ;;  %v2539_v20 = vsel %vm7388_vm2, %v7728_v26, %v7705_v62  ;;  %v1372_v19 = vld [vmem:[%s7352_s6 + $0x60] sm:$0xe]  ;;  %v7149_v62 = vld [vmem:[%s7352_s6 + $0x94] sm:$0xf] }
  0xb0   : > { %6599 = vmatprep.subr.bf16.mxu0 %v8065_v42  ;;  %v8092_v56 = vsel %vm7536_vm5, %v1470_v39, %v1471_v48  ;;  %v5456_v60 = vrot.slane %v1370_v0, 9  ;;  %v1477_v58 = vrot.slane %v1475_v31, 4  ;;  %v1465_v28 = vsel %vm7536_vm5, %v1463_v2, %v1464_v6 }
  0xb1   : > { %v1462_v17 = vsel %vm7536_vm5, %v5454_v32, %v1461_v50  ;;  %v5487_v53 = vcombine.low %v8081_v47, %v8092_v56  ;;  %v1482_v55 = vrot.slane %v7851_v35, 5  ;;  %v5457_v41 = vrot.slane %v1371_v61, 9  ;;  %v7095_v32 = vld [vmem:[%s7352_s6 + $0xb4] sm:$0xff]  }
  0xb2   : > { %6536 = vmatmul.mubr.bf16.gmra.mrb[16].mxu0 %v7087_v8  ;;  %v7093_v8 = vld [vmem:[%s7352_s6 + $0xa8] sm:$0xff]   ;;  %v8107_v14 = vsel %vm7536_vm5, %v5456_v60, %v1475_v31  ;;  %v8111_v24 = vsel %vm7536_vm5, %v1477_v58, %v1478_v51  ;;  %v1489_v50 = vrot.slane %v7873_v23, 5  ;;  %v5485_v22 = vcombine.low %v1455_v10, %v1458_v1  ;;  %v7097_v51 = vld [vmem:[%s7352_s6 + $0xc0] sm:$0xff]  }
  0xb3   : > { %6539 = vmatprep.mubr.bf16.mxu0 %v7089_v16  ;;  %v1485_v16 = vrot.slane %v7854_v46, 5  ;;  %v5488_v35 = vcombine.low %v8107_v14, %v8111_v24  ;;  %v1484_v46 = vrot.slane %v1482_v55, 4  ;;  %v8119_v34 = vsel %vm7536_vm5, %v5457_v41, %v1482_v55  ;;  %v1373_v31 = vld [vmem:[%s7352_s6 + $0x6c] sm:$0xe]  ;;  %v7101_v55 = vld [vmem:[%s8930_s1 + $0xe0] sm:$0xff]  }
  0xb4   : > { %6328 = vmatmul.mubr.bf16.vlgmr.msra.gmra.mrb[0].mxu1 %v5483_v44  ;;  %v1491_v23 = vrot.slane %v1489_v50, 4  ;;  %v1496_v9 = vrot.slane %v7885_v63, 5  ;;  %v5486_v37 = vcombine.low %v1462_v17, %v1465_v28  ;;  %v5458_v6 = vrot.slane %v1372_v19, 9  ;;  %v5812_v63 = vld [vmem:[%s7352_s6 + $0x20] sm:$0x1] }
  0xb5   : > { %6360 = vmatpush3.bf16.msra.mxu1 %v7890_v4  ;;  %6331 = vmatprep.mubr.bf16.mxu1 %v5484_v11  ;;  %v1492_v4 = vrot.slane %v7878_v7, 5  ;;  %v8126_v2 = vsel %vm7536_vm5, %v1484_v46, %v1485_v16  ;;  %v5810_v7 = vld [vmem:[%s7352_s6 + $0x18] sm:$0xf]  ;;  %v1499_v18 = vrot.slane %v7896_v57, 5  ;;  %v3959_v39 = vshll.u32 %v5812_v63, 16 }
  0xb6   : > { %6361 = vmatprep.subr.bf16.mxu1 %v7090_v38  ;;  %v5489_v48 = vcombine.low %v8119_v34, %v8126_v2  ;;  %v3943_v49 = vshll.u32 %v5810_v7, 16  ;;  %v7098_v11 = vld [vmem:[%s8930_s1 + $0xd8] sm:$0xff]   ;;  %v8144_v57 = vsel %vm7536_vm5, %v5458_v6, %v1489_v50  ;;  %v5459_v17 = vrot.slane %v1373_v31, 9  ;;  %v5813_v16 = vld [vmem:[%s7352_s6 + $0x24] sm:$0xf] }
  0xb7   : > { %v8135_v44 = vsel %vm7536_vm5, %v1491_v23, %v1492_v4  ;;  %v3961_v28 = vrot.slane %v3959_v39, 5  ;;  %v1498_v61 = vrot.slane %v1496_v9, 4  ;;  %v8158_v46 = vld [vmem:[%s7352_s6 + $0x28] sm:$0xf]  ;;  %v8161_v4 = vld [vmem:[%s7352_s6 + $0x2c] sm:$0x1] }
  0xb8   : > { %v5490_v10 = vcombine.low %v8144_v57, %v8135_v44  ;;  %v3945_v0 = vrot.slane %v3943_v49, 5  ;;  %v8155_v50 = vsel %vm7536_vm5, %v5459_v17, %v1496_v9  ;;  %v3967_v19 = vshll.u32 %v5813_v16, 16  ;;  %v5816_v17 = vld [vmem:[%s7352_s6 + $0x30] sm:$0xf] }
  0xb9   : > { %6362 = vmatpush3.bf16.msra.mxu1 %v7090_v38  ;;  %v3949_v38 = vshll.u32 %v5811_v43, 16  ;;  %v3977_v9 = vshrl.u32 %v8158_v46, 16  ;;  %v1520_v57 = vrot.slane %v7953_v27, 5  ;;  %v7106_v27 = vld [vmem:[%s8930_s1 + $0x210] sm:$0xff]   ;;  %v2574_v26 = vshll.u32 %v7149_v62, 16 }
  0xba   : > { %6540 = vmatmul.mubr.bf16.gmra.mrb[20].mxu0 %v7091_v21  ;;  %v3940_v21 = vshrl.u32 %v5810_v7, 16  ;;  %6363 = vmatprep.subr.bf16.mxu1 %v7094_v25  ;;  %v3969_v63 = vrot.slane %v3967_v19, 5 }
  0xbb   : > { %6543 = vmatprep.mubr.bf16.mxu0 %v7093_v8  ;;  %v3953_v8 = vshrl.u32 %v5811_v43, 16  ;;  %v3951_v60 = vrot.slane %v3949_v38, 5  ;;  %v3983_v38 = vshll.u32 %v8161_v4, 16 }
  0xbc   : > { %v3942_v1 = vrot.slane %v3940_v21, 4  ;;  %6332 = vmatmul.mubr.bf16.gmra.mrb[4].mxu1 %v5485_v22  ;;  %v3964_v22 = vshrl.u32 %v5813_v16, 16  ;;  %v7099_v21 = vld [vmem:[%s7352_s6 + $0xcc] sm:$0xff]  }
  0xbd   : > { %v3955_v58 = vrot.slane %v3953_v8, 4  ;;  %6335 = vmatprep.mubr.bf16.mxu1 %v5486_v37  ;;  %6364 = vmatpush3.bf16.msra.mxu1 %v7094_v25  ;;  %v8165_v37 = vsel %vm7536_vm5, %v1498_v61, %v1499_v18  ;;  %v3973_v25 = vshll.u32 %v8158_v46, 16  ;;  %v3979_v18 = vrot.slane %v3977_v9, 4  ;;  %v7103_v8 = vld [vmem:[%s8930_s1 + $0xe8] sm:$0xff]  }
  0xbe   : > { %v3946_v41 = vor.u32 %v3945_v0, %v3942_v1  ;;  %6365 = vmatprep.subr.bf16.mxu1 %v7098_v11  ;;  %v5491_v7 = vcombine.low %v8155_v50, %v8165_v37  ;;  %v3966_v43 = vrot.slane %v3964_v22, 4  ;;  %v1503_v0 = vrot.slane %v7910_v13, 5  ;;  %v1378_v37 = vld [vmem:[%s7352_s6 + $0xa8] sm:$0xe] }
  0xbf   : > { %v3956_v23 = vor.u32 %v3955_v58, %v3951_v60  ;;  %v3975_v31 = vrot.slane %v3973_v25, 5  ;;  %v8182_v58 = vld [vmem:[%s7352_s6 + $0x34] sm:$0xf]  ;;  %v1506_v22 = vrot.slane %v7914_v29, 5  ;;  %v3988_v25 = vshrl.u32 %v5816_v17, 16 }
  0xc0   : > { %v3947_v6 = vrot.slane %v3946_v41, 4  ;;  %v3985_v41 = vrot.slane %v3983_v38, 5  ;;  %v3991_v9 = vshll.u32 %v5816_v17, 16  ;;  %v1375_v29 = vld [vmem:[%s7352_s6 + $0x84] sm:$0xe]  ;;  %v4001_v56 = vshrl.u32 %v8182_v58, 16 }
  0xc1   : > { %v3957_v49 = vrot.slane %v3956_v23, 4  ;;  %6366 = vmatpush3.bf16.msra.mxu1 %v7098_v11  ;;  %v3980_v16 = vor.u32 %v3979_v18, %v3975_v31  ;;  %v8188_v11 = vld [vmem:[%s7352_s6 + $0x38] sm:$0x1]  ;;  %v1505_v23 = vrot.slane %v1503_v0, 4  ;;  %v3990_v24 = vrot.slane %v3988_v25, 4 }
  0xc2   : > { %6544 = vmatmul.mubr.bf16.gmra.mrb[24].mxu0 %v7095_v32  ;;  %v1374_v32 = vld [vmem:[%s7352_s6 + $0x78] sm:$0xe]  ;;  %v3952_v39 = vsel %vm7388_vm2, %v3947_v6, %v3951_v60  ;;  %6367 = vmatprep.subr.bf16.mxu1 %v7101_v55  ;;  %v3997_v6 = vshll.u32 %v8182_v58, 16  ;;  %v4003_v38 = vrot.slane %v4001_v56, 4 }
  0xc3   : > { %6547 = vmatprep.mubr.bf16.mxu0 %v7097_v51  ;;  %v3970_v51 = vor.u32 %v3969_v63, %v3966_v43  ;;  %v5460_v1 = vrot.slane %v1374_v32, 9  ;;  %v3962_v61 = vsel %vm7388_vm2, %v3957_v49, %v3961_v28  ;;  %v3981_v28 = vrot.slane %v3980_v16, 4  ;;  %v7105_v43 = vld [vmem:[%s8930_s1 + $0xf0] sm:$0xff]   ;;  %v5819_v32 = vld [vmem:[%s7352_s6 + $0x3c] sm:$0xf] }
  0xc4   : > { %v5874_v19 = vcombine.low %v3952_v39, %v3962_v61  ;;  %6336 = vmatmul.mubr.bf16.gmra.mrb[8].mxu1 %v5487_v53  ;;  %v8209_v47 = vsel %vm7536_vm5, %v1505_v23, %v1506_v22  ;;  %v4007_v53 = vshll.u32 %v8188_v11, 16  ;;  %v3999_v18 = vrot.slane %v3997_v6, 5  ;;  %v8224_v61 = vld [vmem:[%s7352_s6 + $0x44] sm:$0x1]  ;;  %v7107_v25 = vld [vmem:[%s8930_s1 + $0xf8] sm:$0xff]  }
  0xc5   : > { %v3971_v60 = vrot.slane %v3970_v51, 4  ;;  %v8192_v13 = vsel %vm7536_vm5, %v5460_v1, %v1503_v0  ;;  %6339 = vmatprep.mubr.bf16.mxu1 %v5488_v35  ;;  %6368 = vmatpush3.bf16.msra.mxu1 %v7101_v55  ;;  %v3986_v49 = vsel %vm7388_vm2, %v3981_v28, %v3985_v41  ;;  %v3993_v35 = vrot.slane %v3991_v9, 5  ;;  %v8219_v55 = vld [vmem:[%s7352_s6 + $0x40] sm:$0xf] }
  0xc6   : > { %v5492_v14 = vcombine.low %v8192_v13, %v8209_v47  ;;  %6369 = vmatprep.subr.bf16.mxu1 %v7103_v8  ;;  %v4009_v39 = vrot.slane %v4007_v53, 5  ;;  %v1510_v1 = vrot.slane %v7923_v52, 5  ;;  %v1513_v0 = vrot.slane %v7929_v15, 5  ;;  %v7104_v52 = vld [vmem:[%s8930_s1 + $0x208] sm:$0xff]   ;;  %v1376_v15 = vld [vmem:[%s7352_s6 + $0x90] sm:$0xe] }
  0xc7   : > { %v3976_v63 = vsel %vm7388_vm2, %v3971_v60, %v3975_v31  ;;  %v3994_v51 = vor.u32 %v3993_v35, %v3990_v24  ;;  %v4004_v17 = vor.u32 %v4003_v38, %v3999_v18  ;;  %v4012_v16 = vshrl.u32 %v5819_v32, 16  ;;  %v8258_v35 = vld [vmem:[%s7352_s6 + $0x4c] sm:$0xf] }
  0xc8   : > { %v5875_v31 = vcombine.low %v3976_v63, %v3986_v49  ;;  %v4015_v41 = vshll.u32 %v5819_v32, 16  ;;  %v4021_v22 = vshll.u32 %v8219_v55, 16  ;;  %v1512_v23 = vrot.slane %v1510_v1, 4  ;;  %v5822_v49 = vld [vmem:[%s7352_s6 + $0x48] sm:$0xf] }
  0xc9   : > { %6370 = vmatpush3.bf16.msra.mxu1 %v7103_v8  ;;  %v4025_v28 = vshrl.u32 %v8219_v55, 16  ;;  %v4005_v8 = vrot.slane %v4004_v17, 4  ;;  %v4014_v9 = vrot.slane %v4012_v16, 4  ;;  %v4031_v32 = vshll.u32 %v8224_v61, 16 }
  0xca   : > { %6548 = vmatmul.mubr.bf16.gmra.mrb[28].mxu0 %v7099_v21  ;;  %v5461_v21 = vrot.slane %v1375_v29, 9  ;;  %6371 = vmatprep.subr.bf16.mxu1 %v7105_v43  ;;  %v4017_v6 = vrot.slane %v4015_v41, 5  ;;  %v4023_v29 = vrot.slane %v4021_v22, 5  ;;  %v8246_v56 = vsel %vm7536_vm5, %v1512_v23, %v1513_v0  ;;  %v1377_v22 = vld [vmem:[%s7352_s6 + $0x9c] sm:$0xe] }
  0xcb   : > { %6567 = vmatprep.mubr.bf16.mxu0 %v5874_v19  ;;  %v3995_v19 = vrot.slane %v3994_v51, 4  ;;  %v4027_v53 = vrot.slane %v4025_v28, 4  ;;  %v4010_v34 = vsel %vm7388_vm2, %v4005_v8, %v4009_v39  ;;  %v5462_v24 = vrot.slane %v1376_v15, 9  ;;  %v5825_v8 = vld [vmem:[%s7352_s6 + $0x54] sm:$0xf] }
  0xcc   : > { %v8229_v60 = vsel %vm7536_vm5, %v5461_v21, %v1510_v1  ;;  %6340 = vmatmul.mubr.bf16.gmra.mrb[12].mxu1 %v5489_v48  ;;  %v4018_v48 = vor.u32 %v4017_v6, %v4014_v9  ;;  %v4033_v51 = vrot.slane %v4031_v32, 5  ;;  %v1517_v21 = vrot.slane %v7950_v36, 5  ;;  %v8287_v9 = vld [vmem:[%s7352_s6 + $0x58] sm:$0xf]  ;;  %v8292_v6 = vld [vmem:[%s8930_s1 + $0x100] sm:$0xff]  }
  0xcd   : > { %v4000_v63 = vsel %vm7388_vm2, %v3995_v19, %v3999_v18  ;;  %6343 = vmatprep.mubr.bf16.mxu1 %v5490_v10  ;;  %v5493_v2 = vcombine.low %v8229_v60, %v8246_v56  ;;  %6372 = vmatpush3.bf16.msra.mxu1 %v7105_v43  ;;  %v4028_v38 = vor.u32 %v4027_v53, %v4023_v29  ;;  %v8264_v10 = vld [vmem:[%s7352_s6 + $0x50] sm:$0x1]  ;;  %v4036_v39 = vshrl.u32 %v5822_v49, 16  ;;  %v7108_v32 = vld [vmem:[%s8930_s1 + $0x218] sm:$0xff]  }
  0xce   : > { %v5876_v18 = vcombine.low %v4000_v63, %v4010_v34  ;;  %6373 = vmatprep.subr.bf16.mxu1 %v7107_v25  ;;  %v4019_v44 = vrot.slane %v4018_v48, 4  ;;  %v4039_v1 = vshll.u32 %v5822_v49, 16  ;;  %v8268_v43 = vsel %vm7536_vm5, %v5462_v24, %v1517_v21  ;;  %v8306_v24 = vld [vmem:[%s7352_s6 + $0x5c] sm:$0x1] }
  0xcf   : > { %v4029_v0 = vrot.slane %v4028_v38, 4  ;;  %v1519_v36 = vrot.slane %v1517_v21, 4  ;;  %v4038_v17 = vrot.slane %v4036_v39, 4  ;;  %v4049_v41 = vshrl.u32 %v8258_v35, 16  ;;  %v8322_v39 = vld [vmem:[%s7352_s6 + $0x64] sm:$0xf] }
  0xd0   : > { %v4041_v16 = vrot.slane %v4039_v1, 5  ;;  %v4055_v15 = vshll.u32 %v8264_v10, 16  ;;  %v5463_v34 = vrot.slane %v1377_v22, 9  ;;  %v1524_v48 = vrot.slane %v7962_v59, 5 }
  0xd1   : > { %6374 = vmatpush3.bf16.msra.mxu1 %v7107_v25  ;;  %v4034_v19 = vsel %vm7388_vm2, %v4029_v0, %v4033_v51  ;;  %v8282_v23 = vsel %vm7536_vm5, %v1519_v36, %v1520_v57  ;;  %v4051_v53 = vrot.slane %v4049_v41, 4  ;;  %v4060_v51 = vshrl.u32 %v5825_v8, 16 }
  0xd2   : > { %6568 = vmatmul.mubr.bf16.vlgmr.msra.gmra.mrb[0].mxu0 %v5875_v31  ;;  %v4024_v31 = vsel %vm7388_vm2, %v4019_v44, %v4023_v29  ;;  %6647 = vmatprep.subr.bf16.mxu1 %v8292_v6  ;;  %v5494_v29 = vcombine.low %v8268_v43, %v8282_v23  ;;  %v4042_v63 = vor.u32 %v4041_v16, %v4038_v17  ;;  %v4057_v49 = vrot.slane %v4055_v15, 5  ;;  %v5828_v44 = vld [vmem:[%s7352_s6 + $0x60] sm:$0xf] }
  0xd3   : > { %6600 = vmatpush3.bf16.msra.mxu0 %v8065_v42  ;;  %6571 = vmatprep.mubr.bf16.mxu0 %v5876_v18  ;;  %v4045_v42 = vshll.u32 %v8258_v35, 16  ;;  %v5877_v25 = vcombine.low %v4024_v31, %v4034_v19  ;;  %v4063_v50 = vshll.u32 %v5825_v8, 16  ;;  %v1526_v59 = vrot.slane %v1524_v48, 4  ;;  %v7111_v16 = vld [vmem:[%s8930_s1 + $0x220] sm:$0xff]  }
  0xd4   : > { %6601 = vmatprep.subr.bf16.mxu0 %v7104_v52  ;;  %6344 = vmatmul.mubr.bf16.gmra.mrb[16].mxu1 %v5491_v7  ;;  %v4043_v18 = vrot.slane %v4042_v63, 4  ;;  %v8314_v7 = vsel %vm7536_vm5, %v5463_v34, %v1524_v48  ;;  %v4073_v21 = vshrl.u32 %v8287_v9, 16  ;;  %v4079_v36 = vshll.u32 %v8306_v24, 16 }
  0xd5   : > { %v4047_v28 = vrot.slane %v4045_v42, 5  ;;  %6347 = vmatprep.mubr.bf16.mxu1 %v5492_v14  ;;  %v4062_v14 = vrot.slane %v4060_v51, 4  ;;  %v4065_v57 = vrot.slane %v4063_v50, 5  ;;  %v5464_v17 = vrot.slane %v1378_v37, 9  ;;  %v8361_v50 = vld [vmem:[%s7352_s6 + $0x70] sm:$0xf] }
  0xd6   : > { %v4075_v43 = vrot.slane %v4073_v21, 4  ;;  %v4081_v19 = vrot.slane %v4079_v36, 5  ;;  %v1531_v23 = vrot.slane %v7987_v45, 5  ;;  %v1534_v8 = vrot.slane %v7992_v5, 5  ;;  %v7114_v5 = vld [vmem:[%s8930_s1 + $0x228] sm:$0xff]  }
  0xd7   : > { %6602 = vmatpush3.bf16.msra.mxu0 %v7104_v52  ;;  %v1527_v52 = vrot.slane %v7971_v40, 5  ;;  %v4052_v38 = vor.u32 %v4051_v53, %v4047_v28  ;;  %v4069_v40 = vshll.u32 %v8287_v9, 16  ;;  %v4048_v13 = vsel %vm7388_vm2, %v4043_v18, %v4047_v28  ;;  %v8338_v28 = vld [vmem:[%s7352_s6 + $0x68] sm:$0x1]  ;;  %v1379_v53 = vld [vmem:[%s7352_s6 + $0xb4] sm:$0xe] }
  0xd8   : > { %6603 = vmatprep.subr.bf16.mxu0 %v7106_v27  ;;  %v4087_v63 = vshll.u32 %v5828_v44, 16  ;;  %v1532_v45 = vsel %vm7536_vm5, %v5464_v17, %v1531_v23  ;;  %v1533_v34 = vrot.slane %v1531_v23, 4  ;;  %v4093_v48 = vshll.u32 %v8322_v39, 16  ;;  %v8364_v21 = vld [vmem:[%s7352_s6 + $0x74] sm:$0x1] }
  0xd9   : > { %v4053_v47 = vrot.slane %v4052_v38, 4  ;;  %v8326_v1 = vsel %vm7536_vm5, %v1526_v59, %v1527_v52  ;;  %v4071_v0 = vrot.slane %v4069_v40, 5  ;;  %v4103_v51 = vshll.u32 %v8338_v28, 16  ;;  %v8379_v23 = vld [vmem:[%s7352_s6 + $0x7c] sm:$0xf] }
  0xda   : > { %6572 = vmatmul.mubr.bf16.gmra.mrb[4].mxu0 %v5877_v25  ;;  %v5495_v31 = vcombine.low %v8314_v7, %v8326_v1  ;;  %v4084_v25 = vshrl.u32 %v5828_v44, 16  ;;  %v1535_v18 = vsel %vm7536_vm5, %v1533_v34, %v1534_v8  ;;  %v4095_v38 = vrot.slane %v4093_v48, 5  ;;  %v7117_v44 = vld [vmem:[%s8930_s1 + $0x230] sm:$0xff]   ;;  %v5834_v1 = vld [vmem:[%s7352_s6 + $0x78] sm:$0xf] }
  0xdb   : > { %6604 = vmatpush3.bf16.msra.mxu0 %v7106_v27  ;;  %v4058_v42 = vsel %vm7388_vm2, %v4053_v47, %v4057_v49  ;;  %v4066_v27 = vor.u32 %v4065_v57, %v4062_v14  ;;  %v4076_v22 = vor.u32 %v4075_v43, %v4071_v0  ;;  %v5496_v7 = vcombine.low %v1532_v45, %v1535_v18 }
  0xdc   : > { %6605 = vmatprep.subr.bf16.mxu0 %v7108_v32  ;;  %v5878_v41 = vcombine.low %v4048_v13, %v4058_v42  ;;  %6348 = vmatmul.mubr.bf16.gmra.mrb[20].mxu1 %v5493_v2  ;;  %v4086_v56 = vrot.slane %v4084_v25, 4  ;;  %v4089_v2 = vrot.slane %v4087_v63, 5  ;;  %v4105_v13 = vrot.slane %v4103_v51, 5 }
  0xdd   : > { %v4067_v15 = vrot.slane %v4066_v27, 4  ;;  %v4077_v49 = vrot.slane %v4076_v22, 4  ;;  %6351 = vmatprep.mubr.bf16.mxu1 %v5494_v29  ;;  %v5831_v29 = vld [vmem:[%s7352_s6 + $0x6c] sm:$0xf]  ;;  %v5465_v47 = vrot.slane %v1379_v53, 9  ;;  %v1538_v14 = vrot.slane %v8004_v12, 5 }
  0xde   : > { %6575 = vmatprep.mubr.bf16.mxu0 %v5878_v41  ;;  %v4090_v59 = vor.u32 %v4089_v2, %v4086_v56  ;;  %v1541_v57 = vrot.slane %v8007_v54, 5  ;;  %v4108_v36 = vshrl.u32 %v5831_v29, 16  ;;  %v4111_v42 = vshll.u32 %v5831_v29, 16  ;;  %v8385_v53 = vld [vmem:[%s7352_s6 + $0x80] sm:$0x1] }
  0xdf   : > { %6606 = vmatpush3.bf16.msra.mxu0 %v7108_v32  ;;  %v4072_v60 = vsel %vm7388_vm2, %v4067_v15, %v4071_v0  ;;  %v4097_v32 = vshrl.u32 %v8322_v39, 16  ;;  %v4082_v52 = vsel %vm7388_vm2, %v4077_v49, %v4081_v19  ;;  %v1539_v27 = vsel %vm7536_vm5, %v5465_v47, %v1538_v14  ;;  %v7120_v49 = vld [vmem:[%s8930_s1 + $0x238] sm:$0xff]   ;;  %v5840_v47 = vld [vmem:[%s7352_s6 + $0x90] sm:$0xf] }
  0xe0   : > { %6607 = vmatprep.subr.bf16.mxu0 %v7111_v16  ;;  %v5879_v37 = vcombine.low %v4072_v60, %v4082_v52  ;;  %v4091_v0 = vrot.slane %v4090_v59, 4  ;;  %v1540_v17 = vrot.slane %v1538_v14, 4  ;;  %v4121_v41 = vshrl.u32 %v8361_v50, 16  ;;  %v8394_v52 = vld [vmem:[%s7352_s6 + $0x88] sm:$0xf] }
  0xe1   : > { %v4099_v40 = vrot.slane %v4097_v32, 4  ;;  %v4110_v22 = vrot.slane %v4108_v36, 4  ;;  %v4113_v19 = vrot.slane %v4111_v42, 5  ;;  %v4127_v63 = vshll.u32 %v8364_v21, 16 }
  0xe2   : > { %6576 = vmatmul.mubr.bf16.gmra.mrb[8].mxu0 %v5879_v37  ;;  %v4096_v12 = vsel %vm7388_vm2, %v4091_v0, %v4095_v38  ;;  %v1542_v15 = vsel %vm7536_vm5, %v1540_v17, %v1541_v57  ;;  %v4123_v25 = vrot.slane %v4121_v41, 4  ;;  %v4132_v48 = vshrl.u32 %v5834_v1, 16  ;;  %v8399_v37 = vld [vmem:[%s7352_s6 + $0x8c] sm:$0x1] }
  0xe3   : > { %6608 = vmatpush3.bf16.msra.mxu0 %v7111_v16  ;;  %v4100_v43 = vor.u32 %v4099_v40, %v4095_v38  ;;  %v4117_v16 = vshll.u32 %v8361_v50, 16  ;;  %v5497_v45 = vcombine.low %v1539_v27, %v1542_v15  ;;  %v4114_v34 = vor.u32 %v4113_v19, %v4110_v22  ;;  %v7109_v57 = vld [vmem:[%s7352_s6 + $0xc] sm:$0xff]  }
  0xe4   : > { %6609 = vmatprep.subr.bf16.mxu0 %v7114_v5  ;;  %6352 = vmatmul.mubr.bf16.gmra.mrb[24].mxu1 %v5495_v31  ;;  %v4129_v2 = vrot.slane %v4127_v63, 5  ;;  %v4135_v32 = vshll.u32 %v5834_v1, 16  ;;  %v4134_v38 = vrot.slane %v4132_v48, 4  ;;  %v4141_v51 = vshll.u32 %v8379_v23, 16 }
  0xe5   : > { %v4101_v54 = vrot.slane %v4100_v43, 4  ;;  %v4119_v8 = vrot.slane %v4117_v16, 5  ;;  %6355 = vmatprep.mubr.bf16.mxu1 %v5496_v7  ;;  %v4115_v18 = vrot.slane %v4114_v34, 4  ;;  %v4145_v29 = vshrl.u32 %v8379_v23, 16 }
  0xe6   : > { %v4137_v59 = vrot.slane %v4135_v32, 5  ;;  %v4151_v40 = vshll.u32 %v8385_v53, 16  ;;  %v4143_v1 = vrot.slane %v4141_v51, 5  ;;  %v4169_v19 = vshrl.u32 %v8394_v52, 16 }
  0xe7   : > { %6610 = vmatpush3.bf16.msra.mxu0 %v7114_v5  ;;  %v4106_v31 = vsel %vm7388_vm2, %v4101_v54, %v4105_v13  ;;  %v5837_v5 = vld [vmem:[%s7352_s6 + $0x84] sm:$0xf]  ;;  %v4124_v56 = vor.u32 %v4123_v25, %v4119_v8  ;;  %v4120_v14 = vsel %vm7388_vm2, %v4115_v18, %v4119_v8  ;;  %v4147_v0 = vrot.slane %v4145_v29, 4  ;;  %v8410_v54 = vld [vmem:[%s7352_s6 + $0x94] sm:$0xf] }
  0xe8   : > { %6611 = vmatprep.subr.bf16.mxu0 %v7117_v44  ;;  %v5880_v60 = vcombine.low %v4096_v12, %v4106_v31  ;;  %v4156_v13 = vshrl.u32 %v5837_v5, 16  ;;  %v4159_v43 = vshll.u32 %v5837_v5, 16  ;;  %v4138_v36 = vor.u32 %v4137_v59, %v4134_v38  ;;  %v8415_v8 = vld [vmem:[%s7352_s6 + $0x98] sm:$0x1]  ;;  %v5843_v5 = vld [vmem:[%s7352_s6 + $0x9c] sm:$0xf] }
  0xe9   : > { %v4125_v7 = vrot.slane %v4124_v56, 4  ;;  %v4153_v42 = vrot.slane %v4151_v40, 5  ;;  %v4148_v16 = vor.u32 %v4147_v0, %v4143_v1  ;;  %v4165_v12 = vshll.u32 %v8394_v52, 16  ;;  %v7112_v38 = vld [vmem:[%s7352_s6 + $0x24] sm:$0xff]  }
  0xea   : > { %6579 = vmatprep.mubr.bf16.mxu0 %v5880_v60  ;;  %v4158_v27 = vrot.slane %v4156_v13, 4  ;;  %v4161_v41 = vrot.slane %v4159_v43, 5  ;;  %v4139_v22 = vrot.slane %v4138_v36, 4  ;;  %v4175_v15 = vshll.u32 %v8399_v37, 16 }
  0xeb   : > { %6612 = vmatpush3.bf16.msra.mxu0 %v7117_v44  ;;  %v4130_v44 = vsel %vm7388_vm2, %v4125_v7, %v4129_v2  ;;  %v4180_v25 = vshrl.u32 %v5840_v47, 16  ;;  %v4149_v63 = vrot.slane %v4148_v16, 4  ;;  %v4167_v34 = vrot.slane %v4165_v12, 5 }
  0xec   : > { %6613 = vmatprep.subr.bf16.mxu0 %v7120_v49  ;;  %v5881_v17 = vcombine.low %v4120_v14, %v4130_v44  ;;  %6356 = vmatmul.mubr.bf16.gmra.mrb[28].mxu1 %v5497_v45  ;;  %v4162_v31 = vor.u32 %v4161_v41, %v4158_v27  ;;  %v4183_v48 = vshll.u32 %v5840_v47, 16  ;;  %v7110_v45 = vld [vmem:[%s7352_s6 + $0x18] sm:$0xff]   ;;  %v4171_v60 = vrot.slane %v4169_v19, 4  ;;  %v8428_v47 = vld [vmem:[%s7352_s6 + $0xa0] sm:$0xf] }
  0xed   : > { %6375 = vmatprep.mubr.bf16.mxu1 %v7109_v57  ;;  %v4177_v56 = vrot.slane %v4175_v15, 5  ;;  %v4182_v2 = vrot.slane %v4180_v25, 4  ;;  %v4154_v32 = vsel %vm7388_vm2, %v4149_v63, %v4153_v42  ;;  %v4189_v29 = vshll.u32 %v8410_v54, 16  ;;  %v8431_v14 = vld [vmem:[%s7352_s6 + $0xa4] sm:$0x1] }
  0xee   : > { %6580 = vmatmul.mubr.bf16.gmra.mrb[12].mxu0 %v5881_v17  ;;  %v4163_v18 = vrot.slane %v4162_v31, 4  ;;  %v4185_v51 = vrot.slane %v4183_v48, 5  ;;  %v4172_v59 = vor.u32 %v4171_v60, %v4167_v34  ;;  %v4193_v40 = vshrl.u32 %v8410_v54, 16  ;;  %v5846_v44 = vld [vmem:[%s7352_s6 + $0xa8] sm:$0xf] }
  0xef   : > { %6614 = vmatpush3.bf16.msra.mxu0 %v7120_v49  ;;  %v4144_v49 = vsel %vm7388_vm2, %v4139_v22, %v4143_v1  ;;  %v4199_v13 = vshll.u32 %v8415_v8, 16  ;;  %v4191_v0 = vrot.slane %v4189_v29, 5  ;;  %v4204_v43 = vshrl.u32 %v5843_v5, 16  ;;  %v8442_v31 = vld [vmem:[%s7352_s6 + $0xac] sm:$0xf] }
  0xf0   : > { %v5882_v7 = vcombine.low %v4144_v49, %v4154_v32  ;;  %v4168_v57 = vsel %vm7388_vm2, %v4163_v18, %v4167_v34  ;;  %v4186_v1 = vor.u32 %v4185_v51, %v4182_v2  ;;  %v4173_v36 = vrot.slane %v4172_v59, 4  ;;  %v5849_v60 = vld [vmem:[%s7352_s6 + $0xb4] sm:$0xf]  ;;  %v7136_v2 = vld [vmem:[%s8930_s1 + $0x108] sm:$0xff]  }
  0xf1   : > { %v4195_v42 = vrot.slane %v4193_v40, 4  ;;  %v4201_v27 = vrot.slane %v4199_v13, 5  ;;  %v4207_v17 = vshll.u32 %v5843_v5, 16  ;;  %v4206_v41 = vrot.slane %v4204_v43, 4  ;;  %v7113_v13 = vld [vmem:[%s7352_s6 + $0x30] sm:$0xff]  }
  0xf2   : > { %6583 = vmatprep.mubr.bf16.mxu0 %v5882_v7  ;;  %v4187_v16 = vrot.slane %v4186_v1, 4  ;;  %v4213_v12 = vshll.u32 %v8428_v47, 16  ;;  %v4217_v22 = vshrl.u32 %v8428_v47, 16  ;;  %v4178_v19 = vsel %vm7388_vm2, %v4173_v36, %v4177_v56  ;;  %v8464_v43 = vld [vmem:[%s7352_s6 + $0xbc] sm:$0x1] }
  0xf3   : > { %v4196_v15 = vor.u32 %v4195_v42, %v4191_v0  ;;  %v4209_v25 = vrot.slane %v4207_v17, 5  ;;  %v4223_v63 = vshll.u32 %v8431_v14, 16  ;;  %v5883_v34 = vcombine.low %v4168_v57, %v4178_v19  ;;  %v7115_v17 = vld [vmem:[%s7352_s6 + $0x3c] sm:$0xff]   ;;  %v7137_v19 = vld [vmem:[%s8930_s1 + $0x110] sm:$0xff]  }
  0xf4   : > { %6376 = vmatmul.mubr.bf16.vlgmr.msra.gmra.mrb[0].mxu1 %v7110_v45  ;;  %v4192_v48 = vsel %vm7388_vm2, %v4187_v16, %v4191_v0  ;;  %v4215_v5 = vrot.slane %v4213_v12, 5  ;;  %v4219_v49 = vrot.slane %v4217_v22, 4  ;;  %v8448_v45 = vld [vmem:[%s7352_s6 + $0xb0] sm:$0x1]  ;;  %v4231_v29 = vshll.u32 %v5846_v44, 16 }
  0xf5   : > { %6655 = vmatpush3.bf16.msra.mxu1 %v8292_v6  ;;  %6379 = vmatprep.mubr.bf16.mxu1 %v7112_v38  ;;  %v4197_v56 = vrot.slane %v4196_v15, 4  ;;  %v4210_v32 = vor.u32 %v4209_v25, %v4206_v41  ;;  %v4225_v18 = vrot.slane %v4223_v63, 5  ;;  %v4228_v6 = vshrl.u32 %v5846_v44, 16  ;;  %v8455_v38 = vld [vmem:[%s7352_s6 + $0xb8] sm:$0xf] }
  0xf6   : > { %6648 = vmatprep.subr.bf16.mxu1 %v7136_v2  ;;  %6584 = vmatmul.mubr.bf16.gmra.mrb[16].mxu0 %v5883_v34  ;;  %v4220_v51 = vor.u32 %v4219_v49, %v4215_v5  ;;  %v4237_v7 = vshll.u32 %v8442_v31, 16  ;;  %v4241_v59 = vshrl.u32 %v8442_v31, 16  ;;  %v4247_v0 = vshll.u32 %v8448_v45, 16  ;;  %v5852_v41 = vld [vmem:[%s7352_s6 + $0xc0] sm:$0xf] }
  0xf7   : > { %v4202_v40 = vsel %vm7388_vm2, %v4197_v56, %v4201_v27  ;;  %v4211_v57 = vrot.slane %v4210_v32, 4  ;;  %v4230_v1 = vrot.slane %v4228_v6, 4  ;;  %v4233_v44 = vrot.slane %v4231_v29, 5  ;;  %v8474_v25 = vld [vmem:[%s7352_s6 + $0xc4] sm:$0xf] }
  0xf8   : > { %v5884_v36 = vcombine.low %v4192_v48, %v4202_v40  ;;  %v4221_v42 = vrot.slane %v4220_v51, 4  ;;  %v4239_v16 = vrot.slane %v4237_v7, 5  ;;  %v4243_v22 = vrot.slane %v4241_v59, 4  ;;  %v7116_v40 = vld [vmem:[%s7352_s6 + $0x48] sm:$0xff]  }
  0xf9   : > { %6656 = vmatpush3.bf16.msra.mxu1 %v7136_v2  ;;  %v4216_v12 = vsel %vm7388_vm2, %v4211_v57, %v4215_v5  ;;  %v4249_v27 = vrot.slane %v4247_v0, 5  ;;  %v4252_v15 = vshrl.u32 %v5849_v60, 16  ;;  %v4234_v34 = vor.u32 %v4233_v44, %v4230_v1  ;;  %v7138_v0 = vld [vmem:[%s8930_s1 + $0x118] sm:$0xff]  }
  0xfa   : > { %6649 = vmatprep.subr.bf16.mxu1 %v7137_v19  ;;  %6587 = vmatprep.mubr.bf16.mxu0 %v5884_v36  ;;  %v4226_v63 = vsel %vm7388_vm2, %v4221_v42, %v4225_v18  ;;  %v4255_v48 = vshll.u32 %v5849_v60, 16  ;;  %v4261_v5 = vshll.u32 %v8455_v38, 16  ;;  %v4244_v56 = vor.u32 %v4243_v22, %v4239_v16  ;;  %v8482_v18 = vld [vmem:[%s7352_s6 + $0xc8] sm:$0x1]  ;;  %v5855_v60 = vld [vmem:[%s7352_s6 + $0xcc] sm:$0xf] }
  0xfb   : > { %v5885_v49 = vcombine.low %v4216_v12, %v4226_v63  ;;  %v4254_v2 = vrot.slane %v4252_v15, 4  ;;  %v4265_v32 = vshrl.u32 %v8455_v38, 16  ;;  %v4235_v6 = vrot.slane %v4234_v34, 4  ;;  %v8493_v12 = vld [vmem:[%s7352_s6 + $0xd0] sm:$0xf] }
  0xfc   : > { %6380 = vmatmul.mubr.bf16.gmra.mrb[4].mxu1 %v7113_v13  ;;  %v4257_v51 = vrot.slane %v4255_v48, 5  ;;  %v4263_v29 = vrot.slane %v4261_v5, 5  ;;  %v4271_v7 = vshll.u32 %v8464_v43, 16  ;;  %v4245_v59 = vrot.slane %v4244_v56, 4  ;;  %v7118_v48 = vld [vmem:[%s7352_s6 + $0x54] sm:$0xff]  }
  0xfd   : > { %6383 = vmatprep.mubr.bf16.mxu1 %v7115_v17  ;;  %6657 = vmatpush3.bf16.msra.mxu1 %v7137_v19  ;;  %v4267_v57 = vrot.slane %v4265_v32, 4  ;;  %v4276_v13 = vshrl.u32 %v5852_v41, 16  ;;  %v4279_v1 = vshll.u32 %v5852_v41, 16  ;;  %v4240_v36 = vsel %vm7388_vm2, %v4235_v6, %v4239_v16  ;;  %v8500_v16 = vld [vmem:[%s7352_s6 + $0xd4] sm:$0x1] }
  0xfe   : > { %6650 = vmatprep.subr.bf16.mxu1 %v7138_v0  ;;  %6588 = vmatmul.mubr.bf16.gmra.mrb[20].mxu0 %v5885_v49  ;;  %v4258_v42 = vor.u32 %v4257_v51, %v4254_v2  ;;  %v4273_v17 = vrot.slane %v4271_v7, 5  ;;  %v4285_v44 = vshll.u32 %v8474_v25, 16  ;;  %v4250_v41 = vsel %vm7388_vm2, %v4245_v59, %v4249_v27  ;;  %v5898_v56 = vld [vmem:[%s7352_s6 + $0x18] sm:$0xe]  ;;  %v7139_v27 = vld [vmem:[%s8930_s1 + $0x120] sm:$0xff]  }
  0xff   : > { %v4268_v22 = vor.u32 %v4267_v57, %v4263_v29  ;;  %v4278_v19 = vrot.slane %v4276_v13, 4  ;;  %v4281_v15 = vrot.slane %v4279_v1, 5  ;;  %v5886_v63 = vcombine.low %v4240_v36, %v4250_v41 }
 0x100   : > { %v4259_v34 = vrot.slane %v4258_v42, 4  ;;  %v4287_v5 = vrot.slane %v4285_v44, 5  ;;  %v4289_v49 = vshrl.u32 %v8474_v25, 16  ;;  %v4295_v6 = vshll.u32 %v8482_v18, 16  ;;  %v5899_v44 = vld [vmem:[%s7352_s6 + $0x24] sm:$0xe] }
 0x101   : > { %6658 = vmatpush3.bf16.msra.mxu1 %v7138_v0  ;;  %v4269_v2 = vrot.slane %v4268_v22, 4  ;;  %v4282_v32 = vor.u32 %v4281_v15, %v4278_v19  ;;  %v4300_v51 = vshrl.u32 %v5855_v60, 16  ;;  %6591 = vmatprep.mubr.bf16.mxu0 %v5886_v63  ;;  %v4303_v57 = vshll.u32 %v5855_v60, 16  ;;  %v5900_v63 = vld [vmem:[%s7352_s6 + $0x30] sm:$0xe] }
 0x102   : > { %6651 = vmatprep.subr.bf16.mxu1 %v7139_v27  ;;  %v4264_v7 = vsel %vm7388_vm2, %v4259_v34, %v4263_v29  ;;  %v4291_v59 = vrot.slane %v4289_v49, 4  ;;  %v4309_v13 = vshll.u32 %v8493_v12, 16  ;;  %v4297_v36 = vrot.slane %v4295_v6, 5  ;;  %v7140_v34 = vld [vmem:[%s8930_s1 + $0x128] sm:$0xff]   ;;  %v7119_v49 = vld [vmem:[%s7352_s6 + $0x60] sm:$0xff]  }
 0x103   : > { %v4274_v1 = vsel %vm7388_vm2, %v4269_v2, %v4273_v17  ;;  %v4283_v0 = vrot.slane %v4282_v32, 4  ;;  %v4302_v42 = vrot.slane %v4300_v51, 4  ;;  %v4305_v19 = vrot.slane %v4303_v57, 5  ;;  %v7141_v32 = vld [vmem:[%s7352_s6 + $0x1c] sm:$0xf] }
 0x104   : > { %6384 = vmatmul.mubr.bf16.gmra.mrb[8].mxu1 %v7116_v40  ;;  %v5887_v41 = vcombine.low %v4264_v7, %v4274_v1  ;;  %v4292_v22 = vor.u32 %v4291_v59, %v4287_v5  ;;  %v4311_v29 = vrot.slane %v4309_v13, 5  ;;  %v4313_v40 = vshrl.u32 %v8493_v12, 16  ;;  %v7142_v51 = vld [vmem:[%s7352_s6 + $0x20] sm:$0x1]  ;;  %v7121_v1 = vld [vmem:[%s7352_s6 + $0x6c] sm:$0xff]  }
 0x105   : > { %6387 = vmatprep.mubr.bf16.mxu1 %v7118_v48  ;;  %6659 = vmatpush3.bf16.msra.mxu1 %v7139_v27  ;;  %v4288_v60 = vsel %vm7388_vm2, %v4283_v0, %v4287_v5  ;;  %v4319_v17 = vshll.u32 %v8500_v16, 16  ;;  %v5914_v15 = vrot.slane %v5898_v56, 9  ;;  %v4306_v2 = vor.u32 %v4305_v19, %v4302_v42 }
 0x106   : > { %6652 = vmatprep.subr.bf16.mxu1 %v7140_v34  ;;  %6592 = vmatmul.mubr.bf16.gmra.mrb[24].mxu0 %v5887_v41  ;;  %v4293_v48 = vrot.slane %v4292_v22, 4  ;;  %v4711_v6 = vrot.slane %v7141_v32, 5  ;;  %v4714_v5 = vrot.slane %v7142_v51, 5  ;;  %v4315_v27 = vrot.slane %v4313_v40, 4  ;;  %v5901_v40 = vld [vmem:[%s7352_s6 + $0x3c] sm:$0xe] }
 0x107   : > { %v4321_v7 = vrot.slane %v4319_v17, 5  ;;  %v5915_v59 = vrot.slane %v5899_v44, 9  ;;  %v4718_v56 = vrot.slane %v8158_v46, 5  ;;  %v4307_v13 = vrot.slane %v4306_v2, 4  ;;  %v7143_v46 = vld [vmem:[%s8930_s1 + $0x130] sm:$0xff]  }
 0x108   : > { %v4298_v57 = vsel %vm7388_vm2, %v4293_v48, %v4297_v36  ;;  %v4712_v0 = vsel %vm7536_vm5, %v5914_v15, %v4711_v6  ;;  %v4713_v41 = vrot.slane %v4711_v6, 4  ;;  %v4316_v22 = vor.u32 %v4315_v27, %v4311_v29  ;;  %v5902_v6 = vld [vmem:[%s7352_s6 + $0x48] sm:$0xe] }
 0x109   : > { %6660 = vmatpush3.bf16.msra.mxu1 %v7140_v34  ;;  %v5888_v42 = vcombine.low %v4288_v60, %v4298_v57  ;;  %v8532_v19 = vsel %vm7536_vm5, %v5915_v59, %v4718_v56  ;;  %v4720_v44 = vrot.slane %v4718_v56, 4  ;;  %v4312_v36 = vsel %vm7388_vm2, %v4307_v13, %v4311_v29  ;;  %v5904_v57 = vld [vmem:[%s7352_s6 + $0x60] sm:$0xe]  ;;  %v7122_v13 = vld [vmem:[%s7352_s6 + $0x78] sm:$0xff]  }
 0x10a   : > { %6653 = vmatprep.subr.bf16.mxu1 %v7143_v46  ;;  %v4715_v60 = vsel %vm7536_vm5, %v4713_v41, %v4714_v5  ;;  %v4721_v17 = vrot.slane %v8161_v4, 5  ;;  %v5916_v15 = vrot.slane %v5900_v63, 9  ;;  %v4317_v34 = vrot.slane %v4316_v22, 4  ;;  %v7123_v22 = vld [vmem:[%s7352_s6 + $0x84] sm:$0xff]  }
 0x10b   : > { %6595 = vmatprep.mubr.bf16.mxu0 %v5888_v42  ;;  %v5946_v48 = vcombine.low %v4712_v0, %v4715_v60  ;;  %v4725_v2 = vrot.slane %v8182_v58, 5  ;;  %v4728_v32 = vrot.slane %v8188_v11, 5  ;;  %v5917_v51 = vrot.slane %v5901_v40, 9 }
 0x10c   : > { %6388 = vmatmul.mubr.bf16.gmra.mrb[12].mxu1 %v7119_v49  ;;  %v8548_v29 = vsel %vm7536_vm5, %v4720_v44, %v4721_v17  ;;  %v4732_v4 = vrot.slane %v8219_v55, 5  ;;  %v4735_v63 = vrot.slane %v8224_v61, 5  ;;  %v5903_v49 = vld [vmem:[%s7352_s6 + $0x54] sm:$0xe]  ;;  %v4322_v58 = vsel %vm7388_vm2, %v4317_v34, %v4321_v7  ;;  %v7144_v55 = vld [vmem:[%s8930_s1 + $0x138] sm:$0xff]  }
 0x10d   : > { %6391 = vmatprep.mubr.bf16.mxu1 %v7121_v1  ;;  %6661 = vmatpush3.bf16.msra.mxu1 %v7143_v46  ;;  %v5947_v11 = vcombine.low %v8532_v19, %v8548_v29  ;;  %v8559_v5 = vsel %vm7536_vm5, %v5916_v15, %v4725_v2  ;;  %v4727_v27 = vrot.slane %v4725_v2, 4  ;;  %v5889_v61 = vcombine.low %v4312_v36, %v4322_v58  ;;  %v5905_v36 = vld [vmem:[%s7352_s6 + $0x6c] sm:$0xe] }
 0x10e   : > { %6654 = vmatprep.subr.bf16.mxu1 %v7144_v55  ;;  %v8566_v59 = vsel %vm7536_vm5, %v5917_v51, %v4732_v4  ;;  %v4734_v7 = vrot.slane %v4732_v4, 4  ;;  %v5918_v56 = vrot.slane %v5902_v6, 9  ;;  %v4739_v0 = vrot.slane %v8258_v35, 5  ;;  %v5602_v2 = vld [vmem:[%s7352_s6 + $0x6c] sm:$0xf] }
 0x10f   : > { %v4729_v1 = vsel %vm7536_vm5, %v4727_v27, %v4728_v32  ;;  %v4742_v41 = vrot.slane %v8264_v10, 5  ;;  %v5919_v42 = vrot.slane %v5903_v49, 9  ;;  %6596 = vmatmul.mubr.bf16.gmra.mrb[28].mxu0 %v5889_v61  ;;  %v4746_v40 = vrot.slane %v8287_v9, 5  ;;  %v7145_v27 = vld [vmem:[%s7352_s6 + $0x70] sm:$0xf] }
 0x110   : > { %v5948_v19 = vcombine.low %v8559_v5, %v4729_v1  ;;  %v8578_v44 = vsel %vm7536_vm5, %v4734_v7, %v4735_v63  ;;  %v4749_v46 = vrot.slane %v8306_v24, 5  ;;  %6615 = vmatprep.mubr.bf16.mxu0 %v5946_v48  ;;  %v8587_v10 = vsel %vm7536_vm5, %v5918_v56, %v4739_v0  ;;  %v5906_v7 = vld [vmem:[%s7352_s6 + $0x78] sm:$0xe]  ;;  %v7124_v56 = vld [vmem:[%s7352_s6 + $0x90] sm:$0xff]  }
 0x111   : > { %6662 = vmatpush3.bf16.msra.mxu1 %v7144_v55  ;;  %v5949_v35 = vcombine.low %v8566_v59, %v8578_v44  ;;  %v4741_v60 = vrot.slane %v4739_v0, 4  ;;  %v5920_v17 = vrot.slane %v5904_v57, 9  ;;  %v8591_v15 = vsel %vm7536_vm5, %v5919_v42, %v4746_v40  ;;  %v7146_v0 = vld [vmem:[%s7352_s6 + $0x74] sm:$0x1]  ;;  %v5605_v42 = vld [vmem:[%s7352_s6 + $0x78] sm:$0xf] }
 0x112   : > { %v4748_v34 = vrot.slane %v4746_v40, 4  ;;  %v4753_v9 = vrot.slane %v8322_v39, 5  ;;  %v4756_v24 = vrot.slane %v8338_v28, 5  ;;  %v5921_v32 = vrot.slane %v5905_v36, 9 }
 0x113   : > { %v8598_v48 = vsel %vm7536_vm5, %v4741_v60, %v4742_v41  ;;  %v4760_v6 = vrot.slane %v8361_v50, 5  ;;  %v4763_v29 = vrot.slane %v8364_v21, 5  ;;  %v2493_v49 = vshrl.u32 %v5602_v2, 16 }
 0x114   : > { %6392 = vmatmul.mubr.bf16.gmra.mrb[16].mxu1 %v7122_v13  ;;  %v5950_v39 = vcombine.low %v8587_v10, %v8598_v48  ;;  %v8606_v28 = vsel %vm7536_vm5, %v4748_v34, %v4749_v46  ;;  %v8610_v51 = vsel %vm7536_vm5, %v5920_v17, %v4753_v9  ;;  %v4755_v4 = vrot.slane %v4753_v9, 4  ;;  %v5907_v17 = vld [vmem:[%s7352_s6 + $0x84] sm:$0xe] }
 0x115   : > { %6395 = vmatprep.mubr.bf16.mxu1 %v7123_v22  ;;  %v5951_v50 = vcombine.low %v8591_v15, %v8606_v28  ;;  %v8616_v21 = vsel %vm7536_vm5, %v5921_v32, %v4760_v6  ;;  %v4762_v63 = vrot.slane %v4760_v6, 4  ;;  %v2496_v5 = vshll.u32 %v5602_v2, 16  ;;  %v7125_v22 = vld [vmem:[%s7352_s6 + $0x9c] sm:$0xff]  }
 0x116   : > { %v8620_v58 = vsel %vm7536_vm5, %v4755_v4, %v4756_v24  ;;  %v2502_v55 = vshll.u32 %v7145_v27, 16  ;;  %v2506_v61 = vshrl.u32 %v7145_v27, 16  ;;  %v2495_v1 = vrot.slane %v2493_v49, 4 }
 0x117   : > { %v5952_v57 = vcombine.low %v8610_v51, %v8620_v58  ;;  %v8629_v13 = vsel %vm7536_vm5, %v4762_v63, %v4763_v29  ;;  %v2512_v41 = vshll.u32 %v7146_v0, 16  ;;  %6616 = vmatmul.mubr.bf16.vlgmr.msra.gmra.mrb[0].mxu0 %v5947_v11  ;;  %v2498_v46 = vrot.slane %v2496_v5, 5 }
 0x118   : > { %v5953_v40 = vcombine.low %v8616_v21, %v8629_v13  ;;  %v2504_v36 = vrot.slane %v2502_v55, 5  ;;  %v2508_v60 = vrot.slane %v2506_v61, 4  ;;  %6619 = vmatprep.mubr.bf16.mxu0 %v5948_v19  ;;  %v5922_v9 = vrot.slane %v5906_v7, 9  ;;  %v5608_v55 = vld [vmem:[%s7352_s6 + $0x84] sm:$0xf] }
 0x119   : > { %v2514_v34 = vrot.slane %v2512_v41, 5  ;;  %v4767_v24 = vrot.slane %v8379_v23, 5  ;;  %v4770_v2 = vrot.slane %v8385_v53, 5  ;;  %v2499_v32 = vor.u32 %v2498_v46, %v2495_v1  ;;  %v7126_v46 = vld [vmem:[%s7352_s6 + $0xa8] sm:$0xff]  }
 0x11a   : > { %v2509_v6 = vor.u32 %v2508_v60, %v2504_v36  ;;  %v2517_v29 = vshrl.u32 %v5605_v42, 16  ;;  %v2520_v11 = vshll.u32 %v5605_v42, 16  ;;  %v5923_v49 = vrot.slane %v5907_v17, 9  ;;  %v7153_v21 = vld [vmem:[%s7352_s6 + $0xac] sm:$0xf] }
 0x11b   : > { %v8641_v4 = vsel %vm7536_vm5, %v5922_v9, %v4767_v24  ;;  %v4769_v63 = vrot.slane %v4767_v24, 4  ;;  %v4774_v19 = vrot.slane %v8394_v52, 5  ;;  %v2500_v23 = vrot.slane %v2499_v32, 4 }
 0x11c   : > { %6396 = vmatmul.mubr.bf16.gmra.mrb[20].mxu1 %v7124_v56  ;;  %v2510_v5 = vrot.slane %v2509_v6, 4  ;;  %v2519_v27 = vrot.slane %v2517_v29, 4  ;;  %v2522_v53 = vrot.slane %v2520_v11, 5  ;;  %v4777_v52 = vrot.slane %v8399_v37, 5 }
 0x11d   : > { %6399 = vmatprep.mubr.bf16.mxu1 %v7125_v22  ;;  %v8647_v61 = vsel %vm7536_vm5, %v4769_v63, %v4770_v2  ;;  %v8651_v7 = vsel %vm7536_vm5, %v5923_v49, %v4774_v19  ;;  %v4776_v56 = vrot.slane %v4774_v19, 4  ;;  %v2505_v1 = vsel %vm7388_vm2, %v2500_v23, %v2504_v36  ;;  %v5908_v22 = vld [vmem:[%s7352_s6 + $0x90] sm:$0xe]  ;;  %v7127_v36 = vld [vmem:[%s7352_s6 + $0xb4] sm:$0xff]   ;;  %v7147_v2 = vld [vmem:[%s7352_s6 + $0x88] sm:$0xf] }
 0x11e   : > { %v2515_v0 = vsel %vm7388_vm2, %v2510_v5, %v2514_v34  ;;  %v5954_v41 = vcombine.low %v8641_v4, %v8647_v61  ;;  %v2523_v42 = vor.u32 %v2522_v53, %v2519_v27  ;;  %v2541_v37 = vshrl.u32 %v5608_v55, 16  ;;  %v7148_v63 = vld [vmem:[%s7352_s6 + $0x8c] sm:$0x1]  ;;  %v5611_v23 = vld [vmem:[%s7352_s6 + $0x90] sm:$0xf] }
 0x11f   : > { %v8662_v60 = vcombine.low %v2505_v1, %v2515_v0  ;;  %v8666_v17 = vsel %vm7536_vm5, %v4776_v56, %v4777_v52  ;;  %v2544_v9 = vshll.u32 %v5608_v55, 16  ;;  %6620 = vmatmul.mubr.bf16.gmra.mrb[4].mxu0 %v5949_v35  ;;  %v2550_v32 = vshll.u32 %v7147_v2, 16  ;;  %v5909_v1 = vld [vmem:[%s7352_s6 + $0x9c] sm:$0xe] }
 0x120   : > { %v2524_v34 = vrot.slane %v2523_v42, 4  ;;  %v5955_v24 = vcombine.low %v8651_v7, %v8666_v17  ;;  %v2554_v6 = vshrl.u32 %v7147_v2, 16  ;;  %6623 = vmatprep.mubr.bf16.mxu0 %v5950_v39  ;;  %v2543_v29 = vrot.slane %v2541_v37, 4  ;;  %v7128_v37 = vld [vmem:[%s7352_s6 + $0xc0] sm:$0xff]  }
 0x121   : > { %v2546_v11 = vrot.slane %v2544_v9, 5  ;;  %v2560_v49 = vshll.u32 %v7148_v63, 16  ;;  %v5924_v19 = vrot.slane %v5908_v22, 9  ;;  %v2552_v44 = vrot.slane %v2550_v32, 5  ;;  %v7150_v22 = vld [vmem:[%s7352_s6 + $0x98] sm:$0x1] }
 0x122   : > { %v2529_v59 = vsel %vm7388_vm2, %v2524_v34, %v7700_v3  ;;  %v2556_v35 = vrot.slane %v2554_v6, 4  ;;  %v4781_v5 = vrot.slane %v8410_v54, 5  ;;  %v4784_v27 = vrot.slane %v8415_v8, 5  ;;  %v5614_v32 = vld [vmem:[%s7352_s6 + $0x9c] sm:$0xf] }
 0x123   : > { %v8689_v10 = vcombine.low %v2529_v59, %v2539_v20  ;;  %v2547_v48 = vor.u32 %v2546_v11, %v2543_v29  ;;  %v2562_v39 = vrot.slane %v2560_v49, 5  ;;  %v2565_v55 = vshrl.u32 %v5611_v23, 16 }
 0x124   : > { %6400 = vmatmul.mubr.bf16.gmra.mrb[24].mxu1 %v7126_v46  ;;  %v2557_v3 = vor.u32 %v2556_v35, %v2552_v44  ;;  %v8694_v54 = vsel %vm7536_vm5, %v5924_v19, %v4781_v5  ;;  %v4783_v53 = vrot.slane %v4781_v5, 4  ;;  %v2568_v52 = vshll.u32 %v5611_v23, 16 }
 0x125   : > { %6403 = vmatprep.mubr.bf16.mxu1 %v7127_v36  ;;  %v2548_v56 = vrot.slane %v2547_v48, 4  ;;  %v2578_v20 = vshrl.u32 %v7149_v62, 16  ;;  %v2567_v42 = vrot.slane %v2565_v55, 4  ;;  %v2584_v46 = vshll.u32 %v7150_v22, 16  ;;  %v5910_v48 = vld [vmem:[%s7352_s6 + $0xa8] sm:$0xe] }
 0x126   : > { %v2558_v0 = vrot.slane %v2557_v3, 4  ;;  %v8700_v8 = vsel %vm7536_vm5, %v4783_v53, %v4784_v27  ;;  %v2570_v34 = vrot.slane %v2568_v52, 5  ;;  %v2576_v2 = vrot.slane %v2574_v26, 5  ;;  %v5617_v62 = vld [vmem:[%s7352_s6 + $0xa8] sm:$0xf] }
 0x127   : > { %v2553_v9 = vsel %vm7388_vm2, %v2548_v56, %v2552_v44  ;;  %v5956_v36 = vcombine.low %v8694_v54, %v8700_v8  ;;  %6624 = vmatmul.mubr.bf16.gmra.mrb[8].mxu0 %v5951_v50  ;;  %v2580_v29 = vrot.slane %v2578_v20, 4  ;;  %v2586_v11 = vrot.slane %v2584_v46, 5  ;;  %v7151_v50 = vld [vmem:[%s7352_s6 + $0xa0] sm:$0xf]  ;;  %v7152_v56 = vld [vmem:[%s7352_s6 + $0xa4] sm:$0x1] }
 0x128   : > { %v2563_v6 = vsel %vm7388_vm2, %v2558_v0, %v2562_v39  ;;  %v5925_v63 = vrot.slane %v5909_v1, 9  ;;  %6627 = vmatprep.mubr.bf16.mxu0 %v5952_v57  ;;  %v2571_v19 = vor.u32 %v2570_v34, %v2567_v42  ;;  %v4788_v23 = vrot.slane %v8428_v47, 5 }
 0x129   : > { %v5652_v49 = vcombine.low %v2553_v9, %v2563_v6  ;;  %v4791_v59 = vrot.slane %v8431_v14, 5  ;;  %v2581_v44 = vor.u32 %v2580_v29, %v2576_v2  ;;  %v2589_v15 = vshrl.u32 %v5614_v32, 16 }
 0x12a   : > { %v2592_v28 = vshll.u32 %v5614_v32, 16  ;;  %v2598_v35 = vshll.u32 %v7151_v50, 16  ;;  %v2572_v5 = vrot.slane %v2571_v19, 4  ;;  %v8722_v51 = vsel %vm7536_vm5, %v5925_v63, %v4788_v23  ;;  %v5911_v63 = vld [vmem:[%s7352_s6 + $0xb4] sm:$0xe] }
 0x12b   : > { %v4790_v58 = vrot.slane %v4788_v23, 4  ;;  %v2602_v57 = vshrl.u32 %v7151_v50, 16  ;;  %v2582_v47 = vrot.slane %v2581_v44, 4  ;;  %v2591_v14 = vrot.slane %v2589_v15, 4  ;;  %v7154_v19 = vld [vmem:[%s7352_s6 + $0xb0] sm:$0x1] }
 0x12c   : > { %6404 = vmatmul.mubr.bf16.gmra.mrb[28].mxu1 %v7128_v37  ;;  %v2594_v39 = vrot.slane %v2592_v28, 5  ;;  %v2600_v27 = vrot.slane %v2598_v35, 5  ;;  %v2577_v3 = vsel %vm7388_vm2, %v2572_v5, %v2576_v2  ;;  %v2608_v52 = vshll.u32 %v7152_v56, 16  ;;  %v5912_v56 = vld [vmem:[%s7352_s6 + $0xc0] sm:$0xe] }
 0x12d   : > { %6439 = vmatprep.mubr.bf16.mxu1 %v8662_v60  ;;  %v8730_v53 = vsel %vm7536_vm5, %v4790_v58, %v4791_v59  ;;  %v2604_v55 = vrot.slane %v2602_v57, 4  ;;  %v2587_v26 = vsel %vm7388_vm2, %v2582_v47, %v2586_v11  ;;  %v5926_v1 = vrot.slane %v5910_v48, 9  ;;  %v5620_v59 = vld [vmem:[%s7352_s6 + $0xb4] sm:$0xf] }
 0x12e   : > { %v5957_v60 = vcombine.low %v8722_v51, %v8730_v53  ;;  %v2595_v20 = vor.u32 %v2594_v39, %v2591_v14  ;;  %v5653_v0 = vcombine.low %v2577_v3, %v2587_v26  ;;  %v2610_v22 = vrot.slane %v2608_v52, 5 }
 0x12f   : > { %v2605_v42 = vor.u32 %v2604_v55, %v2600_v27  ;;  %v4795_v46 = vrot.slane %v8442_v31, 5  ;;  %6628 = vmatmul.mubr.bf16.gmra.mrb[12].mxu0 %v5953_v40  ;;  %v4798_v9 = vrot.slane %v8448_v45, 5  ;;  %v2613_v34 = vshrl.u32 %v5617_v62, 16 }
 0x130   : > { %v2596_v37 = vrot.slane %v2595_v20, 4  ;;  %v2616_v2 = vshll.u32 %v5617_v62, 16  ;;  %6631 = vmatprep.mubr.bf16.mxu0 %v5954_v41  ;;  %v2622_v13 = vshll.u32 %v7153_v21, 16  ;;  %v2626_v11 = vshrl.u32 %v7153_v21, 16 }
 0x131   : > { %v2606_v32 = vrot.slane %v2605_v42, 4  ;;  %v8748_v31 = vsel %vm7536_vm5, %v5926_v1, %v4795_v46  ;;  %v4797_v6 = vrot.slane %v4795_v46, 4  ;;  %v2615_v45 = vrot.slane %v2613_v34, 4  ;;  %v7156_v42 = vld [vmem:[%s7352_s6 + $0xbc] sm:$0x1] }
 0x132   : > { %v2601_v40 = vsel %vm7388_vm2, %v2596_v37, %v2600_v27  ;;  %v2618_v29 = vrot.slane %v2616_v2, 5  ;;  %v2624_v41 = vrot.slane %v2622_v13, 5  ;;  %v2632_v23 = vshll.u32 %v7154_v19, 16  ;;  %v7155_v27 = vld [vmem:[%s7352_s6 + $0xb8] sm:$0xf] }
 0x133   : > { %v2611_v4 = vsel %vm7388_vm2, %v2606_v32, %v2610_v22  ;;  %v8759_v61 = vsel %vm7536_vm5, %v4797_v6, %v4798_v9  ;;  %v5927_v35 = vrot.slane %v5911_v63, 9  ;;  %v4802_v5 = vrot.slane %v8455_v38, 5  ;;  %v5623_v46 = vld [vmem:[%s7352_s6 + $0xc0] sm:$0xf]  ;;  %v5913_v63 = vld [vmem:[%s7352_s6 + $0xcc] sm:$0xe] }
 0x134   : > { %6440 = vmatmul.mubr.bf16.vlgmr.msra.gmra.mrb[16].mxu1 %v8689_v10  ;;  %v5654_v44 = vcombine.low %v2601_v40, %v2611_v4  ;;  %v5958_v15 = vcombine.low %v8748_v31, %v8759_v61  ;;  %v2619_v28 = vor.u32 %v2618_v29, %v2615_v45  ;;  %v2628_v10 = vrot.slane %v2626_v11, 4  ;;  %v7157_v40 = vld [vmem:[%s7352_s6 + $0xc4] sm:$0xf] }
 0x135   : > { %6443 = vmatprep.mubr.bf16.mxu1 %v5652_v49  ;;  %v2634_v50 = vrot.slane %v2632_v23, 5  ;;  %v4805_v58 = vrot.slane %v8464_v43, 5  ;;  %v2637_v47 = vshrl.u32 %v5620_v59, 16  ;;  %v2640_v14 = vshll.u32 %v5620_v59, 16 }
 0x136   : > { %v2620_v57 = vrot.slane %v2619_v28, 4  ;;  %v2629_v48 = vor.u32 %v2628_v10, %v2624_v41  ;;  %v8769_v49 = vsel %vm7536_vm5, %v5927_v35, %v4802_v5  ;;  %v4804_v39 = vrot.slane %v4802_v5, 4 }
 0x137   : > { %v2646_v3 = vshll.u32 %v7155_v27, 16  ;;  %v2650_v55 = vshrl.u32 %v7155_v27, 16  ;;  %6632 = vmatmul.mubr.bf16.gmra.mrb[16].mxu0 %v5955_v24  ;;  %v2639_v52 = vrot.slane %v2637_v47, 4  ;;  %v2642_v62 = vrot.slane %v2640_v14, 5 }
 0x138   : > { %v2625_v38 = vsel %vm7388_vm2, %v2620_v57, %v2624_v41  ;;  %v2630_v43 = vrot.slane %v2629_v48, 4  ;;  %6635 = vmatprep.mubr.bf16.mxu0 %v5956_v36  ;;  %v4806_v26 = vsel %vm7536_vm5, %v4804_v39, %v4805_v58  ;;  %v2656_v22 = vshll.u32 %v7156_v42, 16  ;;  %v7158_v41 = vld [vmem:[%s7352_s6 + $0xc8] sm:$0x1]  ;;  %v8825_v42 = vld [vmem:[%s8931_s2] ss:$0 sm:$0xff] }
 0x139   : > { %v2648_v20 = vrot.slane %v2646_v3, 5  ;;  %v2652_v1 = vrot.slane %v2650_v55, 4  ;;  %v5959_v17 = vcombine.low %v8769_v49, %v4806_v26  ;;  %v2643_v24 = vor.u32 %v2642_v62, %v2639_v52 }
 0x13a   : > { %v2635_v7 = vsel %vm7388_vm2, %v2630_v43, %v2634_v50  ;;  %v5928_v37 = vrot.slane %v5912_v56, 9  ;;  %v2658_v8 = vrot.slane %v2656_v22, 5  ;;  %v4809_v36 = vrot.slane %v8474_v25, 5 }
 0x13b   : > { %v5655_v9 = vcombine.low %v2625_v38, %v2635_v7  ;;  %v2653_v54 = vor.u32 %v2652_v1, %v2648_v20  ;;  %v2644_v34 = vrot.slane %v2643_v24, 4  ;;  %v4812_v2 = vrot.slane %v8482_v18, 5 }
 0x13c   : > { %6444 = vmatmul.mubr.bf16.gmra.mrb[20].mxu1 %v5653_v0  ;;  %v2661_v32 = vshrl.u32 %v5623_v46, 16  ;;  %v2664_v31 = vshll.u32 %v5623_v46, 16  ;;  %v4810_v21 = vsel %vm7536_vm5, %v5928_v37, %v4809_v36  ;;  %v4811_v13 = vrot.slane %v4809_v36, 4 }
 0x13d   : > { %6447 = vmatprep.mubr.bf16.mxu1 %v5654_v44  ;;  %v2654_v6 = vrot.slane %v2653_v54, 4  ;;  %v2670_v0 = vshll.u32 %v7157_v40, 16  ;;  %v2649_v45 = vsel %vm7388_vm2, %v2644_v34, %v2648_v20  ;;  %v2674_v25 = vshrl.u32 %v7157_v40, 16 }
 0x13e   : > { %v2663_v29 = vrot.slane %v2661_v32, 4  ;;  %v2666_v11 = vrot.slane %v2664_v31, 5  ;;  %v4813_v4 = vsel %vm7536_vm5, %v4811_v13, %v4812_v2  ;;  %v2680_v19 = vshll.u32 %v7158_v41, 16 }
 0x13f   : > { %v2659_v18 = vsel %vm7388_vm2, %v2654_v6, %v2658_v8  ;;  %v2672_v61 = vrot.slane %v2670_v0, 5  ;;  %6636 = vmatmul.mubr.bf16.gmra.mrb[20].mxu0 %v5957_v60  ;;  %v5960_v59 = vcombine.low %v4810_v21, %v4813_v4  ;;  %v2676_v28 = vrot.slane %v2674_v25, 4 }
 0x140   : > { %v5656_v23 = vcombine.low %v2649_v45, %v2659_v18  ;;  %v2667_v44 = vor.u32 %v2666_v11, %v2663_v29  ;;  %6639 = vmatprep.mubr.bf16.mxu0 %v5958_v15  ;;  %v5929_v10 = vrot.slane %v5913_v63, 9  ;;  %v4816_v50 = vrot.slane %v8493_v12, 5 }
 0x141   : > { %v4819_v35 = vrot.slane %v8500_v16, 5  ;;  %v2677_v58 = vor.u32 %v2676_v28, %v2672_v61  ;;  %v2682_v57 = vrot.slane %v2680_v19, 5 }
 0x142   : > { %v2668_v5 = vrot.slane %v2667_v44, 4  ;;  %v4817_v48 = vsel %vm7536_vm5, %v5929_v10, %v4816_v50  ;;  %v4818_v47 = vrot.slane %v4816_v50, 4 }
 0x143   : > { %v2678_v53 = vrot.slane %v2677_v58, 4 }
 0x144   : > { %6448 = vmatmul.mubr.bf16.gmra.mrb[24].mxu1 %v5655_v9  ;;  %v2673_v51 = vsel %vm7388_vm2, %v2668_v5, %v2672_v61  ;;  %v4820_v60 = vsel %vm7536_vm5, %v4818_v47, %v4819_v35 }
 0x145   : > { %6451 = vmatprep.mubr.bf16.mxu1 %v5656_v23  ;;  %v2683_v12 = vsel %vm7388_vm2, %v2678_v53, %v2682_v57  ;;  %v5961_v16 = vcombine.low %v4817_v48, %v4820_v60 }
 0x146   : > { %v5657_v15 = vcombine.low %v2673_v51, %v2683_v12 }
 0x147   : > { %6640 = vmatmul.mubr.bf16.gmra.mrb[24].mxu0 %v5959_v17 }
 0x148   : > { %6643 = vmatprep.mubr.bf16.mxu0 %v5960_v59 }
 0x14c   : > { %6452 = vmatmul.mubr.bf16.gmra.mrb[28].mxu1 %v5657_v15 }
 0x14f   : > { %6644 = vmatmul.mubr.bf16.gmra.mrb[28].mxu0 %v5961_v16 }
 0x1c7   : > { %v6377_v14 = vpop.f32.mrb[0].mxu1 }
 0x1c8   : > { %v2093_v49 = vpop.f32.mrb[1].mxu1  ;;  %v6663_v22 = vadd.f32 %v6377_v14, %v8825_v42 }
 0x1c9   : > { %v6378_v39 = vpop.f32.mrb[2].mxu1  ;;  %v6665_v46 = vadd.f32 %v8825_v42, %v2093_v49 }
 0x1ca   : > { %v2096_v27 = vpop.f32.mrb[3].mxu1  ;;  %v6667_v17 = vadd.f32 %v6378_v39, %v8825_v42 }
 0x1cb   : > { %v6669_v9 = vadd.f32 %v8825_v42, %v2096_v27 }
 0x1cf   : > { %v6381_v3 = vpop.f32.mrb[4].mxu1 }
 0x1d0   : > { %v2109_v55 = vpop.f32.mrb[5].mxu1  ;;  %v6671_v40 = vadd.f32 %v6381_v3, %v8825_v42 }
 0x1d1   : > { %v6382_v56 = vpop.f32.mrb[6].mxu1  ;;  %v6673_v0 = vadd.f32 %v8825_v42, %v2109_v55 }
 0x1d2   : > { %v2112_v38 = vpop.f32.mrb[7].mxu1  ;;  %v6675_v11 = vadd.f32 %v6382_v56, %v8825_v42 }
 0x1d3   : > { %v6677_v18 = vadd.f32 %v8825_v42, %v2112_v38 }
 0x1d7   : > { %v6385_v43 = vpop.f32.mrb[8].mxu1 }
 0x1d8   : > { %v2125_v30 = vpop.f32.mrb[9].mxu1  ;;  %v6679_v35 = vadd.f32 %v6385_v43, %v8825_v42 }
 0x1d9   : > { %v6386_v52 = vpop.f32.mrb[10].mxu1  ;;  %v6681_v5 = vadd.f32 %v8825_v42, %v2125_v30 }
 0x1da   : > { %v2128_v62 = vpop.f32.mrb[11].mxu1  ;;  %v6683_v48 = vadd.f32 %v6386_v52, %v8825_v42 }
 0x1db   : > { %v6685_v53 = vadd.f32 %v8825_v42, %v2128_v62 }
 0x1df   : > { %v8814_v33 = vpop.f32.mrb[12].mxu1 }
 0x1e0   : > { %v8816_v26 = vpop.f32.mrb[13].mxu1  ;;  %v6687_v56 = vadd.f32 %v8814_v33, %v8825_v42 }
 0x1e1   : > { %v8818_v20 = vpop.f32.mrb[14].mxu1  ;;  %v6689_v30 = vadd.f32 %v8825_v42, %v8816_v26 }
 0x1e2   : > { %v8820_v1 = vpop.f32.mrb[15].mxu1 }
 0x1e3   : > { %v6693_v33 = vadd.f32 %v8825_v42, %v8820_v1 }
 0x1ea   : > { %v6617_v7 = vpop.f32.mrb[0].mxu0 }
 0x1eb   : > { %v6664_v24 = vadd.f32 %v6663_v22, %v6617_v7  ;;  %v4984_v37 = vpop.f32.mrb[1].mxu0  ;;  %v6691_v22 = vadd.f32 %v8818_v20, %v8825_v42 }
 0x1ec   : > { %v6666_v54 = vadd.f32 %v6665_v46, %v4984_v37  ;;  %v6618_v8 = vpop.f32.mrb[2].mxu0 }
 0x1ed   : > { %v5145_v36 = vmax.f32 %v6664_v24, 0.0  ;;  %v6668_v34 = vadd.f32 %v6667_v17, %v6618_v8  ;;  %v4987_v2 = vpop.f32.mrb[3].mxu0 }
 0x1ee   : > { %v5143_v32 = vmax.f32 %v6666_v54, 0.0  ;;  %v6670_v31 = vadd.f32 %v6669_v9, %v4987_v2 }
 0x1ef   : > { %v5146_v6 = vmax.f32 %v6668_v34, 0.0 }
 0x1f0   : > { %v5175_v21 = vmax.f32 %v5143_v32, %v5145_v36  ;;  %v5144_v13 = vmax.f32 %v6670_v31, 0.0 }
 0x1f2   : > { %5191 = vst [vmem:[#allocation2] sm:$0xff] %v5175_v21  ;;  %v5176_v45 = vmax.f32 %v5144_v13, %v5146_v6  ;;  %v6621_v29 = vpop.f32.mrb[4].mxu0 }
 0x1f3   : > { %v6672_v25 = vadd.f32 %v6671_v40, %v6621_v29  ;;  %v5000_v63 = vpop.f32.mrb[5].mxu0 }
 0x1f4   : > { %5192 = vst [vmem:[#allocation2 + $0x8] sm:$0xff] %v5176_v45  ;;  %v6674_v4 = vadd.f32 %v6673_v0, %v5000_v63  ;;  %v6622_v61 = vpop.f32.mrb[6].mxu0 }
 0x1f5   : > { %v5149_v41 = vmax.f32 %v6672_v25, 0.0  ;;  %v6676_v19 = vadd.f32 %v6675_v11, %v6622_v61  ;;  %v5003_v23 = vpop.f32.mrb[7].mxu0 }
 0x1f6   : > { %v5147_v59 = vmax.f32 %v6674_v4, 0.0  ;;  %v6678_v44 = vadd.f32 %v6677_v18, %v5003_v23 }
 0x1f7   : > { %v5150_v28 = vmax.f32 %v6676_v19, 0.0 }
 0x1f8   : > { %v5177_v10 = vmax.f32 %v5147_v59, %v5149_v41  ;;  %v5148_v50 = vmax.f32 %v6678_v44, 0.0 }
 0x1fa   : > { %5193 = vst [vmem:[#allocation2 + $0x10] sm:$0xff] %v5177_v10  ;;  %v5178_v58 = vmax.f32 %v5148_v50, %v5150_v28  ;;  %v6625_v57 = vpop.f32.mrb[8].mxu0 }
 0x1fb   : > { %v6680_v47 = vadd.f32 %v6679_v35, %v6625_v57  ;;  %v5016_v51 = vpop.f32.mrb[9].mxu0  ;;  %v5207_v38 = vld [vmem:[#allocation2] ss:$2 sm:$0xff]  ;;  %v5223_v43 = vld [vmem:[#allocation2 + $0x1] ss:$2 sm:$0xff] }
 0x1fc   : > { %5194 = vst [vmem:[#allocation2 + $0x18] sm:$0xff] %v5178_v58  ;;  %v6682_v60 = vadd.f32 %v6681_v5, %v5016_v51  ;;  %v6626_v12 = vpop.f32.mrb[10].mxu0  ;;  %v5238_v54 = vmax.f32 %v5207_v38, %v5223_v43 }
 0x1fd   : > { %v5153_v16 = vmax.f32 %v6680_v47, 0.0  ;;  %v6684_v15 = vadd.f32 %v6683_v48, %v6626_v12  ;;  %v5019_v14 = vpop.f32.mrb[11].mxu0 }
 0x1fe   : > { %v5151_v49 = vmax.f32 %v6682_v60, 0.0  ;;  %v6686_v39 = vadd.f32 %v6685_v53, %v5019_v14 }
 0x1ff   : > { %v5154_v27 = vmax.f32 %v6684_v15, 0.0 }
 0x200   : > { %v5179_v3 = vmax.f32 %v5151_v49, %v5153_v16  ;;  %v5152_v55 = vmax.f32 %v6686_v39, 0.0 }
 0x202   : > { %5195 = vst [vmem:[#allocation2 + $0x20] sm:$0xff] %v5179_v3  ;;  %v5180_v52 = vmax.f32 %v5152_v55, %v5154_v27  ;;  %v6629_v62 = vpop.f32.mrb[12].mxu0 }
 0x203   : > { %v6688_v46 = vadd.f32 %v6687_v56, %v6629_v62  ;;  %v5032_v7 = vpop.f32.mrb[13].mxu0  ;;  %v5209_v17 = vld [vmem:[#allocation2 + $0x10] ss:$2 sm:$0xff]  ;;  %v5225_v24 = vld [vmem:[#allocation2 + $0x11] ss:$2 sm:$0xff] }
 0x204   : > { %5196 = vst [vmem:[#allocation2 + $0x28] sm:$0xff] %v5180_v52  ;;  %v6690_v37 = vadd.f32 %v6689_v30, %v5032_v7  ;;  %v6630_v9 = vpop.f32.mrb[14].mxu0  ;;  %v5239_v26 = vmax.f32 %v5209_v17, %v5225_v24 }
 0x205   : > { %v5157_v8 = vmax.f32 %v6688_v46, 0.0  ;;  %v6692_v36 = vadd.f32 %v6691_v22, %v6630_v9  ;;  %v5035_v34 = vpop.f32.mrb[15].mxu0 }
 0x206   : > { %v5155_v32 = vmax.f32 %v6690_v37, 0.0  ;;  %v6694_v31 = vadd.f32 %v6693_v33, %v5035_v34  ;;  %v5979_v20 = vpack.c.bf16 %v5239_v26, %v5238_v54 }
 0x207   : > { %v6441_v2 = vpop.f32.mrb[16].mxu1  ;;  %v5158_v21 = vmax.f32 %v6692_v36, 0.0 }
 0x208   : > { %v2911_v6 = vpop.f32.mrb[17].mxu1  ;;  %v6695_v13 = vadd.f32 %v6441_v2, %v8825_v42  ;;  %v5181_v0 = vmax.f32 %v5155_v32, %v5157_v8  ;;  %v5156_v45 = vmax.f32 %v6694_v31, 0.0  ;;  %5980 = vst [vmem:[%s8852_s5] sm:$0xff] %v5979_v20  }
 0x209   : > { %v6442_v40 = vpop.f32.mrb[18].mxu1  ;;  %v6697_v1 = vadd.f32 %v8825_v42, %v2911_v6 }
 0x20a   : > { %v2914_v29 = vpop.f32.mrb[19].mxu1  ;;  %v6699_v11 = vadd.f32 %v6442_v40, %v8825_v42  ;;  %5197 = vst [vmem:[#allocation2 + $0x30] sm:$0xff] %v5181_v0  ;;  %v5182_v25 = vmax.f32 %v5156_v45, %v5158_v21  ;;  %v6633_v63 = vpop.f32.mrb[16].mxu0 }
 0x20b   : > { %v6701_v18 = vadd.f32 %v8825_v42, %v2914_v29  ;;  %v6696_v4 = vadd.f32 %v6695_v13, %v6633_v63  ;;  %v5048_v61 = vpop.f32.mrb[17].mxu0  ;;  %v5211_v12 = vld [vmem:[#allocation2 + $0x20] ss:$2 sm:$0xff]  ;;  %v5227_v16 = vld [vmem:[#allocation2 + $0x21] ss:$2 sm:$0xff] }
 0x20c   : > { %5198 = vst [vmem:[#allocation2 + $0x38] sm:$0xff] %v5182_v25  ;;  %v6698_v41 = vadd.f32 %v6697_v1, %v5048_v61  ;;  %v6634_v19 = vpop.f32.mrb[18].mxu0  ;;  %v5240_v43 = vmax.f32 %v5211_v12, %v5227_v16 }
 0x20d   : > { %v5161_v23 = vmax.f32 %v6696_v4, 0.0  ;;  %v6700_v59 = vadd.f32 %v6699_v11, %v6634_v19  ;;  %v5051_v44 = vpop.f32.mrb[19].mxu0 }
 0x20e   : > { %v5159_v10 = vmax.f32 %v6698_v41, 0.0  ;;  %v6702_v50 = vadd.f32 %v6701_v18, %v5051_v44 }
 0x20f   : > { %v6445_v28 = vpop.f32.mrb[20].mxu1  ;;  %v5162_v5 = vmax.f32 %v6700_v59, 0.0 }
 0x210   : > { %v2927_v35 = vpop.f32.mrb[21].mxu1  ;;  %v6703_v58 = vadd.f32 %v6445_v28, %v8825_v42  ;;  %v5183_v48 = vmax.f32 %v5159_v10, %v5161_v23  ;;  %v5160_v47 = vmax.f32 %v6702_v50, 0.0 }
 0x211   : > { %v6446_v57 = vpop.f32.mrb[22].mxu1  ;;  %v6705_v51 = vadd.f32 %v8825_v42, %v2927_v35 }
 0x212   : > { %v2930_v53 = vpop.f32.mrb[23].mxu1  ;;  %v6707_v60 = vadd.f32 %v6446_v57, %v8825_v42  ;;  %5199 = vst [vmem:[#allocation2 + $0x40] sm:$0xff] %v5183_v48  ;;  %v5184_v15 = vmax.f32 %v5160_v47, %v5162_v5  ;;  %v6637_v14 = vpop.f32.mrb[20].mxu0 }
 0x213   : > { %v6709_v49 = vadd.f32 %v8825_v42, %v2930_v53  ;;  %v6704_v39 = vadd.f32 %v6703_v58, %v6637_v14  ;;  %v5064_v27 = vpop.f32.mrb[21].mxu0  ;;  %v5213_v3 = vld [vmem:[#allocation2 + $0x30] ss:$2 sm:$0xff]  ;;  %v5229_v55 = vld [vmem:[#allocation2 + $0x31] ss:$2 sm:$0xff] }
 0x214   : > { %5200 = vst [vmem:[#allocation2 + $0x48] sm:$0xff] %v5184_v15  ;;  %v6706_v56 = vadd.f32 %v6705_v51, %v5064_v27  ;;  %v6638_v38 = vpop.f32.mrb[22].mxu0  ;;  %v5241_v30 = vmax.f32 %v5213_v3, %v5229_v55 }
 0x215   : > { %v5165_v52 = vmax.f32 %v6704_v39, 0.0  ;;  %v6708_v62 = vadd.f32 %v6707_v60, %v6638_v38  ;;  %v5067_v22 = vpop.f32.mrb[23].mxu0 }
 0x216   : > { %v5163_v7 = vmax.f32 %v6706_v56, 0.0  ;;  %v6710_v17 = vadd.f32 %v6709_v49, %v5067_v22  ;;  %v5984_v33 = vpack.c.bf16 %v5241_v30, %v5240_v43 }
 0x217   : > { %v6449_v46 = vpop.f32.mrb[24].mxu1  ;;  %v5166_v37 = vmax.f32 %v6708_v62, 0.0 }
 0x218   : > { %v2943_v24 = vpop.f32.mrb[25].mxu1  ;;  %v6711_v9 = vadd.f32 %v6449_v46, %v8825_v42  ;;  %v5185_v26 = vmax.f32 %v5163_v7, %v5165_v52  ;;  %v5164_v8 = vmax.f32 %v6710_v17, 0.0  ;;  %5996 = vst [vmem:[%s8852_s5 + $0x8] sm:$0xff] %v5984_v33  }
 0x219   : > { %v6450_v54 = vpop.f32.mrb[26].mxu1  ;;  %v6713_v36 = vadd.f32 %v8825_v42, %v2943_v24 }
 0x21a   : > { %v2946_v34 = vpop.f32.mrb[27].mxu1  ;;  %v6715_v2 = vadd.f32 %v6450_v54, %v8825_v42  ;;  %5201 = vst [vmem:[#allocation2 + $0x50] sm:$0xff] %v5185_v26  ;;  %v5186_v32 = vmax.f32 %v5164_v8, %v5166_v37  ;;  %v6641_v31 = vpop.f32.mrb[24].mxu0 }
 0x21b   : > { %v6717_v6 = vadd.f32 %v8825_v42, %v2946_v34  ;;  %v6712_v20 = vadd.f32 %v6711_v9, %v6641_v31  ;;  %v5080_v21 = vpop.f32.mrb[25].mxu0  ;;  %v5215_v28 = vld [vmem:[#allocation2 + $0x40] ss:$2 sm:$0xff]  ;;  %v5231_v10 = vld [vmem:[#allocation2 + $0x41] ss:$2 sm:$0xff] }
 0x21c   : > { %5202 = vst [vmem:[#allocation2 + $0x58] sm:$0xff] %v5186_v32  ;;  %v6714_v13 = vadd.f32 %v6713_v36, %v5080_v21  ;;  %v6642_v40 = vpop.f32.mrb[26].mxu0  ;;  %v5242_v60 = vmax.f32 %v5215_v28, %v5231_v10 }
 0x21d   : > { %v5169_v0 = vmax.f32 %v6712_v20, 0.0  ;;  %v6716_v45 = vadd.f32 %v6715_v2, %v6642_v40  ;;  %v5083_v1 = vpop.f32.mrb[27].mxu0 }
 0x21e   : > { %v5167_v11 = vmax.f32 %v6714_v13, 0.0  ;;  %v6718_v25 = vadd.f32 %v6717_v6, %v5083_v1 }
 0x21f   : > { %v6453_v29 = vpop.f32.mrb[28].mxu1  ;;  %v5170_v18 = vmax.f32 %v6716_v45, 0.0 }
 0x220   : > { %v2959_v63 = vpop.f32.mrb[29].mxu1  ;;  %v6719_v4 = vadd.f32 %v6453_v29, %v8825_v42  ;;  %v5187_v41 = vmax.f32 %v5167_v11, %v5169_v0  ;;  %v5168_v19 = vmax.f32 %v6718_v25, 0.0 }
 0x221   : > { %v6454_v61 = vpop.f32.mrb[30].mxu1  ;;  %v6721_v23 = vadd.f32 %v8825_v42, %v2959_v63 }
 0x222   : > { %v2962_v59 = vpop.f32.mrb[31].mxu1  ;;  %v6723_v44 = vadd.f32 %v6454_v61, %v8825_v42  ;;  %5203 = vst [vmem:[#allocation2 + $0x60] sm:$0xff] %v5187_v41  ;;  %v5188_v50 = vmax.f32 %v5168_v19, %v5170_v18  ;;  %v6645_v35 = vpop.f32.mrb[28].mxu0 }
 0x223   : > { %v6725_v5 = vadd.f32 %v8825_v42, %v2962_v59  ;;  %v6720_v58 = vadd.f32 %v6719_v4, %v6645_v35  ;;  %v5096_v57 = vpop.f32.mrb[29].mxu0  ;;  %v5217_v48 = vld [vmem:[#allocation2 + $0x50] ss:$2 sm:$0xff]  ;;  %v5233_v47 = vld [vmem:[#allocation2 + $0x51] ss:$2 sm:$0xff] }
 0x224   : > { %5204 = vst [vmem:[#allocation2 + $0x68] sm:$0xff] %v5188_v50  ;;  %v6722_v51 = vadd.f32 %v6721_v23, %v5096_v57  ;;  %v6646_v53 = vpop.f32.mrb[30].mxu0  ;;  %v5243_v12 = vmax.f32 %v5217_v48, %v5233_v47 }
 0x225   : > { %v5173_v16 = vmax.f32 %v6720_v58, 0.0  ;;  %v6724_v15 = vadd.f32 %v6723_v44, %v6646_v53  ;;  %v5099_v14 = vpop.f32.mrb[31].mxu0 }
 0x226   : > { %v5171_v49 = vmax.f32 %v6722_v51, 0.0  ;;  %v6726_v39 = vadd.f32 %v6725_v5, %v5099_v14  ;;  %v5989_v27 = vpack.c.bf16 %v5243_v12, %v5242_v60 }
 0x227   : > { %v5174_v3 = vmax.f32 %v6724_v15, 0.0 }
 0x228   : > { %v5189_v42 = vmax.f32 %v5171_v49, %v5173_v16  ;;  %v5172_v55 = vmax.f32 %v6726_v39, 0.0  ;;  %5997 = vst [vmem:[%s8852_s5 + $0x10] sm:$0xff] %v5989_v27  }
 0x22a   : > { %5205 = vst [vmem:[#allocation2 + $0x70] sm:$0xff] %v5189_v42  ;;  %v5190_v56 = vmax.f32 %v5172_v55, %v5174_v3 }
 0x22b   : > { %v5219_v38 = vld [vmem:[#allocation2 + $0x60] ss:$2 sm:$0xff]  ;;  %v5235_v43 = vld [vmem:[#allocation2 + $0x61] ss:$2 sm:$0xff] }
 0x22c   : > { %5206 = vst [vmem:[#allocation2 + $0x78] sm:$0xff] %v5190_v56  ;;  %v5244_v62 = vmax.f32 %v5219_v38, %v5235_v43 }
 0x233   : > { %v5221_v30 = vld [vmem:[#allocation2 + $0x70] ss:$2 sm:$0xff]  ;;  %v5237_v52 = vld [vmem:[#allocation2 + $0x71] ss:$2 sm:$0xff] }
 0x234   : > { %v5245_v22 = vmax.f32 %v5221_v30, %v5237_v52 }
 0x236   : > { %v5994_v46 = vpack.c.bf16 %v5245_v22, %v5244_v62 }
 0x238   : > { %5998 = vst [vmem:[%s8852_s5 + $0x18] sm:$0xff] %v5994_v46  }
 0x239   : > { %7172 = shalt.err (!%p7169_p5)
}
 0x23a   : > { %s7173_s26 = scalar_lea.hbm %s8876_s11, 512  ;;  %s7177_s6 = scalar_lea.hbm %s8932_s3, 1024 }
 0x23b   : > { %p7174_p6 = scmp.ne.s32.totalorder %s8876_s11, %s7173_s26  ;;  %p7178_p10 = scmp.lt.u32.totalorder %s8876_s11, %s8932_s3 }
 0x23c   : > { %p7179_p11 = scmp.lt.u32.totalorder %s7177_s6, %s7173_s26  ;;  %p7181_p13 = scmp.lt.u32.totalorder %s7173_s26, %s8876_s11 }
 0x23d   : > { %p7175_p7 = pnand %p7174_p6, %p7302_p4 }
 0x23e   : > { %p7180_p12 = por %p7179_p11, %p7178_p10 }
 0x23f   : > { %p7176_p9 = pneg %p7175_p7 }
 0x240   : > { %p7182_p0 = por %p7181_p13, %p7180_p12 }
 0x242   : > { %p7183_p1 = pnand %p7182_p0, %p7176_p9 }
 0x244   : > { %7186 = shalt.err (!%p7183_p1)
}
 0x245   : > { %s7240_s4 = smov 64   ;;  %s7241_s5 = smov 4  }
 0x246   : > { %6952 = dma.vmem_to_hbm [thread:$0]  (%p7302_p4), %s8878_s8, 512, %s8876_s11, %s8883_s18, %s7240_s4, %s7240_s4, %s7241_s5  }
 0x247 PF: > { %p6958_p2 = scmp.ge.s32.totalorder %s7237_s17, 2  ;;  %s5292_s7 = sand.u32 1, %s7217_s12  }
 0x248   : > { %s5293_s9 = scalar_lea.sflag [#allocation4], %s5292_s7 }
 0x249   : > { %p6955_p3 = pnand %p6958_p2, %p7309_p8 }
 0x24b   : > { %7212 = dma.done.wait (!%p6955_p3), %s5293_s9, 512  }
 0x24c   : > { %7214 = vsyncadd (!%p6955_p3), %s5293_s9, 4294966784  ;;  %s16_s17 = sadd.s32 1, %s7237_s17   ;;  %s8939_s12 = smov %s7221_s13 }
 0x24d   : > { %p13_p5 = scmp.ge.s32.totalorder %s16_s17, 4   ;;  %s8940_s13 = smov %s7225_s14 }
 0x24e   : > { %s8941_s14 = smov %s7315_s25  ;;  %s8942_s15 = smov %s7233_s16 }
 0x24f   : > { %s8943_s16 = smov %s8945_s20  ;;  %15 = sbr.rel (!%p13_p5) target bundleno = 4 (0x4), region = 98 }
 0x256   :  { %5298 = vsyncpa [#allocation4], 1 }
 0x257   :  { %5300 = vsyncpa [#allocation4 + $0x1], 1 }

</bundles_post_ra>
